<compile_context>
chip_gen: v6e
topology: v6e:2x2x1
jax: 0.10.0
libtpu: 0.0.40
codegen_flags: <defaults>
</compile_context>

<pallas_src>
import functools

import jax
import jax.numpy as jnp
from jax.experimental import pallas as pl
from jax.experimental.pallas import tpu as pltpu

K = 16          # number of filter taps (powers of the Laplacian), module default k=16
C = 16          # mlp_out == mlp_hid (mlp_nlayers == 1)
EPS = 1e-5      # BatchNorm1d eps (PyTorch default)


def _pearl_kernel(lap_ref, w_ref, wbig_ref, p_ref, gam_ref, bet_ref,
                  o_ref, stat_ref, *, g, n_taps):
    """Processes `g` graphs per grid step.

    lap_ref:  (g, N, N)       VMEM
    w_ref:    (g, N, M)       VMEM
    wbig_ref: (K, M, M*C)     VMEM  block-structured Linear weight
    p_ref:    (M*C, M*C)      VMEM  per-channel mean projector (includes 1/(N*M))
    gam_ref:  (1, M*C)        VMEM  BN gamma, tiled over M
    bet_ref:  (1, M*C)        VMEM  BN beta,  tiled over M
    o_ref:    (g, N, M*C)     VMEM  output block; also used as the f32 Linear accumulator
    stat_ref: (g, M*C)        VMEM  scratch for batched BN statistics
    """
    # --- filter1 fused with the Linear(k -> C) ------------------------------
    # tap_j = lap^j @ w ;  x += tap_j @ Wbig_j, accumulated directly into the
    # lane-dense (N, M*C) output block.  The g chains are independent, so the
    # scheduler can interleave their matmuls to hide MXU latency.
    curs = [w_ref[i] for i in range(g)]                       # (N, M) each
    w0 = wbig_ref[0]                                          # (M, M*C)
    for i in range(g):
        o_ref[i] = jnp.dot(curs[i], w0, preferred_element_type=jnp.float32)
    for j in range(1, n_taps):
        wj = wbig_ref[j]                                      # (M, M*C)
        for i in range(g):
            curs[i] = jnp.dot(lap_ref[i], curs[i],
                              preferred_element_type=jnp.float32)
            o_ref[i] = o_ref[i] + jnp.dot(curs[i], wj,
                                          preferred_element_type=jnp.float32)

    pmat = p_ref[...]        # (M*C, M*C)
    gam = gam_ref[...]       # (1, M*C)
    bet = bet_ref[...]       # (1, M*C)

    # --- BatchNorm1d (training mode), stats batched over the g graphs -------
    # Row sums (sublane reduce) land in stat_ref; ONE (g,128)@(128,128) matmul
    # against the projector yields every graph's per-channel mean (and the
    # same again for the biased variance, two-pass for numerical safety).
    for i in range(g):
        stat_ref[pl.ds(i, 1), :] = jnp.sum(o_ref[i], axis=0, keepdims=True)
    mu_all = jnp.dot(stat_ref[...], pmat,
                     preferred_element_type=jnp.float32)       # (g, M*C)
    for i in range(g):
        xc = o_ref[i] - mu_all[i:i + 1]
        stat_ref[pl.ds(i, 1), :] = jnp.sum(xc * xc, axis=0, keepdims=True)
    var_all = jnp.dot(stat_ref[...], pmat,
                      preferred_element_type=jnp.float32)      # (g, M*C)
    scale_all = jax.lax.rsqrt(var_all + EPS) * gam             # (g, M*C)

    for i in range(g):
        y = (o_ref[i] - mu_all[i:i + 1]) * scale_all[i:i + 1] + bet
        o_ref[i] = jnp.maximum(y, 0.0)                         # ReLU


def _pick_group(batch, n, m):
    """Graphs per grid step: amortize step overhead, respect VMEM, keep >=2 steps."""
    # Double-buffered per-graph blocks: Lap + W + output, f32.
    per_graph = 2 * 4 * (n * n + n * m + n * m * C)
    budget = 16 * 1024 * 1024          # safe headroom under v7x's 64 MiB VMEM
    g_mem = max(1, budget // max(per_graph, 1))
    g_cap = int(min(16, g_mem))
    if batch >= 2:
        # Keep the grid length >= 2 so a v7x chip's 2nd TensorCore gets work.
        g_cap = min(g_cap, batch // 2)
    g_cap = max(1, min(g_cap, batch))
    g = 1
    for cand in range(1, g_cap + 1):   # largest divisor of batch <= g_cap
        if batch % cand == 0:
            g = cand
    return g


def k_pearl_pe_block(Lap, W, lin_w, lin_b, gamma, beta):
    """filter1 + Linear + BatchNorm + ReLU for every graph.  Returns (B, N, M, C)."""
    B, N, _ = Lap.shape
    M = W.shape[-1]
    c_out, k_taps = lin_w.shape
    MC = M * c_out
    del lin_b   # Linear bias cancels exactly under training-mode BatchNorm.

    f32 = jnp.float32
    Lap = Lap.astype(f32)
    W = W.astype(f32)

    # Block-structured Linear weight: wbig[j, m, q*C+c] = lin_w[c, j] * (m == q),
    # so (N, M) taps @ wbig[j] give the Linear output already in (N, M*C) layout.
    wbig = jnp.einsum("ck,mq->kmqc", lin_w.astype(f32),
                      jnp.eye(M, dtype=f32)).reshape(k_taps, M, MC)
    # Per-channel mean projector / broadcaster: P[m*C+c, m'*C+c'] = (c==c')/(N*M).
    pmat = jnp.tile(jnp.eye(c_out, dtype=f32), (M, M)) / float(N * M)
    gam_b = jnp.tile(gamma.astype(f32), (M,)).reshape(1, MC)
    bet_b = jnp.tile(beta.astype(f32), (M,)).reshape(1, MC)

    G = _pick_group(B, N, M)
    kernel = functools.partial(_pearl_kernel, g=G, n_taps=k_taps)

    # VMEM footprint: double-buffered graph blocks + (also double-buffered)
    # shared parameter blocks + stat scratch, with 2x headroom, 4..48 MiB.
    grid_bytes = 2 * 4 * G * (N * N + N * M + N * MC)
    fixed_bytes = 2 * 4 * (k_taps * M * MC + MC * MC + 2 * MC) + 4 * G * MC
    vmem_limit = int(min(max(2 * (grid_bytes + fixed_bytes), 4 * 1024 * 1024),
                         48 * 1024 * 1024))

    cost = pl.CostEstimate(
        flops=int(B * ((k_taps - 1) * 2 * N * N * M      # Laplacian power chain
                       + k_taps * 2 * N * M * MC         # fused Linear
                       + 4 * MC * MC)),                  # BN projector matmuls
        transcendentals=int(B * MC),
        bytes_accessed=int(4 * (B * (N * N + N * M + N * MC)
                                + k_taps * M * MC + MC * MC + 2 * MC)))

    out = pl.pallas_call(
        kernel,
        out_shape=jax.ShapeDtypeStruct((B, N, MC), f32),
        grid=(B // G,),
        in_specs=[
            pl.BlockSpec((G, N, N), lambda b: (b, 0, 0)),          # Lap
            pl.BlockSpec((G, N, M), lambda b: (b, 0, 0)),          # W
            pl.BlockSpec((k_taps, M, MC), lambda b: (0, 0, 0)),    # wbig (shared)
            pl.BlockSpec((MC, MC), lambda b: (0, 0)),              # BN projector
            pl.BlockSpec((1, MC), lambda b: (0, 0)),               # gamma (tiled)
            pl.BlockSpec((1, MC), lambda b: (0, 0)),               # beta  (tiled)
        ],
        out_specs=pl.BlockSpec((G, N, MC), lambda b: (b, 0, 0)),
        scratch_shapes=[pltpu.VMEM((G, MC), f32)],                 # BN stats
        compiler_params=pltpu.CompilerParams(
            dimension_semantics=("parallel",),
            vmem_limit_bytes=vmem_limit),
        cost_estimate=cost,
    )(Lap, W, wbig, pmat, gam_b, bet_b)

    # (B, N, M*C) -> (B, N, M, C): trailing-dim split, no data movement.
    return out.reshape(B, N, M, c_out)


def phi_stub(W_list, edge_index, basis, final=False):
    # TODO(synk): `phi` is an external nn.Module injected at construction time
    # (not defined in this file); stand-in: mean-pool over the sample dim M and
    # concatenate graphs -> [N_sum, D_pe].
    del edge_index, basis, final
    return jnp.concatenate([w.mean(axis=1) for w in W_list], axis=0)


def k_pearl_pe_forward(Lap, W, edge_index, lin_w, lin_b, gamma, beta,
                       basis=True, final=False):
    blocks = k_pearl_pe_block(Lap, W, lin_w, lin_b, gamma, beta)     # (B, N, M, C)
    W_list = [blocks[b] for b in range(blocks.shape[0])]
    return phi_stub(W_list, edge_index, basis, final=final)


def reference_blocks(Lap, W, lin_w, lin_b, gamma, beta):
    """Pure-JAX reference mirroring the PyTorch forward (training-mode BN)."""
    hi = jax.lax.Precision.HIGHEST
    outs = []
    for b in range(Lap.shape[0]):
        s, w = Lap[b], W[b]
        cur = w
        taps = [cur]
        for _ in range(K - 1):
            cur = jnp.matmul(s, cur, precision=hi)
            taps.append(cur)
        filt = jnp.stack(taps, axis=-1)                                # (N, M, K)
        lin = jnp.einsum("nmk,ck->nmc", filt, lin_w, precision=hi) + lin_b
        mu = jnp.mean(lin, axis=(0, 1), keepdims=True)
        var = jnp.mean((lin - mu) ** 2, axis=(0, 1), keepdims=True)
        y = (lin - mu) / jnp.sqrt(var + EPS) * gamma + beta
        outs.append(jax.nn.relu(y))
    return jnp.stack(outs, axis=0)


if __name__ == "__main__":
    B, N, M = 8, 16, 8    # 8 graphs, 16 nodes, 8 random-feature columns

    key = jax.random.PRNGKey(0)
    k_lap, k_w, k_lw, k_lb, k_g, k_bt, k_e = jax.random.split(key, 7)

    # Symmetric, row-normalized "Laplacian"-like operators (spectral radius < 1
    # so that the 15 matrix powers stay numerically tame).
    R = jax.random.normal(k_lap, (B, N, N), jnp.float32)
    Lap = 0.5 * (R + jnp.swapaxes(R, -1, -2))
    Lap = Lap / (jnp.sum(jnp.abs(Lap), axis=-1, keepdims=True) + 1.0)
    W = jax.random.normal(k_w, (B, N, M), jnp.float32)

    # Deterministic parameter init (PyTorch-style Linear init, BN affine ~ (1, 0)).
    bound = 1.0 / (K ** 0.5)
    lin_w = jax.random.uniform(k_lw, (C, K), jnp.float32, -bound, bound)
    lin_b = jax.random.uniform(k_lb, (C,), jnp.float32, -bound, bound)
    gamma = 1.0 + 0.1 * jax.random.normal(k_g, (C,), jnp.float32)
    beta = 0.1 * jax.random.normal(k_bt, (C,), jnp.float32)

    edge_index = jax.random.randint(k_e, (2, 32), 0, N)   # COO connectivity (unused by stub phi)

    out = jax.block_until_ready(
        k_pearl_pe_forward(Lap, W, edge_index, lin_w, lin_b, gamma, beta))
    assert out.shape == (B * N, C)

    # Verify the Pallas hot path against the plain-JAX reference (which keeps
    # lin_b; it cancels exactly under training-mode BatchNorm).
    blocks = jax.block_until_ready(k_pearl_pe_block(Lap, W, lin_w, lin_b, gamma, beta))
    ref = reference_blocks(Lap, W, lin_w, lin_b, gamma, beta)
    assert jnp.allclose(blocks, ref, rtol=2e-3, atol=2e-3), \
        float(jnp.max(jnp.abs(blocks - ref)))

    print("KERNEL_OK")
</pallas_src>

<mosaic_0001>
module attributes {stable_mosaic.version = 11 : i64} {
  func.func @_pearl_kernel(%arg0: i32, %arg1: memref<4x16x16xf32, #tpu.memory_space<vmem>>, %arg2: memref<4x16x8xf32, #tpu.memory_space<vmem>>, %arg3: memref<16x8x128xf32, #tpu.memory_space<vmem>>, %arg4: memref<128x128xf32, #tpu.memory_space<vmem>>, %arg5: memref<1x128xf32, #tpu.memory_space<vmem>>, %arg6: memref<1x128xf32, #tpu.memory_space<vmem>>, %arg7: memref<4x16x128xf32, #tpu.memory_space<vmem>>, %arg8: memref<4x128xf32, #tpu.memory_space<vmem>>) attributes {dimension_semantics = [#tpu.dimension_semantics<parallel>], iteration_bounds = array<i64: 2>, scalar_prefetch = 0 : i64, scratch_operands = 1 : i64, tpu.core_type = #tpu.core_type<tc>, window_params = [{transform_indices = @transform_0, window_bounds = array<i64: 4, 16, 16>}, {transform_indices = @transform_1, window_bounds = array<i64: 4, 16, 8>}, {pipeline_mode = #tpu.pipeline_mode<synchronous>, transform_indices = @transform_2, window_bounds = array<i64: 16, 8, 128>}, {pipeline_mode = #tpu.pipeline_mode<synchronous>, transform_indices = @transform_3, window_bounds = array<i64: 128, 128>}, {pipeline_mode = #tpu.pipeline_mode<synchronous>, transform_indices = @transform_4, window_bounds = array<i64: 1, 128>}, {pipeline_mode = #tpu.pipeline_mode<synchronous>, transform_indices = @transform_5, window_bounds = array<i64: 1, 128>}, {transform_indices = @transform_6, window_bounds = array<i64: 4, 16, 128>}]} {
    %c0 = arith.constant 0 : index
    %c0_0 = arith.constant 0 : index
    %c0_1 = arith.constant 0 : index
    %0 = vector.load %arg2[%c0, %c0_0, %c0_1] : memref<4x16x8xf32, #tpu.memory_space<vmem>>, vector<1x16x8xf32>
    %1 = vector.shape_cast %0 : vector<1x16x8xf32> to vector<16x8xf32>
    %c1 = arith.constant 1 : index
    %c0_2 = arith.constant 0 : index
    %c0_3 = arith.constant 0 : index
    %2 = vector.load %arg2[%c1, %c0_2, %c0_3] : memref<4x16x8xf32, #tpu.memory_space<vmem>>, vector<1x16x8xf32>
    %3 = vector.shape_cast %2 : vector<1x16x8xf32> to vector<16x8xf32>
    %c2 = arith.constant 2 : index
    %c0_4 = arith.constant 0 : index
    %c0_5 = arith.constant 0 : index
    %4 = vector.load %arg2[%c2, %c0_4, %c0_5] : memref<4x16x8xf32, #tpu.memory_space<vmem>>, vector<1x16x8xf32>
    %5 = vector.shape_cast %4 : vector<1x16x8xf32> to vector<16x8xf32>
    %c3 = arith.constant 3 : index
    %c0_6 = arith.constant 0 : index
    %c0_7 = arith.constant 0 : index
    %6 = vector.load %arg2[%c3, %c0_6, %c0_7] : memref<4x16x8xf32, #tpu.memory_space<vmem>>, vector<1x16x8xf32>
    %7 = vector.shape_cast %6 : vector<1x16x8xf32> to vector<16x8xf32>
    %c0_8 = arith.constant 0 : index
    %c0_9 = arith.constant 0 : index
    %c0_10 = arith.constant 0 : index
    %8 = vector.load %arg3[%c0_8, %c0_9, %c0_10] : memref<16x8x128xf32, #tpu.memory_space<vmem>>, vector<1x8x128xf32>
    %9 = vector.shape_cast %8 : vector<1x8x128xf32> to vector<8x128xf32>
    %cst = arith.constant dense<0.000000e+00> : vector<16x128xf32>
    %10 = tpu.matmul %1, %9, %cst {dimension_numbers = #tpu.dot_dimension_numbers<[1], [0], [0], [1], [0, 0, 1, 1], [], []>} : vector<16x8xf32>, vector<8x128xf32>, vector<16x128xf32> -> vector<16x128xf32>
    %c0_11 = arith.constant 0 : index
    %c0_12 = arith.constant 0 : index
    %c0_13 = arith.constant 0 : index
    %11 = vector.load %arg7[%c0_11, %c0_12, %c0_13] : memref<4x16x128xf32, #tpu.memory_space<vmem>>, vector<1x16x128xf32>
    %12 = vector.shape_cast %11 : vector<1x16x128xf32> to vector<16x128xf32>
    %13 = vector.shape_cast %10 : vector<16x128xf32> to vector<1x16x128xf32>
    tpu.vector_store %arg7[%c0_11, %c0_12, %c0_13], %13 {strides = array<i32>} : memref<4x16x128xf32, #tpu.memory_space<vmem>>, vector<1x16x128xf32>,
    %cst_14 = arith.constant dense<0.000000e+00> : vector<16x128xf32>
    %14 = tpu.matmul %3, %9, %cst_14 {dimension_numbers = #tpu.dot_dimension_numbers<[1], [0], [0], [1], [0, 0, 1, 1], [], []>} : vector<16x8xf32>, vector<8x128xf32>, vector<16x128xf32> -> vector<16x128xf32>
    %c1_15 = arith.constant 1 : index
    %c0_16 = arith.constant 0 : index
    %c0_17 = arith.constant 0 : index
    %15 = vector.load %arg7[%c1_15, %c0_16, %c0_17] : memref<4x16x128xf32, #tpu.memory_space<vmem>>, vector<1x16x128xf32>
    %16 = vector.shape_cast %15 : vector<1x16x128xf32> to vector<16x128xf32>
    %17 = vector.shape_cast %14 : vector<16x128xf32> to vector<1x16x128xf32>
    tpu.vector_store %arg7[%c1_15, %c0_16, %c0_17], %17 {strides = array<i32>} : memref<4x16x128xf32, #tpu.memory_space<vmem>>, vector<1x16x128xf32>,
    %cst_18 = arith.constant dense<0.000000e+00> : vector<16x128xf32>
    %18 = tpu.matmul %5, %9, %cst_18 {dimension_numbers = #tpu.dot_dimension_numbers<[1], [0], [0], [1], [0, 0, 1, 1], [], []>} : vector<16x8xf32>, vector<8x128xf32>, vector<16x128xf32> -> vector<16x128xf32>
    %c2_19 = arith.constant 2 : index
    %c0_20 = arith.constant 0 : index
    %c0_21 = arith.constant 0 : index
    %19 = vector.load %arg7[%c2_19, %c0_20, %c0_21] : memref<4x16x128xf32, #tpu.memory_space<vmem>>, vector<1x16x128xf32>
    %20 = vector.shape_cast %19 : vector<1x16x128xf32> to vector<16x128xf32>
    %21 = vector.shape_cast %18 : vector<16x128xf32> to vector<1x16x128xf32>
    tpu.vector_store %arg7[%c2_19, %c0_20, %c0_21], %21 {strides = array<i32>} : memref<4x16x128xf32, #tpu.memory_space<vmem>>, vector<1x16x128xf32>,
    %cst_22 = arith.constant dense<0.000000e+00> : vector<16x128xf32>
    %22 = tpu.matmul %7, %9, %cst_22 {dimension_numbers = #tpu.dot_dimension_numbers<[1], [0], [0], [1], [0, 0, 1, 1], [], []>} : vector<16x8xf32>, vector<8x128xf32>, vector<16x128xf32> -> vector<16x128xf32>
    %c3_23 = arith.constant 3 : index
    %c0_24 = arith.constant 0 : index
    %c0_25 = arith.constant 0 : index
    %23 = vector.load %arg7[%c3_23, %c0_24, %c0_25] : memref<4x16x128xf32, #tpu.memory_space<vmem>>, vector<1x16x128xf32>
    %24 = vector.shape_cast %23 : vector<1x16x128xf32> to vector<16x128xf32>
    %25 = vector.shape_cast %22 : vector<16x128xf32> to vector<1x16x128xf32>
    tpu.vector_store %arg7[%c3_23, %c0_24, %c0_25], %25 {strides = array<i32>} : memref<4x16x128xf32, #tpu.memory_space<vmem>>, vector<1x16x128xf32>,
    %c1_26 = arith.constant 1 : index
    %c0_27 = arith.constant 0 : index
    %c0_28 = arith.constant 0 : index
    %26 = vector.load %arg3[%c1_26, %c0_27, %c0_28] : memref<16x8x128xf32, #tpu.memory_space<vmem>>, vector<1x8x128xf32>
    %27 = vector.shape_cast %26 : vector<1x8x128xf32> to vector<8x128xf32>
    %c0_29 = arith.constant 0 : index
    %c0_30 = arith.constant 0 : index
    %c0_31 = arith.constant 0 : index
    %28 = vector.load %arg1[%c0_29, %c0_30, %c0_31] : memref<4x16x16xf32, #tpu.memory_space<vmem>>, vector<1x16x16xf32>
    %29 = vector.shape_cast %28 : vector<1x16x16xf32> to vector<16x16xf32>
    %cst_32 = arith.constant dense<0.000000e+00> : vector<16x8xf32>
    %30 = tpu.matmul %29, %1, %cst_32 {dimension_numbers = #tpu.dot_dimension_numbers<[1], [0], [0], [1], [0, 0, 1, 1], [], []>} : vector<16x16xf32>, vector<16x8xf32>, vector<16x8xf32> -> vector<16x8xf32>
    %c0_33 = arith.constant 0 : index
    %c0_34 = arith.constant 0 : index
    %c0_35 = arith.constant 0 : index
    %31 = vector.load %arg7[%c0_33, %c0_34, %c0_35] : memref<4x16x128xf32, #tpu.memory_space<vmem>>, vector<1x16x128xf32>
    %32 = vector.shape_cast %31 : vector<1x16x128xf32> to vector<16x128xf32>
    %cst_36 = arith.constant dense<0.000000e+00> : vector<16x128xf32>
    %33 = tpu.matmul %30, %27, %cst_36 {dimension_numbers = #tpu.dot_dimension_numbers<[1], [0], [0], [1], [0, 0, 1, 1], [], []>} : vector<16x8xf32>, vector<8x128xf32>, vector<16x128xf32> -> vector<16x128xf32>
    %34 = arith.addf %32, %33 : vector<16x128xf32>
    %c0_37 = arith.constant 0 : index
    %c0_38 = arith.constant 0 : index
    %c0_39 = arith.constant 0 : index
    %35 = vector.load %arg7[%c0_37, %c0_38, %c0_39] : memref<4x16x128xf32, #tpu.memory_space<vmem>>, vector<1x16x128xf32>
    %36 = vector.shape_cast %35 : vector<1x16x128xf32> to vector<16x128xf32>
    %37 = vector.shape_cast %34 : vector<16x128xf32> to vector<1x16x128xf32>
    tpu.vector_store %arg7[%c0_37, %c0_38, %c0_39], %37 {strides = array<i32>} : memref<4x16x128xf32, #tpu.memory_space<vmem>>, vector<1x16x128xf32>,
    %c1_40 = arith.constant 1 : index
    %c0_41 = arith.constant 0 : index
    %c0_42 = arith.constant 0 : index
    %38 = vector.load %arg1[%c1_40, %c0_41, %c0_42] : memref<4x16x16xf32, #tpu.memory_space<vmem>>, vector<1x16x16xf32>
    %39 = vector.shape_cast %38 : vector<1x16x16xf32> to vector<16x16xf32>
    %cst_43 = arith.constant dense<0.000000e+00> : vector<16x8xf32>
    %40 = tpu.matmul %39, %3, %cst_43 {dimension_numbers = #tpu.dot_dimension_numbers<[1], [0], [0], [1], [0, 0, 1, 1], [], []>} : vector<16x16xf32>, vector<16x8xf32>, vector<16x8xf32> -> vector<16x8xf32>
    %c1_44 = arith.constant 1 : index
    %c0_45 = arith.constant 0 : index
    %c0_46 = arith.constant 0 : index
    %41 = vector.load %arg7[%c1_44, %c0_45, %c0_46] : memref<4x16x128xf32, #tpu.memory_space<vmem>>, vector<1x16x128xf32>
    %42 = vector.shape_cast %41 : vector<1x16x128xf32> to vector<16x128xf32>
    %cst_47 = arith.constant dense<0.000000e+00> : vector<16x128xf32>
    %43 = tpu.matmul %40, %27, %cst_47 {dimension_numbers = #tpu.dot_dimension_numbers<[1], [0], [0], [1], [0, 0, 1, 1], [], []>} : vector<16x8xf32>, vector<8x128xf32>, vector<16x128xf32> -> vector<16x128xf32>
    %44 = arith.addf %42, %43 : vector<16x128xf32>
    %c1_48 = arith.constant 1 : index
    %c0_49 = arith.constant 0 : index
    %c0_50 = arith.constant 0 : index
    %45 = vector.load %arg7[%c1_48, %c0_49, %c0_50] : memref<4x16x128xf32, #tpu.memory_space<vmem>>, vector<1x16x128xf32>
    %46 = vector.shape_cast %45 : vector<1x16x128xf32> to vector<16x128xf32>
    %47 = vector.shape_cast %44 : vector<16x128xf32> to vector<1x16x128xf32>
    tpu.vector_store %arg7[%c1_48, %c0_49, %c0_50], %47 {strides = array<i32>} : memref<4x16x128xf32, #tpu.memory_space<vmem>>, vector<1x16x128xf32>,
    %c2_51 = arith.constant 2 : index
    %c0_52 = arith.constant 0 : index
    %c0_53 = arith.constant 0 : index
    %48 = vector.load %arg1[%c2_51, %c0_52, %c0_53] : memref<4x16x16xf32, #tpu.memory_space<vmem>>, vector<1x16x16xf32>
    %49 = vector.shape_cast %48 : vector<1x16x16xf32> to vector<16x16xf32>
    %cst_54 = arith.constant dense<0.000000e+00> : vector<16x8xf32>
    %50 = tpu.matmul %49, %5, %cst_54 {dimension_numbers = #tpu.dot_dimension_numbers<[1], [0], [0], [1], [0, 0, 1, 1], [], []>} : vector<16x16xf32>, vector<16x8xf32>, vector<16x8xf32> -> vector<16x8xf32>
    %c2_55 = arith.constant 2 : index
    %c0_56 = arith.constant 0 : index
    %c0_57 = arith.constant 0 : index
    %51 = vector.load %arg7[%c2_55, %c0_56, %c0_57] : memref<4x16x128xf32, #tpu.memory_space<vmem>>, vector<1x16x128xf32>
    %52 = vector.shape_cast %51 : vector<1x16x128xf32> to vector<16x128xf32>
    %cst_58 = arith.constant dense<0.000000e+00> : vector<16x128xf32>
    %53 = tpu.matmul %50, %27, %cst_58 {dimension_numbers = #tpu.dot_dimension_numbers<[1], [0], [0], [1], [0, 0, 1, 1], [], []>} : vector<16x8xf32>, vector<8x128xf32>, vector<16x128xf32> -> vector<16x128xf32>
    %54 = arith.addf %52, %53 : vector<16x128xf32>
    %c2_59 = arith.constant 2 : index
    %c0_60 = arith.constant 0 : index
    %c0_61 = arith.constant 0 : index
    %55 = vector.load %arg7[%c2_59, %c0_60, %c0_61] : memref<4x16x128xf32, #tpu.memory_space<vmem>>, vector<1x16x128xf32>
    %56 = vector.shape_cast %55 : vector<1x16x128xf32> to vector<16x128xf32>
    %57 = vector.shape_cast %54 : vector<16x128xf32> to vector<1x16x128xf32>
    tpu.vector_store %arg7[%c2_59, %c0_60, %c0_61], %57 {strides = array<i32>} : memref<4x16x128xf32, #tpu.memory_space<vmem>>, vector<1x16x128xf32>,
    %c3_62 = arith.constant 3 : index
    %c0_63 = arith.constant 0 : index
    %c0_64 = arith.constant 0 : index
    %58 = vector.load %arg1[%c3_62, %c0_63, %c0_64] : memref<4x16x16xf32, #tpu.memory_space<vmem>>, vector<1x16x16xf32>
    %59 = vector.shape_cast %58 : vector<1x16x16xf32> to vector<16x16xf32>
    %cst_65 = arith.constant dense<0.000000e+00> : vector<16x8xf32>
    %60 = tpu.matmul %59, %7, %cst_65 {dimension_numbers = #tpu.dot_dimension_numbers<[1], [0], [0], [1], [0, 0, 1, 1], [], []>} : vector<16x16xf32>, vector<16x8xf32>, vector<16x8xf32> -> vector<16x8xf32>
    %c3_66 = arith.constant 3 : index
    %c0_67 = arith.constant 0 : index
    %c0_68 = arith.constant 0 : index
    %61 = vector.load %arg7[%c3_66, %c0_67, %c0_68] : memref<4x16x128xf32, #tpu.memory_space<vmem>>, vector<1x16x128xf32>
    %62 = vector.shape_cast %61 : vector<1x16x128xf32> to vector<16x128xf32>
    %cst_69 = arith.constant dense<0.000000e+00> : vector<16x128xf32>
    %63 = tpu.matmul %60, %27, %cst_69 {dimension_numbers = #tpu.dot_dimension_numbers<[1], [0], [0], [1], [0, 0, 1, 1], [], []>} : vector<16x8xf32>, vector<8x128xf32>, vector<16x128xf32> -> vector<16x128xf32>
    %64 = arith.addf %62, %63 : vector<16x128xf32>
    %c3_70 = arith.constant 3 : index
    %c0_71 = arith.constant 0 : index
    %c0_72 = arith.constant 0 : index
    %65 = vector.load %arg7[%c3_70, %c0_71, %c0_72] : memref<4x16x128xf32, #tpu.memory_space<vmem>>, vector<1x16x128xf32>
    %66 = vector.shape_cast %65 : vector<1x16x128xf32> to vector<16x128xf32>
    %67 = vector.shape_cast %64 : vector<16x128xf32> to vector<1x16x128xf32>
    tpu.vector_store %arg7[%c3_70, %c0_71, %c0_72], %67 {strides = array<i32>} : memref<4x16x128xf32, #tpu.memory_space<vmem>>, vector<1x16x128xf32>,
    %c2_73 = arith.constant 2 : index
    %c0_74 = arith.constant 0 : index
    %c0_75 = arith.constant 0 : index
    %68 = vector.load %arg3[%c2_73, %c0_74, %c0_75] : memref<16x8x128xf32, #tpu.memory_space<vmem>>, vector<1x8x128xf32>
    %69 = vector.shape_cast %68 : vector<1x8x128xf32> to vector<8x128xf32>
    %c0_76 = arith.constant 0 : index
    %c0_77 = arith.constant 0 : index
    %c0_78 = arith.constant 0 : index
    %70 = vector.load %arg1[%c0_76, %c0_77, %c0_78] : memref<4x16x16xf32, #tpu.memory_space<vmem>>, vector<1x16x16xf32>
    %71 = vector.shape_cast %70 : vector<1x16x16xf32> to vector<16x16xf32>
    %cst_79 = arith.constant dense<0.000000e+00> : vector<16x8xf32>
    %72 = tpu.matmul %71, %30, %cst_79 {dimension_numbers = #tpu.dot_dimension_numbers<[1], [0], [0], [1], [0, 0, 1, 1], [], []>} : vector<16x16xf32>, vector<16x8xf32>, vector<16x8xf32> -> vector<16x8xf32>
    %c0_80 = arith.constant 0 : index
    %c0_81 = arith.constant 0 : index
    %c0_82 = arith.constant 0 : index
    %73 = vector.load %arg7[%c0_80, %c0_81, %c0_82] : memref<4x16x128xf32, #tpu.memory_space<vmem>>, vector<1x16x128xf32>
    %74 = vector.shape_cast %73 : vector<1x16x128xf32> to vector<16x128xf32>
    %cst_83 = arith.constant dense<0.000000e+00> : vector<16x128xf32>
    %75 = tpu.matmul %72, %69, %cst_83 {dimension_numbers = #tpu.dot_dimension_numbers<[1], [0], [0], [1], [0, 0, 1, 1], [], []>} : vector<16x8xf32>, vector<8x128xf32>, vector<16x128xf32> -> vector<16x128xf32>
    %76 = arith.addf %74, %75 : vector<16x128xf32>
    %c0_84 = arith.constant 0 : index
    %c0_85 = arith.constant 0 : index
    %c0_86 = arith.constant 0 : index
    %77 = vector.load %arg7[%c0_84, %c0_85, %c0_86] : memref<4x16x128xf32, #tpu.memory_space<vmem>>, vector<1x16x128xf32>
    %78 = vector.shape_cast %77 : vector<1x16x128xf32> to vector<16x128xf32>
    %79 = vector.shape_cast %76 : vector<16x128xf32> to vector<1x16x128xf32>
    tpu.vector_store %arg7[%c0_84, %c0_85, %c0_86], %79 {strides = array<i32>} : memref<4x16x128xf32, #tpu.memory_space<vmem>>, vector<1x16x128xf32>,
    %c1_87 = arith.constant 1 : index
    %c0_88 = arith.constant 0 : index
    %c0_89 = arith.constant 0 : index
    %80 = vector.load %arg1[%c1_87, %c0_88, %c0_89] : memref<4x16x16xf32, #tpu.memory_space<vmem>>, vector<1x16x16xf32>
    %81 = vector.shape_cast %80 : vector<1x16x16xf32> to vector<16x16xf32>
    %cst_90 = arith.constant dense<0.000000e+00> : vector<16x8xf32>
    %82 = tpu.matmul %81, %40, %cst_90 {dimension_numbers = #tpu.dot_dimension_numbers<[1], [0], [0], [1], [0, 0, 1, 1], [], []>} : vector<16x16xf32>, vector<16x8xf32>, vector<16x8xf32> -> vector<16x8xf32>
    %c1_91 = arith.constant 1 : index
    %c0_92 = arith.constant 0 : index
    %c0_93 = arith.constant 0 : index
    %83 = vector.load %arg7[%c1_91, %c0_92, %c0_93] : memref<4x16x128xf32, #tpu.memory_space<vmem>>, vector<1x16x128xf32>
    %84 = vector.shape_cast %83 : vector<1x16x128xf32> to vector<16x128xf32>
    %cst_94 = arith.constant dense<0.000000e+00> : vector<16x128xf32>
    %85 = tpu.matmul %82, %69, %cst_94 {dimension_numbers = #tpu.dot_dimension_numbers<[1], [0], [0], [1], [0, 0, 1, 1], [], []>} : vector<16x8xf32>, vector<8x128xf32>, vector<16x128xf32> -> vector<16x128xf32>
    %86 = arith.addf %84, %85 : vector<16x128xf32>
    %c1_95 = arith.constant 1 : index
    %c0_96 = arith.constant 0 : index
    %c0_97 = arith.constant 0 : index
    %87 = vector.load %arg7[%c1_95, %c0_96, %c0_97] : memref<4x16x128xf32, #tpu.memory_space<vmem>>, vector<1x16x128xf32>
    %88 = vector.shape_cast %87 : vector<1x16x128xf32> to vector<16x128xf32>
    %89 = vector.shape_cast %86 : vector<16x128xf32> to vector<1x16x128xf32>
    tpu.vector_store %arg7[%c1_95, %c0_96, %c0_97], %89 {strides = array<i32>} : memref<4x16x128xf32, #tpu.memory_space<vmem>>, vector<1x16x128xf32>,
    %c2_98 = arith.constant 2 : index
    %c0_99 = arith.constant 0 : index
    %c0_100 = arith.constant 0 : index
    %90 = vector.load %arg1[%c2_98, %c0_99, %c0_100] : memref<4x16x16xf32, #tpu.memory_space<vmem>>, vector<1x16x16xf32>
    %91 = vector.shape_cast %90 : vector<1x16x16xf32> to vector<16x16xf32>
    %cst_101 = arith.constant dense<0.000000e+00> : vector<16x8xf32>
    %92 = tpu.matmul %91, %50, %cst_101 {dimension_numbers = #tpu.dot_dimension_numbers<[1], [0], [0], [1], [0, 0, 1, 1], [], []>} : vector<16x16xf32>, vector<16x8xf32>, vector<16x8xf32> -> vector<16x8xf32>
    %c2_102 = arith.constant 2 : index
    %c0_103 = arith.constant 0 : index
    %c0_104 = arith.constant 0 : index
    %93 = vector.load %arg7[%c2_102, %c0_103, %c0_104] : memref<4x16x128xf32, #tpu.memory_space<vmem>>, vector<1x16x128xf32>
    %94 = vector.shape_cast %93 : vector<1x16x128xf32> to vector<16x128xf32>
    %cst_105 = arith.constant dense<0.000000e+00> : vector<16x128xf32>
    %95 = tpu.matmul %92, %69, %cst_105 {dimension_numbers = #tpu.dot_dimension_numbers<[1], [0], [0], [1], [0, 0, 1, 1], [], []>} : vector<16x8xf32>, vector<8x128xf32>, vector<16x128xf32> -> vector<16x128xf32>
    %96 = arith.addf %94, %95 : vector<16x128xf32>
    %c2_106 = arith.constant 2 : index
    %c0_107 = arith.constant 0 : index
    %c0_108 = arith.constant 0 : index
    %97 = vector.load %arg7[%c2_106, %c0_107, %c0_108] : memref<4x16x128xf32, #tpu.memory_space<vmem>>, vector<1x16x128xf32>
    %98 = vector.shape_cast %97 : vector<1x16x128xf32> to vector<16x128xf32>
    %99 = vector.shape_cast %96 : vector<16x128xf32> to vector<1x16x128xf32>
    tpu.vector_store %arg7[%c2_106, %c0_107, %c0_108], %99 {strides = array<i32>} : memref<4x16x128xf32, #tpu.memory_space<vmem>>, vector<1x16x128xf32>,
    %c3_109 = arith.constant 3 : index
    %c0_110 = arith.constant 0 : index
    %c0_111 = arith.constant 0 : index
    %100 = vector.load %arg1[%c3_109, %c0_110, %c0_111] : memref<4x16x16xf32, #tpu.memory_space<vmem>>, vector<1x16x16xf32>
    %101 = vector.shape_cast %100 : vector<1x16x16xf32> to vector<16x16xf32>
    %cst_112 = arith.constant dense<0.000000e+00> : vector<16x8xf32>
    %102 = tpu.matmul %101, %60, %cst_112 {dimension_numbers = #tpu.dot_dimension_numbers<[1], [0], [0], [1], [0, 0, 1, 1], [], []>} : vector<16x16xf32>, vector<16x8xf32>, vector<16x8xf32> -> vector<16x8xf32>
    %c3_113 = arith.constant 3 : index
    %c0_114 = arith.constant 0 : index
    %c0_115 = arith.constant 0 : index
    %103 = vector.load %arg7[%c3_113, %c0_114, %c0_115] : memref<4x16x128xf32, #tpu.memory_space<vmem>>, vector<1x16x128xf32>
    %104 = vector.shape_cast %103 : vector<1x16x128xf32> to vector<16x128xf32>
    %cst_116 = arith.constant dense<0.000000e+00> : vector<16x128xf32>
    %105 = tpu.matmul %102, %69, %cst_116 {dimension_numbers = #tpu.dot_dimension_numbers<[1], [0], [0], [1], [0, 0, 1, 1], [], []>} : vector<16x8xf32>, vector<8x128xf32>, vector<16x128xf32> -> vector<16x128xf32>
    %106 = arith.addf %104, %105 : vector<16x128xf32>
    %c3_117 = arith.constant 3 : index
    %c0_118 = arith.constant 0 : index
    %c0_119 = arith.constant 0 : index
    %107 = vector.load %arg7[%c3_117, %c0_118, %c0_119] : memref<4x16x128xf32, #tpu.memory_space<vmem>>, vector<1x16x128xf32>
    %108 = vector.shape_cast %107 : vector<1x16x128xf32> to vector<16x128xf32>
    %109 = vector.shape_cast %106 : vector<16x128xf32> to vector<1x16x128xf32>
    tpu.vector_store %arg7[%c3_117, %c0_118, %c0_119], %109 {strides = array<i32>} : memref<4x16x128xf32, #tpu.memory_space<vmem>>, vector<1x16x128xf32>,
    %c3_120 = arith.constant 3 : index
    %c0_121 = arith.constant 0 : index
    %c0_122 = arith.constant 0 : index
    %110 = vector.load %arg3[%c3_120, %c0_121, %c0_122] : memref<16x8x128xf32, #tpu.memory_space<vmem>>, vector<1x8x128xf32>
    %111 = vector.shape_cast %110 : vector<1x8x128xf32> to vector<8x128xf32>
    %c0_123 = arith.constant 0 : index
    %c0_124 = arith.constant 0 : index
    %c0_125 = arith.constant 0 : index
    %112 = vector.load %arg1[%c0_123, %c0_124, %c0_125] : memref<4x16x16xf32, #tpu.memory_space<vmem>>, vector<1x16x16xf32>
    %113 = vector.shape_cast %112 : vector<1x16x16xf32> to vector<16x16xf32>
    %cst_126 = arith.constant dense<0.000000e+00> : vector<16x8xf32>
    %114 = tpu.matmul %113, %72, %cst_126 {dimension_numbers = #tpu.dot_dimension_numbers<[1], [0], [0], [1], [0, 0, 1, 1], [], []>} : vector<16x16xf32>, vector<16x8xf32>, vector<16x8xf32> -> vector<16x8xf32>
    %c0_127 = arith.constant 0 : index
    %c0_128 = arith.constant 0 : index
    %c0_129 = arith.constant 0 : index
    %115 = vector.load %arg7[%c0_127, %c0_128, %c0_129] : memref<4x16x128xf32, #tpu.memory_space<vmem>>, vector<1x16x128xf32>
    %116 = vector.shape_cast %115 : vector<1x16x128xf32> to vector<16x128xf32>
    %cst_130 = arith.constant dense<0.000000e+00> : vector<16x128xf32>
    %117 = tpu.matmul %114, %111, %cst_130 {dimension_numbers = #tpu.dot_dimension_numbers<[1], [0], [0], [1], [0, 0, 1, 1], [], []>} : vector<16x8xf32>, vector<8x128xf32>, vector<16x128xf32> -> vector<16x128xf32>
    %118 = arith.addf %116, %117 : vector<16x128xf32>
    %c0_131 = arith.constant 0 : index
    %c0_132 = arith.constant 0 : index
    %c0_133 = arith.constant 0 : index
    %119 = vector.load %arg7[%c0_131, %c0_132, %c0_133] : memref<4x16x128xf32, #tpu.memory_space<vmem>>, vector<1x16x128xf32>
    %120 = vector.shape_cast %119 : vector<1x16x128xf32> to vector<16x128xf32>
    %121 = vector.shape_cast %118 : vector<16x128xf32> to vector<1x16x128xf32>
    tpu.vector_store %arg7[%c0_131, %c0_132, %c0_133], %121 {strides = array<i32>} : memref<4x16x128xf32, #tpu.memory_space<vmem>>, vector<1x16x128xf32>,
    %c1_134 = arith.constant 1 : index
    %c0_135 = arith.constant 0 : index
    %c0_136 = arith.constant 0 : index
    %122 = vector.load %arg1[%c1_134, %c0_135, %c0_136] : memref<4x16x16xf32, #tpu.memory_space<vmem>>, vector<1x16x16xf32>
    %123 = vector.shape_cast %122 : vector<1x16x16xf32> to vector<16x16xf32>
    %cst_137 = arith.constant dense<0.000000e+00> : vector<16x8xf32>
    %124 = tpu.matmul %123, %82, %cst_137 {dimension_numbers = #tpu.dot_dimension_numbers<[1], [0], [0], [1], [0, 0, 1, 1], [], []>} : vector<16x16xf32>, vector<16x8xf32>, vector<16x8xf32> -> vector<16x8xf32>
    %c1_138 = arith.constant 1 : index
    %c0_139 = arith.constant 0 : index
    %c0_140 = arith.constant 0 : index
    %125 = vector.load %arg7[%c1_138, %c0_139, %c0_140] : memref<4x16x128xf32, #tpu.memory_space<vmem>>, vector<1x16x128xf32>
    %126 = vector.shape_cast %125 : vector<1x16x128xf32> to vector<16x128xf32>
    %cst_141 = arith.constant dense<0.000000e+00> : vector<16x128xf32>
    %127 = tpu.matmul %124, %111, %cst_141 {dimension_numbers = #tpu.dot_dimension_numbers<[1], [0], [0], [1], [0, 0, 1, 1], [], []>} : vector<16x8xf32>, vector<8x128xf32>, vector<16x128xf32> -> vector<16x128xf32>
    %128 = arith.addf %126, %127 : vector<16x128xf32>
    %c1_142 = arith.constant 1 : index
    %c0_143 = arith.constant 0 : index
    %c0_144 = arith.constant 0 : index
    %129 = vector.load %arg7[%c1_142, %c0_143, %c0_144] : memref<4x16x128xf32, #tpu.memory_space<vmem>>, vector<1x16x128xf32>
    %130 = vector.shape_cast %129 : vector<1x16x128xf32> to vector<16x128xf32>
    %131 = vector.shape_cast %128 : vector<16x128xf32> to vector<1x16x128xf32>
    tpu.vector_store %arg7[%c1_142, %c0_143, %c0_144], %131 {strides = array<i32>} : memref<4x16x128xf32, #tpu.memory_space<vmem>>, vector<1x16x128xf32>,
    %c2_145 = arith.constant 2 : index
    %c0_146 = arith.constant 0 : index
    %c0_147 = arith.constant 0 : index
    %132 = vector.load %arg1[%c2_145, %c0_146, %c0_147] : memref<4x16x16xf32, #tpu.memory_space<vmem>>, vector<1x16x16xf32>
    %133 = vector.shape_cast %132 : vector<1x16x16xf32> to vector<16x16xf32>
    %cst_148 = arith.constant dense<0.000000e+00> : vector<16x8xf32>
    %134 = tpu.matmul %133, %92, %cst_148 {dimension_numbers = #tpu.dot_dimension_numbers<[1], [0], [0], [1], [0, 0, 1, 1], [], []>} : vector<16x16xf32>, vector<16x8xf32>, vector<16x8xf32> -> vector<16x8xf32>
    %c2_149 = arith.constant 2 : index
    %c0_150 = arith.constant 0 : index
    %c0_151 = arith.constant 0 : index
    %135 = vector.load %arg7[%c2_149, %c0_150, %c0_151] : memref<4x16x128xf32, #tpu.memory_space<vmem>>, vector<1x16x128xf32>
    %136 = vector.shape_cast %135 : vector<1x16x128xf32> to vector<16x128xf32>
    %cst_152 = arith.constant dense<0.000000e+00> : vector<16x128xf32>
    %137 = tpu.matmul %134, %111, %cst_152 {dimension_numbers = #tpu.dot_dimension_numbers<[1], [0], [0], [1], [0, 0, 1, 1], [], []>} : vector<16x8xf32>, vector<8x128xf32>, vector<16x128xf32> -> vector<16x128xf32>
    %138 = arith.addf %136, %137 : vector<16x128xf32>
    %c2_153 = arith.constant 2 : index
    %c0_154 = arith.constant 0 : index
    %c0_155 = arith.constant 0 : index
    %139 = vector.load %arg7[%c2_153, %c0_154, %c0_155] : memref<4x16x128xf32, #tpu.memory_space<vmem>>, vector<1x16x128xf32>
    %140 = vector.shape_cast %139 : vector<1x16x128xf32> to vector<16x128xf32>
    %141 = vector.shape_cast %138 : vector<16x128xf32> to vector<1x16x128xf32>
    tpu.vector_store %arg7[%c2_153, %c0_154, %c0_155], %141 {strides = array<i32>} : memref<4x16x128xf32, #tpu.memory_space<vmem>>, vector<1x16x128xf32>,
    %c3_156 = arith.constant 3 : index
    %c0_157 = arith.constant 0 : index
    %c0_158 = arith.constant 0 : index
    %142 = vector.load %arg1[%c3_156, %c0_157, %c0_158] : memref<4x16x16xf32, #tpu.memory_space<vmem>>, vector<1x16x16xf32>
    %143 = vector.shape_cast %142 : vector<1x16x16xf32> to vector<16x16xf32>
    %cst_159 = arith.constant dense<0.000000e+00> : vector<16x8xf32>
    %144 = tpu.matmul %143, %102, %cst_159 {dimension_numbers = #tpu.dot_dimension_numbers<[1], [0], [0], [1], [0, 0, 1, 1], [], []>} : vector<16x16xf32>, vector<16x8xf32>, vector<16x8xf32> -> vector<16x8xf32>
    %c3_160 = arith.constant 3 : index
    %c0_161 = arith.constant 0 : index
    %c0_162 = arith.constant 0 : index
    %145 = vector.load %arg7[%c3_160, %c0_161, %c0_162] : memref<4x16x128xf32, #tpu.memory_space<vmem>>, vector<1x16x128xf32>
    %146 = vector.shape_cast %145 : vector<1x16x128xf32> to vector<16x128xf32>
    %cst_163 = arith.constant dense<0.000000e+00> : vector<16x128xf32>
    %147 = tpu.matmul %144, %111, %cst_163 {dimension_numbers = #tpu.dot_dimension_numbers<[1], [0], [0], [1], [0, 0, 1, 1], [], []>} : vector<16x8xf32>, vector<8x128xf32>, vector<16x128xf32> -> vector<16x128xf32>
    %148 = arith.addf %146, %147 : vector<16x128xf32>
    %c3_164 = arith.constant 3 : index
    %c0_165 = arith.constant 0 : index
    %c0_166 = arith.constant 0 : index
    %149 = vector.load %arg7[%c3_164, %c0_165, %c0_166] : memref<4x16x128xf32, #tpu.memory_space<vmem>>, vector<1x16x128xf32>
    %150 = vector.shape_cast %149 : vector<1x16x128xf32> to vector<16x128xf32>
    %151 = vector.shape_cast %148 : vector<16x128xf32> to vector<1x16x128xf32>
    tpu.vector_store %arg7[%c3_164, %c0_165, %c0_166], %151 {strides = array<i32>} : memref<4x16x128xf32, #tpu.memory_space<vmem>>, vector<1x16x128xf32>,
    %c4 = arith.constant 4 : index
    %c0_167 = arith.constant 0 : index
    %c0_168 = arith.constant 0 : index
    %152 = vector.load %arg3[%c4, %c0_167, %c0_168] : memref<16x8x128xf32, #tpu.memory_space<vmem>>, vector<1x8x128xf32>
    %153 = vector.shape_cast %152 : vector<1x8x128xf32> to vector<8x128xf32>
    %c0_169 = arith.constant 0 : index
    %c0_170 = arith.constant 0 : index
    %c0_171 = arith.constant 0 : index
    %154 = vector.load %arg1[%c0_169, %c0_170, %c0_171] : memref<4x16x16xf32, #tpu.memory_space<vmem>>, vector<1x16x16xf32>
    %155 = vector.shape_cast %154 : vector<1x16x16xf32> to vector<16x16xf32>
    %cst_172 = arith.constant dense<0.000000e+00> : vector<16x8xf32>
    %156 = tpu.matmul %155, %114, %cst_172 {dimension_numbers = #tpu.dot_dimension_numbers<[1], [0], [0], [1], [0, 0, 1, 1], [], []>} : vector<16x16xf32>, vector<16x8xf32>, vector<16x8xf32> -> vector<16x8xf32>
    %c0_173 = arith.constant 0 : index
    %c0_174 = arith.constant 0 : index
    %c0_175 = arith.constant 0 : index
    %157 = vector.load %arg7[%c0_173, %c0_174, %c0_175] : memref<4x16x128xf32, #tpu.memory_space<vmem>>, vector<1x16x128xf32>
    %158 = vector.shape_cast %157 : vector<1x16x128xf32> to vector<16x128xf32>
    %cst_176 = arith.constant dense<0.000000e+00> : vector<16x128xf32>
    %159 = tpu.matmul %156, %153, %cst_176 {dimension_numbers = #tpu.dot_dimension_numbers<[1], [0], [0], [1], [0, 0, 1, 1], [], []>} : vector<16x8xf32>, vector<8x128xf32>, vector<16x128xf32> -> vector<16x128xf32>
    %160 = arith.addf %158, %159 : vector<16x128xf32>
    %c0_177 = arith.constant 0 : index
    %c0_178 = arith.constant 0 : index
    %c0_179 = arith.constant 0 : index
    %161 = vector.load %arg7[%c0_177, %c0_178, %c0_179] : memref<4x16x128xf32, #tpu.memory_space<vmem>>, vector<1x16x128xf32>
    %162 = vector.shape_cast %161 : vector<1x16x128xf32> to vector<16x128xf32>
    %163 = vector.shape_cast %160 : vector<16x128xf32> to vector<1x16x128xf32>
    tpu.vector_store %arg7[%c0_177, %c0_178, %c0_179], %163 {strides = array<i32>} : memref<4x16x128xf32, #tpu.memory_space<vmem>>, vector<1x16x128xf32>,
    %c1_180 = arith.constant 1 : index
    %c0_181 = arith.constant 0 : index
    %c0_182 = arith.constant 0 : index
    %164 = vector.load %arg1[%c1_180, %c0_181, %c0_182] : memref<4x16x16xf32, #tpu.memory_space<vmem>>, vector<1x16x16xf32>
    %165 = vector.shape_cast %164 : vector<1x16x16xf32> to vector<16x16xf32>
    %cst_183 = arith.constant dense<0.000000e+00> : vector<16x8xf32>
    %166 = tpu.matmul %165, %124, %cst_183 {dimension_numbers = #tpu.dot_dimension_numbers<[1], [0], [0], [1], [0, 0, 1, 1], [], []>} : vector<16x16xf32>, vector<16x8xf32>, vector<16x8xf32> -> vector<16x8xf32>
    %c1_184 = arith.constant 1 : index
    %c0_185 = arith.constant 0 : index
    %c0_186 = arith.constant 0 : index
    %167 = vector.load %arg7[%c1_184, %c0_185, %c0_186] : memref<4x16x128xf32, #tpu.memory_space<vmem>>, vector<1x16x128xf32>
    %168 = vector.shape_cast %167 : vector<1x16x128xf32> to vector<16x128xf32>
    %cst_187 = arith.constant dense<0.000000e+00> : vector<16x128xf32>
    %169 = tpu.matmul %166, %153, %cst_187 {dimension_numbers = #tpu.dot_dimension_numbers<[1], [0], [0], [1], [0, 0, 1, 1], [], []>} : vector<16x8xf32>, vector<8x128xf32>, vector<16x128xf32> -> vector<16x128xf32>
    %170 = arith.addf %168, %169 : vector<16x128xf32>
    %c1_188 = arith.constant 1 : index
    %c0_189 = arith.constant 0 : index
    %c0_190 = arith.constant 0 : index
    %171 = vector.load %arg7[%c1_188, %c0_189, %c0_190] : memref<4x16x128xf32, #tpu.memory_space<vmem>>, vector<1x16x128xf32>
    %172 = vector.shape_cast %171 : vector<1x16x128xf32> to vector<16x128xf32>
    %173 = vector.shape_cast %170 : vector<16x128xf32> to vector<1x16x128xf32>
    tpu.vector_store %arg7[%c1_188, %c0_189, %c0_190], %173 {strides = array<i32>} : memref<4x16x128xf32, #tpu.memory_space<vmem>>, vector<1x16x128xf32>,
    %c2_191 = arith.constant 2 : index
    %c0_192 = arith.constant 0 : index
    %c0_193 = arith.constant 0 : index
    %174 = vector.load %arg1[%c2_191, %c0_192, %c0_193] : memref<4x16x16xf32, #tpu.memory_space<vmem>>, vector<1x16x16xf32>
    %175 = vector.shape_cast %174 : vector<1x16x16xf32> to vector<16x16xf32>
    %cst_194 = arith.constant dense<0.000000e+00> : vector<16x8xf32>
    %176 = tpu.matmul %175, %134, %cst_194 {dimension_numbers = #tpu.dot_dimension_numbers<[1], [0], [0], [1], [0, 0, 1, 1], [], []>} : vector<16x16xf32>, vector<16x8xf32>, vector<16x8xf32> -> vector<16x8xf32>
    %c2_195 = arith.constant 2 : index
    %c0_196 = arith.constant 0 : index
    %c0_197 = arith.constant 0 : index
    %177 = vector.load %arg7[%c2_195, %c0_196, %c0_197] : memref<4x16x128xf32, #tpu.memory_space<vmem>>, vector<1x16x128xf32>
    %178 = vector.shape_cast %177 : vector<1x16x128xf32> to vector<16x128xf32>
    %cst_198 = arith.constant dense<0.000000e+00> : vector<16x128xf32>
    %179 = tpu.matmul %176, %153, %cst_198 {dimension_numbers = #tpu.dot_dimension_numbers<[1], [0], [0], [1], [0, 0, 1, 1], [], []>} : vector<16x8xf32>, vector<8x128xf32>, vector<16x128xf32> -> vector<16x128xf32>
    %180 = arith.addf %178, %179 : vector<16x128xf32>
    %c2_199 = arith.constant 2 : index
    %c0_200 = arith.constant 0 : index
    %c0_201 = arith.constant 0 : index
    %181 = vector.load %arg7[%c2_199, %c0_200, %c0_201] : memref<4x16x128xf32, #tpu.memory_space<vmem>>, vector<1x16x128xf32>
    %182 = vector.shape_cast %181 : vector<1x16x128xf32> to vector<16x128xf32>
    %183 = vector.shape_cast %180 : vector<16x128xf32> to vector<1x16x128xf32>
    tpu.vector_store %arg7[%c2_199, %c0_200, %c0_201], %183 {strides = array<i32>} : memref<4x16x128xf32, #tpu.memory_space<vmem>>, vector<1x16x128xf32>,
    %c3_202 = arith.constant 3 : index
    %c0_203 = arith.constant 0 : index
    %c0_204 = arith.constant 0 : index
    %184 = vector.load %arg1[%c3_202, %c0_203, %c0_204] : memref<4x16x16xf32, #tpu.memory_space<vmem>>, vector<1x16x16xf32>
    %185 = vector.shape_cast %184 : vector<1x16x16xf32> to vector<16x16xf32>
    %cst_205 = arith.constant dense<0.000000e+00> : vector<16x8xf32>
    %186 = tpu.matmul %185, %144, %cst_205 {dimension_numbers = #tpu.dot_dimension_numbers<[1], [0], [0], [1], [0, 0, 1, 1], [], []>} : vector<16x16xf32>, vector<16x8xf32>, vector<16x8xf32> -> vector<16x8xf32>
    %c3_206 = arith.constant 3 : index
    %c0_207 = arith.constant 0 : index
    %c0_208 = arith.constant 0 : index
    %187 = vector.load %arg7[%c3_206, %c0_207, %c0_208] : memref<4x16x128xf32, #tpu.memory_space<vmem>>, vector<1x16x128xf32>
    %188 = vector.shape_cast %187 : vector<1x16x128xf32> to vector<16x128xf32>
    %cst_209 = arith.constant dense<0.000000e+00> : vector<16x128xf32>
    %189 = tpu.matmul %186, %153, %cst_209 {dimension_numbers = #tpu.dot_dimension_numbers<[1], [0], [0], [1], [0, 0, 1, 1], [], []>} : vector<16x8xf32>, vector<8x128xf32>, vector<16x128xf32> -> vector<16x128xf32>
    %190 = arith.addf %188, %189 : vector<16x128xf32>
    %c3_210 = arith.constant 3 : index
    %c0_211 = arith.constant 0 : index
    %c0_212 = arith.constant 0 : index
    %191 = vector.load %arg7[%c3_210, %c0_211, %c0_212] : memref<4x16x128xf32, #tpu.memory_space<vmem>>, vector<1x16x128xf32>
    %192 = vector.shape_cast %191 : vector<1x16x128xf32> to vector<16x128xf32>
    %193 = vector.shape_cast %190 : vector<16x128xf32> to vector<1x16x128xf32>
    tpu.vector_store %arg7[%c3_210, %c0_211, %c0_212], %193 {strides = array<i32>} : memref<4x16x128xf32, #tpu.memory_space<vmem>>, vector<1x16x128xf32>,
    %c5 = arith.constant 5 : index
    %c0_213 = arith.constant 0 : index
    %c0_214 = arith.constant 0 : index
    %194 = vector.load %arg3[%c5, %c0_213, %c0_214] : memref<16x8x128xf32, #tpu.memory_space<vmem>>, vector<1x8x128xf32>
    %195 = vector.shape_cast %194 : vector<1x8x128xf32> to vector<8x128xf32>
    %c0_215 = arith.constant 0 : index
    %c0_216 = arith.constant 0 : index
    %c0_217 = arith.constant 0 : index
    %196 = vector.load %arg1[%c0_215, %c0_216, %c0_217] : memref<4x16x16xf32, #tpu.memory_space<vmem>>, vector<1x16x16xf32>
    %197 = vector.shape_cast %196 : vector<1x16x16xf32> to vector<16x16xf32>
    %cst_218 = arith.constant dense<0.000000e+00> : vector<16x8xf32>
    %198 = tpu.matmul %197, %156, %cst_218 {dimension_numbers = #tpu.dot_dimension_numbers<[1], [0], [0], [1], [0, 0, 1, 1], [], []>} : vector<16x16xf32>, vector<16x8xf32>, vector<16x8xf32> -> vector<16x8xf32>
    %c0_219 = arith.constant 0 : index
    %c0_220 = arith.constant 0 : index
    %c0_221 = arith.constant 0 : index
    %199 = vector.load %arg7[%c0_219, %c0_220, %c0_221] : memref<4x16x128xf32, #tpu.memory_space<vmem>>, vector<1x16x128xf32>
    %200 = vector.shape_cast %199 : vector<1x16x128xf32> to vector<16x128xf32>
    %cst_222 = arith.constant dense<0.000000e+00> : vector<16x128xf32>
    %201 = tpu.matmul %198, %195, %cst_222 {dimension_numbers = #tpu.dot_dimension_numbers<[1], [0], [0], [1], [0, 0, 1, 1], [], []>} : vector<16x8xf32>, vector<8x128xf32>, vector<16x128xf32> -> vector<16x128xf32>
    %202 = arith.addf %200, %201 : vector<16x128xf32>
    %c0_223 = arith.constant 0 : index
    %c0_224 = arith.constant 0 : index
    %c0_225 = arith.constant 0 : index
    %203 = vector.load %arg7[%c0_223, %c0_224, %c0_225] : memref<4x16x128xf32, #tpu.memory_space<vmem>>, vector<1x16x128xf32>
    %204 = vector.shape_cast %203 : vector<1x16x128xf32> to vector<16x128xf32>
    %205 = vector.shape_cast %202 : vector<16x128xf32> to vector<1x16x128xf32>
    tpu.vector_store %arg7[%c0_223, %c0_224, %c0_225], %205 {strides = array<i32>} : memref<4x16x128xf32, #tpu.memory_space<vmem>>, vector<1x16x128xf32>,
    %c1_226 = arith.constant 1 : index
    %c0_227 = arith.constant 0 : index
    %c0_228 = arith.constant 0 : index
    %206 = vector.load %arg1[%c1_226, %c0_227, %c0_228] : memref<4x16x16xf32, #tpu.memory_space<vmem>>, vector<1x16x16xf32>
    %207 = vector.shape_cast %206 : vector<1x16x16xf32> to vector<16x16xf32>
    %cst_229 = arith.constant dense<0.000000e+00> : vector<16x8xf32>
    %208 = tpu.matmul %207, %166, %cst_229 {dimension_numbers = #tpu.dot_dimension_numbers<[1], [0], [0], [1], [0, 0, 1, 1], [], []>} : vector<16x16xf32>, vector<16x8xf32>, vector<16x8xf32> -> vector<16x8xf32>
    %c1_230 = arith.constant 1 : index
    %c0_231 = arith.constant 0 : index
    %c0_232 = arith.constant 0 : index
    %209 = vector.load %arg7[%c1_230, %c0_231, %c0_232] : memref<4x16x128xf32, #tpu.memory_space<vmem>>, vector<1x16x128xf32>
    %210 = vector.shape_cast %209 : vector<1x16x128xf32> to vector<16x128xf32>
    %cst_233 = arith.constant dense<0.000000e+00> : vector<16x128xf32>
    %211 = tpu.matmul %208, %195, %cst_233 {dimension_numbers = #tpu.dot_dimension_numbers<[1], [0], [0], [1], [0, 0, 1, 1], [], []>} : vector<16x8xf32>, vector<8x128xf32>, vector<16x128xf32> -> vector<16x128xf32>
    %212 = arith.addf %210, %211 : vector<16x128xf32>
    %c1_234 = arith.constant 1 : index
    %c0_235 = arith.constant 0 : index
    %c0_236 = arith.constant 0 : index
    %213 = vector.load %arg7[%c1_234, %c0_235, %c0_236] : memref<4x16x128xf32, #tpu.memory_space<vmem>>, vector<1x16x128xf32>
    %214 = vector.shape_cast %213 : vector<1x16x128xf32> to vector<16x128xf32>
    %215 = vector.shape_cast %212 : vector<16x128xf32> to vector<1x16x128xf32>
    tpu.vector_store %arg7[%c1_234, %c0_235, %c0_236], %215 {strides = array<i32>} : memref<4x16x128xf32, #tpu.memory_space<vmem>>, vector<1x16x128xf32>,
    %c2_237 = arith.constant 2 : index
    %c0_238 = arith.constant 0 : index
    %c0_239 = arith.constant 0 : index
    %216 = vector.load %arg1[%c2_237, %c0_238, %c0_239] : memref<4x16x16xf32, #tpu.memory_space<vmem>>, vector<1x16x16xf32>
    %217 = vector.shape_cast %216 : vector<1x16x16xf32> to vector<16x16xf32>
    %cst_240 = arith.constant dense<0.000000e+00> : vector<16x8xf32>
    %218 = tpu.matmul %217, %176, %cst_240 {dimension_numbers = #tpu.dot_dimension_numbers<[1], [0], [0], [1], [0, 0, 1, 1], [], []>} : vector<16x16xf32>, vector<16x8xf32>, vector<16x8xf32> -> vector<16x8xf32>
    %c2_241 = arith.constant 2 : index
    %c0_242 = arith.constant 0 : index
    %c0_243 = arith.constant 0 : index
    %219 = vector.load %arg7[%c2_241, %c0_242, %c0_243] : memref<4x16x128xf32, #tpu.memory_space<vmem>>, vector<1x16x128xf32>
    %220 = vector.shape_cast %219 : vector<1x16x128xf32> to vector<16x128xf32>
    %cst_244 = arith.constant dense<0.000000e+00> : vector<16x128xf32>
    %221 = tpu.matmul %218, %195, %cst_244 {dimension_numbers = #tpu.dot_dimension_numbers<[1], [0], [0], [1], [0, 0, 1, 1], [], []>} : vector<16x8xf32>, vector<8x128xf32>, vector<16x128xf32> -> vector<16x128xf32>
    %222 = arith.addf %220, %221 : vector<16x128xf32>
    %c2_245 = arith.constant 2 : index
    %c0_246 = arith.constant 0 : index
    %c0_247 = arith.constant 0 : index
    %223 = vector.load %arg7[%c2_245, %c0_246, %c0_247] : memref<4x16x128xf32, #tpu.memory_space<vmem>>, vector<1x16x128xf32>
    %224 = vector.shape_cast %223 : vector<1x16x128xf32> to vector<16x128xf32>
    %225 = vector.shape_cast %222 : vector<16x128xf32> to vector<1x16x128xf32>
    tpu.vector_store %arg7[%c2_245, %c0_246, %c0_247], %225 {strides = array<i32>} : memref<4x16x128xf32, #tpu.memory_space<vmem>>, vector<1x16x128xf32>,
    %c3_248 = arith.constant 3 : index
    %c0_249 = arith.constant 0 : index
    %c0_250 = arith.constant 0 : index
    %226 = vector.load %arg1[%c3_248, %c0_249, %c0_250] : memref<4x16x16xf32, #tpu.memory_space<vmem>>, vector<1x16x16xf32>
    %227 = vector.shape_cast %226 : vector<1x16x16xf32> to vector<16x16xf32>
    %cst_251 = arith.constant dense<0.000000e+00> : vector<16x8xf32>
    %228 = tpu.matmul %227, %186, %cst_251 {dimension_numbers = #tpu.dot_dimension_numbers<[1], [0], [0], [1], [0, 0, 1, 1], [], []>} : vector<16x16xf32>, vector<16x8xf32>, vector<16x8xf32> -> vector<16x8xf32>
    %c3_252 = arith.constant 3 : index
    %c0_253 = arith.constant 0 : index
    %c0_254 = arith.constant 0 : index
    %229 = vector.load %arg7[%c3_252, %c0_253, %c0_254] : memref<4x16x128xf32, #tpu.memory_space<vmem>>, vector<1x16x128xf32>
    %230 = vector.shape_cast %229 : vector<1x16x128xf32> to vector<16x128xf32>
    %cst_255 = arith.constant dense<0.000000e+00> : vector<16x128xf32>
    %231 = tpu.matmul %228, %195, %cst_255 {dimension_numbers = #tpu.dot_dimension_numbers<[1], [0], [0], [1], [0, 0, 1, 1], [], []>} : vector<16x8xf32>, vector<8x128xf32>, vector<16x128xf32> -> vector<16x128xf32>
    %232 = arith.addf %230, %231 : vector<16x128xf32>
    %c3_256 = arith.constant 3 : index
    %c0_257 = arith.constant 0 : index
    %c0_258 = arith.constant 0 : index
    %233 = vector.load %arg7[%c3_256, %c0_257, %c0_258] : memref<4x16x128xf32, #tpu.memory_space<vmem>>, vector<1x16x128xf32>
    %234 = vector.shape_cast %233 : vector<1x16x128xf32> to vector<16x128xf32>
    %235 = vector.shape_cast %232 : vector<16x128xf32> to vector<1x16x128xf32>
    tpu.vector_store %arg7[%c3_256, %c0_257, %c0_258], %235 {strides = array<i32>} : memref<4x16x128xf32, #tpu.memory_space<vmem>>, vector<1x16x128xf32>,
    %c6 = arith.constant 6 : index
    %c0_259 = arith.constant 0 : index
    %c0_260 = arith.constant 0 : index
    %236 = vector.load %arg3[%c6, %c0_259, %c0_260] : memref<16x8x128xf32, #tpu.memory_space<vmem>>, vector<1x8x128xf32>
    %237 = vector.shape_cast %236 : vector<1x8x128xf32> to vector<8x128xf32>
    %c0_261 = arith.constant 0 : index
    %c0_262 = arith.constant 0 : index
    %c0_263 = arith.constant 0 : index
    %238 = vector.load %arg1[%c0_261, %c0_262, %c0_263] : memref<4x16x16xf32, #tpu.memory_space<vmem>>, vector<1x16x16xf32>
    %239 = vector.shape_cast %238 : vector<1x16x16xf32> to vector<16x16xf32>
    %cst_264 = arith.constant dense<0.000000e+00> : vector<16x8xf32>
    %240 = tpu.matmul %239, %198, %cst_264 {dimension_numbers = #tpu.dot_dimension_numbers<[1], [0], [0], [1], [0, 0, 1, 1], [], []>} : vector<16x16xf32>, vector<16x8xf32>, vector<16x8xf32> -> vector<16x8xf32>
    %c0_265 = arith.constant 0 : index
    %c0_266 = arith.constant 0 : index
    %c0_267 = arith.constant 0 : index
    %241 = vector.load %arg7[%c0_265, %c0_266, %c0_267] : memref<4x16x128xf32, #tpu.memory_space<vmem>>, vector<1x16x128xf32>
    %242 = vector.shape_cast %241 : vector<1x16x128xf32> to vector<16x128xf32>
    %cst_268 = arith.constant dense<0.000000e+00> : vector<16x128xf32>
    %243 = tpu.matmul %240, %237, %cst_268 {dimension_numbers = #tpu.dot_dimension_numbers<[1], [0], [0], [1], [0, 0, 1, 1], [], []>} : vector<16x8xf32>, vector<8x128xf32>, vector<16x128xf32> -> vector<16x128xf32>
    %244 = arith.addf %242, %243 : vector<16x128xf32>
    %c0_269 = arith.constant 0 : index
    %c0_270 = arith.constant 0 : index
    %c0_271 = arith.constant 0 : index
    %245 = vector.load %arg7[%c0_269, %c0_270, %c0_271] : memref<4x16x128xf32, #tpu.memory_space<vmem>>, vector<1x16x128xf32>
    %246 = vector.shape_cast %245 : vector<1x16x128xf32> to vector<16x128xf32>
    %247 = vector.shape_cast %244 : vector<16x128xf32> to vector<1x16x128xf32>
    tpu.vector_store %arg7[%c0_269, %c0_270, %c0_271], %247 {strides = array<i32>} : memref<4x16x128xf32, #tpu.memory_space<vmem>>, vector<1x16x128xf32>,
    %c1_272 = arith.constant 1 : index
    %c0_273 = arith.constant 0 : index
    %c0_274 = arith.constant 0 : index
    %248 = vector.load %arg1[%c1_272, %c0_273, %c0_274] : memref<4x16x16xf32, #tpu.memory_space<vmem>>, vector<1x16x16xf32>
    %249 = vector.shape_cast %248 : vector<1x16x16xf32> to vector<16x16xf32>
    %cst_275 = arith.constant dense<0.000000e+00> : vector<16x8xf32>
    %250 = tpu.matmul %249, %208, %cst_275 {dimension_numbers = #tpu.dot_dimension_numbers<[1], [0], [0], [1], [0, 0, 1, 1], [], []>} : vector<16x16xf32>, vector<16x8xf32>, vector<16x8xf32> -> vector<16x8xf32>
    %c1_276 = arith.constant 1 : index
    %c0_277 = arith.constant 0 : index
    %c0_278 = arith.constant 0 : index
    %251 = vector.load %arg7[%c1_276, %c0_277, %c0_278] : memref<4x16x128xf32, #tpu.memory_space<vmem>>, vector<1x16x128xf32>
    %252 = vector.shape_cast %251 : vector<1x16x128xf32> to vector<16x128xf32>
    %cst_279 = arith.constant dense<0.000000e+00> : vector<16x128xf32>
    %253 = tpu.matmul %250, %237, %cst_279 {dimension_numbers = #tpu.dot_dimension_numbers<[1], [0], [0], [1], [0, 0, 1, 1], [], []>} : vector<16x8xf32>, vector<8x128xf32>, vector<16x128xf32> -> vector<16x128xf32>
    %254 = arith.addf %252, %253 : vector<16x128xf32>
    %c1_280 = arith.constant 1 : index
    %c0_281 = arith.constant 0 : index
    %c0_282 = arith.constant 0 : index
    %255 = vector.load %arg7[%c1_280, %c0_281, %c0_282] : memref<4x16x128xf32, #tpu.memory_space<vmem>>, vector<1x16x128xf32>
    %256 = vector.shape_cast %255 : vector<1x16x128xf32> to vector<16x128xf32>
    %257 = vector.shape_cast %254 : vector<16x128xf32> to vector<1x16x128xf32>
    tpu.vector_store %arg7[%c1_280, %c0_281, %c0_282], %257 {strides = array<i32>} : memref<4x16x128xf32, #tpu.memory_space<vmem>>, vector<1x16x128xf32>,
    %c2_283 = arith.constant 2 : index
    %c0_284 = arith.constant 0 : index
    %c0_285 = arith.constant 0 : index
    %258 = vector.load %arg1[%c2_283, %c0_284, %c0_285] : memref<4x16x16xf32, #tpu.memory_space<vmem>>, vector<1x16x16xf32>
    %259 = vector.shape_cast %258 : vector<1x16x16xf32> to vector<16x16xf32>
    %cst_286 = arith.constant dense<0.000000e+00> : vector<16x8xf32>
    %260 = tpu.matmul %259, %218, %cst_286 {dimension_numbers = #tpu.dot_dimension_numbers<[1], [0], [0], [1], [0, 0, 1, 1], [], []>} : vector<16x16xf32>, vector<16x8xf32>, vector<16x8xf32> -> vector<16x8xf32>
    %c2_287 = arith.constant 2 : index
    %c0_288 = arith.constant 0 : index
    %c0_289 = arith.constant 0 : index
    %261 = vector.load %arg7[%c2_287, %c0_288, %c0_289] : memref<4x16x128xf32, #tpu.memory_space<vmem>>, vector<1x16x128xf32>
    %262 = vector.shape_cast %261 : vector<1x16x128xf32> to vector<16x128xf32>
    %cst_290 = arith.constant dense<0.000000e+00> : vector<16x128xf32>
    %263 = tpu.matmul %260, %237, %cst_290 {dimension_numbers = #tpu.dot_dimension_numbers<[1], [0], [0], [1], [0, 0, 1, 1], [], []>} : vector<16x8xf32>, vector<8x128xf32>, vector<16x128xf32> -> vector<16x128xf32>
    %264 = arith.addf %262, %263 : vector<16x128xf32>
    %c2_291 = arith.constant 2 : index
    %c0_292 = arith.constant 0 : index
    %c0_293 = arith.constant 0 : index
    %265 = vector.load %arg7[%c2_291, %c0_292, %c0_293] : memref<4x16x128xf32, #tpu.memory_space<vmem>>, vector<1x16x128xf32>
    %266 = vector.shape_cast %265 : vector<1x16x128xf32> to vector<16x128xf32>
    %267 = vector.shape_cast %264 : vector<16x128xf32> to vector<1x16x128xf32>
    tpu.vector_store %arg7[%c2_291, %c0_292, %c0_293], %267 {strides = array<i32>} : memref<4x16x128xf32, #tpu.memory_space<vmem>>, vector<1x16x128xf32>,
    %c3_294 = arith.constant 3 : index
    %c0_295 = arith.constant 0 : index
    %c0_296 = arith.constant 0 : index
    %268 = vector.load %arg1[%c3_294, %c0_295, %c0_296] : memref<4x16x16xf32, #tpu.memory_space<vmem>>, vector<1x16x16xf32>
    %269 = vector.shape_cast %268 : vector<1x16x16xf32> to vector<16x16xf32>
    %cst_297 = arith.constant dense<0.000000e+00> : vector<16x8xf32>
    %270 = tpu.matmul %269, %228, %cst_297 {dimension_numbers = #tpu.dot_dimension_numbers<[1], [0], [0], [1], [0, 0, 1, 1], [], []>} : vector<16x16xf32>, vector<16x8xf32>, vector<16x8xf32> -> vector<16x8xf32>
    %c3_298 = arith.constant 3 : index
    %c0_299 = arith.constant 0 : index
    %c0_300 = arith.constant 0 : index
    %271 = vector.load %arg7[%c3_298, %c0_299, %c0_300] : memref<4x16x128xf32, #tpu.memory_space<vmem>>, vector<1x16x128xf32>
    %272 = vector.shape_cast %271 : vector<1x16x128xf32> to vector<16x128xf32>
    %cst_301 = arith.constant dense<0.000000e+00> : vector<16x128xf32>
    %273 = tpu.matmul %270, %237, %cst_301 {dimension_numbers = #tpu.dot_dimension_numbers<[1], [0], [0], [1], [0, 0, 1, 1], [], []>} : vector<16x8xf32>, vector<8x128xf32>, vector<16x128xf32> -> vector<16x128xf32>
    %274 = arith.addf %272, %273 : vector<16x128xf32>
    %c3_302 = arith.constant 3 : index
    %c0_303 = arith.constant 0 : index
    %c0_304 = arith.constant 0 : index
    %275 = vector.load %arg7[%c3_302, %c0_303, %c0_304] : memref<4x16x128xf32, #tpu.memory_space<vmem>>, vector<1x16x128xf32>
    %276 = vector.shape_cast %275 : vector<1x16x128xf32> to vector<16x128xf32>
    %277 = vector.shape_cast %274 : vector<16x128xf32> to vector<1x16x128xf32>
    tpu.vector_store %arg7[%c3_302, %c0_303, %c0_304], %277 {strides = array<i32>} : memref<4x16x128xf32, #tpu.memory_space<vmem>>, vector<1x16x128xf32>,
    %c7 = arith.constant 7 : index
    %c0_305 = arith.constant 0 : index
    %c0_306 = arith.constant 0 : index
    %278 = vector.load %arg3[%c7, %c0_305, %c0_306] : memref<16x8x128xf32, #tpu.memory_space<vmem>>, vector<1x8x128xf32>
    %279 = vector.shape_cast %278 : vector<1x8x128xf32> to vector<8x128xf32>
    %c0_307 = arith.constant 0 : index
    %c0_308 = arith.constant 0 : index
    %c0_309 = arith.constant 0 : index
    %280 = vector.load %arg1[%c0_307, %c0_308, %c0_309] : memref<4x16x16xf32, #tpu.memory_space<vmem>>, vector<1x16x16xf32>
    %281 = vector.shape_cast %280 : vector<1x16x16xf32> to vector<16x16xf32>
    %cst_310 = arith.constant dense<0.000000e+00> : vector<16x8xf32>
    %282 = tpu.matmul %281, %240, %cst_310 {dimension_numbers = #tpu.dot_dimension_numbers<[1], [0], [0], [1], [0, 0, 1, 1], [], []>} : vector<16x16xf32>, vector<16x8xf32>, vector<16x8xf32> -> vector<16x8xf32>
    %c0_311 = arith.constant 0 : index
    %c0_312 = arith.constant 0 : index
    %c0_313 = arith.constant 0 : index
    %283 = vector.load %arg7[%c0_311, %c0_312, %c0_313] : memref<4x16x128xf32, #tpu.memory_space<vmem>>, vector<1x16x128xf32>
    %284 = vector.shape_cast %283 : vector<1x16x128xf32> to vector<16x128xf32>
    %cst_314 = arith.constant dense<0.000000e+00> : vector<16x128xf32>
    %285 = tpu.matmul %282, %279, %cst_314 {dimension_numbers = #tpu.dot_dimension_numbers<[1], [0], [0], [1], [0, 0, 1, 1], [], []>} : vector<16x8xf32>, vector<8x128xf32>, vector<16x128xf32> -> vector<16x128xf32>
    %286 = arith.addf %284, %285 : vector<16x128xf32>
    %c0_315 = arith.constant 0 : index
    %c0_316 = arith.constant 0 : index
    %c0_317 = arith.constant 0 : index
    %287 = vector.load %arg7[%c0_315, %c0_316, %c0_317] : memref<4x16x128xf32, #tpu.memory_space<vmem>>, vector<1x16x128xf32>
    %288 = vector.shape_cast %287 : vector<1x16x128xf32> to vector<16x128xf32>
    %289 = vector.shape_cast %286 : vector<16x128xf32> to vector<1x16x128xf32>
    tpu.vector_store %arg7[%c0_315, %c0_316, %c0_317], %289 {strides = array<i32>} : memref<4x16x128xf32, #tpu.memory_space<vmem>>, vector<1x16x128xf32>,
    %c1_318 = arith.constant 1 : index
    %c0_319 = arith.constant 0 : index
    %c0_320 = arith.constant 0 : index
    %290 = vector.load %arg1[%c1_318, %c0_319, %c0_320] : memref<4x16x16xf32, #tpu.memory_space<vmem>>, vector<1x16x16xf32>
    %291 = vector.shape_cast %290 : vector<1x16x16xf32> to vector<16x16xf32>
    %cst_321 = arith.constant dense<0.000000e+00> : vector<16x8xf32>
    %292 = tpu.matmul %291, %250, %cst_321 {dimension_numbers = #tpu.dot_dimension_numbers<[1], [0], [0], [1], [0, 0, 1, 1], [], []>} : vector<16x16xf32>, vector<16x8xf32>, vector<16x8xf32> -> vector<16x8xf32>
    %c1_322 = arith.constant 1 : index
    %c0_323 = arith.constant 0 : index
    %c0_324 = arith.constant 0 : index
    %293 = vector.load %arg7[%c1_322, %c0_323, %c0_324] : memref<4x16x128xf32, #tpu.memory_space<vmem>>, vector<1x16x128xf32>
    %294 = vector.shape_cast %293 : vector<1x16x128xf32> to vector<16x128xf32>
    %cst_325 = arith.constant dense<0.000000e+00> : vector<16x128xf32>
    %295 = tpu.matmul %292, %279, %cst_325 {dimension_numbers = #tpu.dot_dimension_numbers<[1], [0], [0], [1], [0, 0, 1, 1], [], []>} : vector<16x8xf32>, vector<8x128xf32>, vector<16x128xf32> -> vector<16x128xf32>
    %296 = arith.addf %294, %295 : vector<16x128xf32>
    %c1_326 = arith.constant 1 : index
    %c0_327 = arith.constant 0 : index
    %c0_328 = arith.constant 0 : index
    %297 = vector.load %arg7[%c1_326, %c0_327, %c0_328] : memref<4x16x128xf32, #tpu.memory_space<vmem>>, vector<1x16x128xf32>
    %298 = vector.shape_cast %297 : vector<1x16x128xf32> to vector<16x128xf32>
    %299 = vector.shape_cast %296 : vector<16x128xf32> to vector<1x16x128xf32>
    tpu.vector_store %arg7[%c1_326, %c0_327, %c0_328], %299 {strides = array<i32>} : memref<4x16x128xf32, #tpu.memory_space<vmem>>, vector<1x16x128xf32>,
    %c2_329 = arith.constant 2 : index
    %c0_330 = arith.constant 0 : index
    %c0_331 = arith.constant 0 : index
    %300 = vector.load %arg1[%c2_329, %c0_330, %c0_331] : memref<4x16x16xf32, #tpu.memory_space<vmem>>, vector<1x16x16xf32>
    %301 = vector.shape_cast %300 : vector<1x16x16xf32> to vector<16x16xf32>
    %cst_332 = arith.constant dense<0.000000e+00> : vector<16x8xf32>
    %302 = tpu.matmul %301, %260, %cst_332 {dimension_numbers = #tpu.dot_dimension_numbers<[1], [0], [0], [1], [0, 0, 1, 1], [], []>} : vector<16x16xf32>, vector<16x8xf32>, vector<16x8xf32> -> vector<16x8xf32>
    %c2_333 = arith.constant 2 : index
    %c0_334 = arith.constant 0 : index
    %c0_335 = arith.constant 0 : index
    %303 = vector.load %arg7[%c2_333, %c0_334, %c0_335] : memref<4x16x128xf32, #tpu.memory_space<vmem>>, vector<1x16x128xf32>
    %304 = vector.shape_cast %303 : vector<1x16x128xf32> to vector<16x128xf32>
    %cst_336 = arith.constant dense<0.000000e+00> : vector<16x128xf32>
    %305 = tpu.matmul %302, %279, %cst_336 {dimension_numbers = #tpu.dot_dimension_numbers<[1], [0], [0], [1], [0, 0, 1, 1], [], []>} : vector<16x8xf32>, vector<8x128xf32>, vector<16x128xf32> -> vector<16x128xf32>
    %306 = arith.addf %304, %305 : vector<16x128xf32>
    %c2_337 = arith.constant 2 : index
    %c0_338 = arith.constant 0 : index
    %c0_339 = arith.constant 0 : index
    %307 = vector.load %arg7[%c2_337, %c0_338, %c0_339] : memref<4x16x128xf32, #tpu.memory_space<vmem>>, vector<1x16x128xf32>
    %308 = vector.shape_cast %307 : vector<1x16x128xf32> to vector<16x128xf32>
    %309 = vector.shape_cast %306 : vector<16x128xf32> to vector<1x16x128xf32>
    tpu.vector_store %arg7[%c2_337, %c0_338, %c0_339], %309 {strides = array<i32>} : memref<4x16x128xf32, #tpu.memory_space<vmem>>, vector<1x16x128xf32>,
    %c3_340 = arith.constant 3 : index
    %c0_341 = arith.constant 0 : index
    %c0_342 = arith.constant 0 : index
    %310 = vector.load %arg1[%c3_340, %c0_341, %c0_342] : memref<4x16x16xf32, #tpu.memory_space<vmem>>, vector<1x16x16xf32>
    %311 = vector.shape_cast %310 : vector<1x16x16xf32> to vector<16x16xf32>
    %cst_343 = arith.constant dense<0.000000e+00> : vector<16x8xf32>
    %312 = tpu.matmul %311, %270, %cst_343 {dimension_numbers = #tpu.dot_dimension_numbers<[1], [0], [0], [1], [0, 0, 1, 1], [], []>} : vector<16x16xf32>, vector<16x8xf32>, vector<16x8xf32> -> vector<16x8xf32>
    %c3_344 = arith.constant 3 : index
    %c0_345 = arith.constant 0 : index
    %c0_346 = arith.constant 0 : index
    %313 = vector.load %arg7[%c3_344, %c0_345, %c0_346] : memref<4x16x128xf32, #tpu.memory_space<vmem>>, vector<1x16x128xf32>
    %314 = vector.shape_cast %313 : vector<1x16x128xf32> to vector<16x128xf32>
    %cst_347 = arith.constant dense<0.000000e+00> : vector<16x128xf32>
    %315 = tpu.matmul %312, %279, %cst_347 {dimension_numbers = #tpu.dot_dimension_numbers<[1], [0], [0], [1], [0, 0, 1, 1], [], []>} : vector<16x8xf32>, vector<8x128xf32>, vector<16x128xf32> -> vector<16x128xf32>
    %316 = arith.addf %314, %315 : vector<16x128xf32>
    %c3_348 = arith.constant 3 : index
    %c0_349 = arith.constant 0 : index
    %c0_350 = arith.constant 0 : index
    %317 = vector.load %arg7[%c3_348, %c0_349, %c0_350] : memref<4x16x128xf32, #tpu.memory_space<vmem>>, vector<1x16x128xf32>
    %318 = vector.shape_cast %317 : vector<1x16x128xf32> to vector<16x128xf32>
    %319 = vector.shape_cast %316 : vector<16x128xf32> to vector<1x16x128xf32>
    tpu.vector_store %arg7[%c3_348, %c0_349, %c0_350], %319 {strides = array<i32>} : memref<4x16x128xf32, #tpu.memory_space<vmem>>, vector<1x16x128xf32>,
    %c8 = arith.constant 8 : index
    %c0_351 = arith.constant 0 : index
    %c0_352 = arith.constant 0 : index
    %320 = vector.load %arg3[%c8, %c0_351, %c0_352] : memref<16x8x128xf32, #tpu.memory_space<vmem>>, vector<1x8x128xf32>
    %321 = vector.shape_cast %320 : vector<1x8x128xf32> to vector<8x128xf32>
    %c0_353 = arith.constant 0 : index
    %c0_354 = arith.constant 0 : index
    %c0_355 = arith.constant 0 : index
    %322 = vector.load %arg1[%c0_353, %c0_354, %c0_355] : memref<4x16x16xf32, #tpu.memory_space<vmem>>, vector<1x16x16xf32>
    %323 = vector.shape_cast %322 : vector<1x16x16xf32> to vector<16x16xf32>
    %cst_356 = arith.constant dense<0.000000e+00> : vector<16x8xf32>
    %324 = tpu.matmul %323, %282, %cst_356 {dimension_numbers = #tpu.dot_dimension_numbers<[1], [0], [0], [1], [0, 0, 1, 1], [], []>} : vector<16x16xf32>, vector<16x8xf32>, vector<16x8xf32> -> vector<16x8xf32>
    %c0_357 = arith.constant 0 : index
    %c0_358 = arith.constant 0 : index
    %c0_359 = arith.constant 0 : index
    %325 = vector.load %arg7[%c0_357, %c0_358, %c0_359] : memref<4x16x128xf32, #tpu.memory_space<vmem>>, vector<1x16x128xf32>
    %326 = vector.shape_cast %325 : vector<1x16x128xf32> to vector<16x128xf32>
    %cst_360 = arith.constant dense<0.000000e+00> : vector<16x128xf32>
    %327 = tpu.matmul %324, %321, %cst_360 {dimension_numbers = #tpu.dot_dimension_numbers<[1], [0], [0], [1], [0, 0, 1, 1], [], []>} : vector<16x8xf32>, vector<8x128xf32>, vector<16x128xf32> -> vector<16x128xf32>
    %328 = arith.addf %326, %327 : vector<16x128xf32>
    %c0_361 = arith.constant 0 : index
    %c0_362 = arith.constant 0 : index
    %c0_363 = arith.constant 0 : index
    %329 = vector.load %arg7[%c0_361, %c0_362, %c0_363] : memref<4x16x128xf32, #tpu.memory_space<vmem>>, vector<1x16x128xf32>
    %330 = vector.shape_cast %329 : vector<1x16x128xf32> to vector<16x128xf32>
    %331 = vector.shape_cast %328 : vector<16x128xf32> to vector<1x16x128xf32>
    tpu.vector_store %arg7[%c0_361, %c0_362, %c0_363], %331 {strides = array<i32>} : memref<4x16x128xf32, #tpu.memory_space<vmem>>, vector<1x16x128xf32>,
    %c1_364 = arith.constant 1 : index
    %c0_365 = arith.constant 0 : index
    %c0_366 = arith.constant 0 : index
    %332 = vector.load %arg1[%c1_364, %c0_365, %c0_366] : memref<4x16x16xf32, #tpu.memory_space<vmem>>, vector<1x16x16xf32>
    %333 = vector.shape_cast %332 : vector<1x16x16xf32> to vector<16x16xf32>
    %cst_367 = arith.constant dense<0.000000e+00> : vector<16x8xf32>
    %334 = tpu.matmul %333, %292, %cst_367 {dimension_numbers = #tpu.dot_dimension_numbers<[1], [0], [0], [1], [0, 0, 1, 1], [], []>} : vector<16x16xf32>, vector<16x8xf32>, vector<16x8xf32> -> vector<16x8xf32>
    %c1_368 = arith.constant 1 : index
    %c0_369 = arith.constant 0 : index
    %c0_370 = arith.constant 0 : index
    %335 = vector.load %arg7[%c1_368, %c0_369, %c0_370] : memref<4x16x128xf32, #tpu.memory_space<vmem>>, vector<1x16x128xf32>
    %336 = vector.shape_cast %335 : vector<1x16x128xf32> to vector<16x128xf32>
    %cst_371 = arith.constant dense<0.000000e+00> : vector<16x128xf32>
    %337 = tpu.matmul %334, %321, %cst_371 {dimension_numbers = #tpu.dot_dimension_numbers<[1], [0], [0], [1], [0, 0, 1, 1], [], []>} : vector<16x8xf32>, vector<8x128xf32>, vector<16x128xf32> -> vector<16x128xf32>
    %338 = arith.addf %336, %337 : vector<16x128xf32>
    %c1_372 = arith.constant 1 : index
    %c0_373 = arith.constant 0 : index
    %c0_374 = arith.constant 0 : index
    %339 = vector.load %arg7[%c1_372, %c0_373, %c0_374] : memref<4x16x128xf32, #tpu.memory_space<vmem>>, vector<1x16x128xf32>
    %340 = vector.shape_cast %339 : vector<1x16x128xf32> to vector<16x128xf32>
    %341 = vector.shape_cast %338 : vector<16x128xf32> to vector<1x16x128xf32>
    tpu.vector_store %arg7[%c1_372, %c0_373, %c0_374], %341 {strides = array<i32>} : memref<4x16x128xf32, #tpu.memory_space<vmem>>, vector<1x16x128xf32>,
    %c2_375 = arith.constant 2 : index
    %c0_376 = arith.constant 0 : index
    %c0_377 = arith.constant 0 : index
    %342 = vector.load %arg1[%c2_375, %c0_376, %c0_377] : memref<4x16x16xf32, #tpu.memory_space<vmem>>, vector<1x16x16xf32>
    %343 = vector.shape_cast %342 : vector<1x16x16xf32> to vector<16x16xf32>
    %cst_378 = arith.constant dense<0.000000e+00> : vector<16x8xf32>
    %344 = tpu.matmul %343, %302, %cst_378 {dimension_numbers = #tpu.dot_dimension_numbers<[1], [0], [0], [1], [0, 0, 1, 1], [], []>} : vector<16x16xf32>, vector<16x8xf32>, vector<16x8xf32> -> vector<16x8xf32>
    %c2_379 = arith.constant 2 : index
    %c0_380 = arith.constant 0 : index
    %c0_381 = arith.constant 0 : index
    %345 = vector.load %arg7[%c2_379, %c0_380, %c0_381] : memref<4x16x128xf32, #tpu.memory_space<vmem>>, vector<1x16x128xf32>
    %346 = vector.shape_cast %345 : vector<1x16x128xf32> to vector<16x128xf32>
    %cst_382 = arith.constant dense<0.000000e+00> : vector<16x128xf32>
    %347 = tpu.matmul %344, %321, %cst_382 {dimension_numbers = #tpu.dot_dimension_numbers<[1], [0], [0], [1], [0, 0, 1, 1], [], []>} : vector<16x8xf32>, vector<8x128xf32>, vector<16x128xf32> -> vector<16x128xf32>
    %348 = arith.addf %346, %347 : vector<16x128xf32>
    %c2_383 = arith.constant 2 : index
    %c0_384 = arith.constant 0 : index
    %c0_385 = arith.constant 0 : index
    %349 = vector.load %arg7[%c2_383, %c0_384, %c0_385] : memref<4x16x128xf32, #tpu.memory_space<vmem>>, vector<1x16x128xf32>
    %350 = vector.shape_cast %349 : vector<1x16x128xf32> to vector<16x128xf32>
    %351 = vector.shape_cast %348 : vector<16x128xf32> to vector<1x16x128xf32>
    tpu.vector_store %arg7[%c2_383, %c0_384, %c0_385], %351 {strides = array<i32>} : memref<4x16x128xf32, #tpu.memory_space<vmem>>, vector<1x16x128xf32>,
    %c3_386 = arith.constant 3 : index
    %c0_387 = arith.constant 0 : index
    %c0_388 = arith.constant 0 : index
    %352 = vector.load %arg1[%c3_386, %c0_387, %c0_388] : memref<4x16x16xf32, #tpu.memory_space<vmem>>, vector<1x16x16xf32>
    %353 = vector.shape_cast %352 : vector<1x16x16xf32> to vector<16x16xf32>
    %cst_389 = arith.constant dense<0.000000e+00> : vector<16x8xf32>
    %354 = tpu.matmul %353, %312, %cst_389 {dimension_numbers = #tpu.dot_dimension_numbers<[1], [0], [0], [1], [0, 0, 1, 1], [], []>} : vector<16x16xf32>, vector<16x8xf32>, vector<16x8xf32> -> vector<16x8xf32>
    %c3_390 = arith.constant 3 : index
    %c0_391 = arith.constant 0 : index
    %c0_392 = arith.constant 0 : index
    %355 = vector.load %arg7[%c3_390, %c0_391, %c0_392] : memref<4x16x128xf32, #tpu.memory_space<vmem>>, vector<1x16x128xf32>
    %356 = vector.shape_cast %355 : vector<1x16x128xf32> to vector<16x128xf32>
    %cst_393 = arith.constant dense<0.000000e+00> : vector<16x128xf32>
    %357 = tpu.matmul %354, %321, %cst_393 {dimension_numbers = #tpu.dot_dimension_numbers<[1], [0], [0], [1], [0, 0, 1, 1], [], []>} : vector<16x8xf32>, vector<8x128xf32>, vector<16x128xf32> -> vector<16x128xf32>
    %358 = arith.addf %356, %357 : vector<16x128xf32>
    %c3_394 = arith.constant 3 : index
    %c0_395 = arith.constant 0 : index
    %c0_396 = arith.constant 0 : index
    %359 = vector.load %arg7[%c3_394, %c0_395, %c0_396] : memref<4x16x128xf32, #tpu.memory_space<vmem>>, vector<1x16x128xf32>
    %360 = vector.shape_cast %359 : vector<1x16x128xf32> to vector<16x128xf32>
    %361 = vector.shape_cast %358 : vector<16x128xf32> to vector<1x16x128xf32>
    tpu.vector_store %arg7[%c3_394, %c0_395, %c0_396], %361 {strides = array<i32>} : memref<4x16x128xf32, #tpu.memory_space<vmem>>, vector<1x16x128xf32>,
    %c9 = arith.constant 9 : index
    %c0_397 = arith.constant 0 : index
    %c0_398 = arith.constant 0 : index
    %362 = vector.load %arg3[%c9, %c0_397, %c0_398] : memref<16x8x128xf32, #tpu.memory_space<vmem>>, vector<1x8x128xf32>
    %363 = vector.shape_cast %362 : vector<1x8x128xf32> to vector<8x128xf32>
    %c0_399 = arith.constant 0 : index
    %c0_400 = arith.constant 0 : index
    %c0_401 = arith.constant 0 : index
    %364 = vector.load %arg1[%c0_399, %c0_400, %c0_401] : memref<4x16x16xf32, #tpu.memory_space<vmem>>, vector<1x16x16xf32>
    %365 = vector.shape_cast %364 : vector<1x16x16xf32> to vector<16x16xf32>
    %cst_402 = arith.constant dense<0.000000e+00> : vector<16x8xf32>
    %366 = tpu.matmul %365, %324, %cst_402 {dimension_numbers = #tpu.dot_dimension_numbers<[1], [0], [0], [1], [0, 0, 1, 1], [], []>} : vector<16x16xf32>, vector<16x8xf32>, vector<16x8xf32> -> vector<16x8xf32>
    %c0_403 = arith.constant 0 : index
    %c0_404 = arith.constant 0 : index
    %c0_405 = arith.constant 0 : index
    %367 = vector.load %arg7[%c0_403, %c0_404, %c0_405] : memref<4x16x128xf32, #tpu.memory_space<vmem>>, vector<1x16x128xf32>
    %368 = vector.shape_cast %367 : vector<1x16x128xf32> to vector<16x128xf32>
    %cst_406 = arith.constant dense<0.000000e+00> : vector<16x128xf32>
    %369 = tpu.matmul %366, %363, %cst_406 {dimension_numbers = #tpu.dot_dimension_numbers<[1], [0], [0], [1], [0, 0, 1, 1], [], []>} : vector<16x8xf32>, vector<8x128xf32>, vector<16x128xf32> -> vector<16x128xf32>
    %370 = arith.addf %368, %369 : vector<16x128xf32>
    %c0_407 = arith.constant 0 : index
    %c0_408 = arith.constant 0 : index
    %c0_409 = arith.constant 0 : index
    %371 = vector.load %arg7[%c0_407, %c0_408, %c0_409] : memref<4x16x128xf32, #tpu.memory_space<vmem>>, vector<1x16x128xf32>
    %372 = vector.shape_cast %371 : vector<1x16x128xf32> to vector<16x128xf32>
    %373 = vector.shape_cast %370 : vector<16x128xf32> to vector<1x16x128xf32>
    tpu.vector_store %arg7[%c0_407, %c0_408, %c0_409], %373 {strides = array<i32>} : memref<4x16x128xf32, #tpu.memory_space<vmem>>, vector<1x16x128xf32>,
    %c1_410 = arith.constant 1 : index
    %c0_411 = arith.constant 0 : index
    %c0_412 = arith.constant 0 : index
    %374 = vector.load %arg1[%c1_410, %c0_411, %c0_412] : memref<4x16x16xf32, #tpu.memory_space<vmem>>, vector<1x16x16xf32>
    %375 = vector.shape_cast %374 : vector<1x16x16xf32> to vector<16x16xf32>
    %cst_413 = arith.constant dense<0.000000e+00> : vector<16x8xf32>
    %376 = tpu.matmul %375, %334, %cst_413 {dimension_numbers = #tpu.dot_dimension_numbers<[1], [0], [0], [1], [0, 0, 1, 1], [], []>} : vector<16x16xf32>, vector<16x8xf32>, vector<16x8xf32> -> vector<16x8xf32>
    %c1_414 = arith.constant 1 : index
    %c0_415 = arith.constant 0 : index
    %c0_416 = arith.constant 0 : index
    %377 = vector.load %arg7[%c1_414, %c0_415, %c0_416] : memref<4x16x128xf32, #tpu.memory_space<vmem>>, vector<1x16x128xf32>
    %378 = vector.shape_cast %377 : vector<1x16x128xf32> to vector<16x128xf32>
    %cst_417 = arith.constant dense<0.000000e+00> : vector<16x128xf32>
    %379 = tpu.matmul %376, %363, %cst_417 {dimension_numbers = #tpu.dot_dimension_numbers<[1], [0], [0], [1], [0, 0, 1, 1], [], []>} : vector<16x8xf32>, vector<8x128xf32>, vector<16x128xf32> -> vector<16x128xf32>
    %380 = arith.addf %378, %379 : vector<16x128xf32>
    %c1_418 = arith.constant 1 : index
    %c0_419 = arith.constant 0 : index
    %c0_420 = arith.constant 0 : index
    %381 = vector.load %arg7[%c1_418, %c0_419, %c0_420] : memref<4x16x128xf32, #tpu.memory_space<vmem>>, vector<1x16x128xf32>
    %382 = vector.shape_cast %381 : vector<1x16x128xf32> to vector<16x128xf32>
    %383 = vector.shape_cast %380 : vector<16x128xf32> to vector<1x16x128xf32>
    tpu.vector_store %arg7[%c1_418, %c0_419, %c0_420], %383 {strides = array<i32>} : memref<4x16x128xf32, #tpu.memory_space<vmem>>, vector<1x16x128xf32>,
    %c2_421 = arith.constant 2 : index
    %c0_422 = arith.constant 0 : index
    %c0_423 = arith.constant 0 : index
    %384 = vector.load %arg1[%c2_421, %c0_422, %c0_423] : memref<4x16x16xf32, #tpu.memory_space<vmem>>, vector<1x16x16xf32>
    %385 = vector.shape_cast %384 : vector<1x16x16xf32> to vector<16x16xf32>
    %cst_424 = arith.constant dense<0.000000e+00> : vector<16x8xf32>
    %386 = tpu.matmul %385, %344, %cst_424 {dimension_numbers = #tpu.dot_dimension_numbers<[1], [0], [0], [1], [0, 0, 1, 1], [], []>} : vector<16x16xf32>, vector<16x8xf32>, vector<16x8xf32> -> vector<16x8xf32>
    %c2_425 = arith.constant 2 : index
    %c0_426 = arith.constant 0 : index
    %c0_427 = arith.constant 0 : index
    %387 = vector.load %arg7[%c2_425, %c0_426, %c0_427] : memref<4x16x128xf32, #tpu.memory_space<vmem>>, vector<1x16x128xf32>
    %388 = vector.shape_cast %387 : vector<1x16x128xf32> to vector<16x128xf32>
    %cst_428 = arith.constant dense<0.000000e+00> : vector<16x128xf32>
    %389 = tpu.matmul %386, %363, %cst_428 {dimension_numbers = #tpu.dot_dimension_numbers<[1], [0], [0], [1], [0, 0, 1, 1], [], []>} : vector<16x8xf32>, vector<8x128xf32>, vector<16x128xf32> -> vector<16x128xf32>
    %390 = arith.addf %388, %389 : vector<16x128xf32>
    %c2_429 = arith.constant 2 : index
    %c0_430 = arith.constant 0 : index
    %c0_431 = arith.constant 0 : index
    %391 = vector.load %arg7[%c2_429, %c0_430, %c0_431] : memref<4x16x128xf32, #tpu.memory_space<vmem>>, vector<1x16x128xf32>
    %392 = vector.shape_cast %391 : vector<1x16x128xf32> to vector<16x128xf32>
    %393 = vector.shape_cast %390 : vector<16x128xf32> to vector<1x16x128xf32>
    tpu.vector_store %arg7[%c2_429, %c0_430, %c0_431], %393 {strides = array<i32>} : memref<4x16x128xf32, #tpu.memory_space<vmem>>, vector<1x16x128xf32>,
    %c3_432 = arith.constant 3 : index
    %c0_433 = arith.constant 0 : index
    %c0_434 = arith.constant 0 : index
    %394 = vector.load %arg1[%c3_432, %c0_433, %c0_434] : memref<4x16x16xf32, #tpu.memory_space<vmem>>, vector<1x16x16xf32>
    %395 = vector.shape_cast %394 : vector<1x16x16xf32> to vector<16x16xf32>
    %cst_435 = arith.constant dense<0.000000e+00> : vector<16x8xf32>
    %396 = tpu.matmul %395, %354, %cst_435 {dimension_numbers = #tpu.dot_dimension_numbers<[1], [0], [0], [1], [0, 0, 1, 1], [], []>} : vector<16x16xf32>, vector<16x8xf32>, vector<16x8xf32> -> vector<16x8xf32>
    %c3_436 = arith.constant 3 : index
    %c0_437 = arith.constant 0 : index
    %c0_438 = arith.constant 0 : index
    %397 = vector.load %arg7[%c3_436, %c0_437, %c0_438] : memref<4x16x128xf32, #tpu.memory_space<vmem>>, vector<1x16x128xf32>
    %398 = vector.shape_cast %397 : vector<1x16x128xf32> to vector<16x128xf32>
    %cst_439 = arith.constant dense<0.000000e+00> : vector<16x128xf32>
    %399 = tpu.matmul %396, %363, %cst_439 {dimension_numbers = #tpu.dot_dimension_numbers<[1], [0], [0], [1], [0, 0, 1, 1], [], []>} : vector<16x8xf32>, vector<8x128xf32>, vector<16x128xf32> -> vector<16x128xf32>
    %400 = arith.addf %398, %399 : vector<16x128xf32>
    %c3_440 = arith.constant 3 : index
    %c0_441 = arith.constant 0 : index
    %c0_442 = arith.constant 0 : index
    %401 = vector.load %arg7[%c3_440, %c0_441, %c0_442] : memref<4x16x128xf32, #tpu.memory_space<vmem>>, vector<1x16x128xf32>
    %402 = vector.shape_cast %401 : vector<1x16x128xf32> to vector<16x128xf32>
    %403 = vector.shape_cast %400 : vector<16x128xf32> to vector<1x16x128xf32>
    tpu.vector_store %arg7[%c3_440, %c0_441, %c0_442], %403 {strides = array<i32>} : memref<4x16x128xf32, #tpu.memory_space<vmem>>, vector<1x16x128xf32>,
    %c10 = arith.constant 10 : index
    %c0_443 = arith.constant 0 : index
    %c0_444 = arith.constant 0 : index
    %404 = vector.load %arg3[%c10, %c0_443, %c0_444] : memref<16x8x128xf32, #tpu.memory_space<vmem>>, vector<1x8x128xf32>
    %405 = vector.shape_cast %404 : vector<1x8x128xf32> to vector<8x128xf32>
    %c0_445 = arith.constant 0 : index
    %c0_446 = arith.constant 0 : index
    %c0_447 = arith.constant 0 : index
    %406 = vector.load %arg1[%c0_445, %c0_446, %c0_447] : memref<4x16x16xf32, #tpu.memory_space<vmem>>, vector<1x16x16xf32>
    %407 = vector.shape_cast %406 : vector<1x16x16xf32> to vector<16x16xf32>
    %cst_448 = arith.constant dense<0.000000e+00> : vector<16x8xf32>
    %408 = tpu.matmul %407, %366, %cst_448 {dimension_numbers = #tpu.dot_dimension_numbers<[1], [0], [0], [1], [0, 0, 1, 1], [], []>} : vector<16x16xf32>, vector<16x8xf32>, vector<16x8xf32> -> vector<16x8xf32>
    %c0_449 = arith.constant 0 : index
    %c0_450 = arith.constant 0 : index
    %c0_451 = arith.constant 0 : index
    %409 = vector.load %arg7[%c0_449, %c0_450, %c0_451] : memref<4x16x128xf32, #tpu.memory_space<vmem>>, vector<1x16x128xf32>
    %410 = vector.shape_cast %409 : vector<1x16x128xf32> to vector<16x128xf32>
    %cst_452 = arith.constant dense<0.000000e+00> : vector<16x128xf32>
    %411 = tpu.matmul %408, %405, %cst_452 {dimension_numbers = #tpu.dot_dimension_numbers<[1], [0], [0], [1], [0, 0, 1, 1], [], []>} : vector<16x8xf32>, vector<8x128xf32>, vector<16x128xf32> -> vector<16x128xf32>
    %412 = arith.addf %410, %411 : vector<16x128xf32>
    %c0_453 = arith.constant 0 : index
    %c0_454 = arith.constant 0 : index
    %c0_455 = arith.constant 0 : index
    %413 = vector.load %arg7[%c0_453, %c0_454, %c0_455] : memref<4x16x128xf32, #tpu.memory_space<vmem>>, vector<1x16x128xf32>
    %414 = vector.shape_cast %413 : vector<1x16x128xf32> to vector<16x128xf32>
    %415 = vector.shape_cast %412 : vector<16x128xf32> to vector<1x16x128xf32>
    tpu.vector_store %arg7[%c0_453, %c0_454, %c0_455], %415 {strides = array<i32>} : memref<4x16x128xf32, #tpu.memory_space<vmem>>, vector<1x16x128xf32>,
    %c1_456 = arith.constant 1 : index
    %c0_457 = arith.constant 0 : index
    %c0_458 = arith.constant 0 : index
    %416 = vector.load %arg1[%c1_456, %c0_457, %c0_458] : memref<4x16x16xf32, #tpu.memory_space<vmem>>, vector<1x16x16xf32>
    %417 = vector.shape_cast %416 : vector<1x16x16xf32> to vector<16x16xf32>
    %cst_459 = arith.constant dense<0.000000e+00> : vector<16x8xf32>
    %418 = tpu.matmul %417, %376, %cst_459 {dimension_numbers = #tpu.dot_dimension_numbers<[1], [0], [0], [1], [0, 0, 1, 1], [], []>} : vector<16x16xf32>, vector<16x8xf32>, vector<16x8xf32> -> vector<16x8xf32>
    %c1_460 = arith.constant 1 : index
    %c0_461 = arith.constant 0 : index
    %c0_462 = arith.constant 0 : index
    %419 = vector.load %arg7[%c1_460, %c0_461, %c0_462] : memref<4x16x128xf32, #tpu.memory_space<vmem>>, vector<1x16x128xf32>
    %420 = vector.shape_cast %419 : vector<1x16x128xf32> to vector<16x128xf32>
    %cst_463 = arith.constant dense<0.000000e+00> : vector<16x128xf32>
    %421 = tpu.matmul %418, %405, %cst_463 {dimension_numbers = #tpu.dot_dimension_numbers<[1], [0], [0], [1], [0, 0, 1, 1], [], []>} : vector<16x8xf32>, vector<8x128xf32>, vector<16x128xf32> -> vector<16x128xf32>
    %422 = arith.addf %420, %421 : vector<16x128xf32>
    %c1_464 = arith.constant 1 : index
    %c0_465 = arith.constant 0 : index
    %c0_466 = arith.constant 0 : index
    %423 = vector.load %arg7[%c1_464, %c0_465, %c0_466] : memref<4x16x128xf32, #tpu.memory_space<vmem>>, vector<1x16x128xf32>
    %424 = vector.shape_cast %423 : vector<1x16x128xf32> to vector<16x128xf32>
    %425 = vector.shape_cast %422 : vector<16x128xf32> to vector<1x16x128xf32>
    tpu.vector_store %arg7[%c1_464, %c0_465, %c0_466], %425 {strides = array<i32>} : memref<4x16x128xf32, #tpu.memory_space<vmem>>, vector<1x16x128xf32>,
    %c2_467 = arith.constant 2 : index
    %c0_468 = arith.constant 0 : index
    %c0_469 = arith.constant 0 : index
    %426 = vector.load %arg1[%c2_467, %c0_468, %c0_469] : memref<4x16x16xf32, #tpu.memory_space<vmem>>, vector<1x16x16xf32>
    %427 = vector.shape_cast %426 : vector<1x16x16xf32> to vector<16x16xf32>
    %cst_470 = arith.constant dense<0.000000e+00> : vector<16x8xf32>
    %428 = tpu.matmul %427, %386, %cst_470 {dimension_numbers = #tpu.dot_dimension_numbers<[1], [0], [0], [1], [0, 0, 1, 1], [], []>} : vector<16x16xf32>, vector<16x8xf32>, vector<16x8xf32> -> vector<16x8xf32>
    %c2_471 = arith.constant 2 : index
    %c0_472 = arith.constant 0 : index
    %c0_473 = arith.constant 0 : index
    %429 = vector.load %arg7[%c2_471, %c0_472, %c0_473] : memref<4x16x128xf32, #tpu.memory_space<vmem>>, vector<1x16x128xf32>
    %430 = vector.shape_cast %429 : vector<1x16x128xf32> to vector<16x128xf32>
    %cst_474 = arith.constant dense<0.000000e+00> : vector<16x128xf32>
    %431 = tpu.matmul %428, %405, %cst_474 {dimension_numbers = #tpu.dot_dimension_numbers<[1], [0], [0], [1], [0, 0, 1, 1], [], []>} : vector<16x8xf32>, vector<8x128xf32>, vector<16x128xf32> -> vector<16x128xf32>
    %432 = arith.addf %430, %431 : vector<16x128xf32>
    %c2_475 = arith.constant 2 : index
    %c0_476 = arith.constant 0 : index
    %c0_477 = arith.constant 0 : index
    %433 = vector.load %arg7[%c2_475, %c0_476, %c0_477] : memref<4x16x128xf32, #tpu.memory_space<vmem>>, vector<1x16x128xf32>
    %434 = vector.shape_cast %433 : vector<1x16x128xf32> to vector<16x128xf32>
    %435 = vector.shape_cast %432 : vector<16x128xf32> to vector<1x16x128xf32>
    tpu.vector_store %arg7[%c2_475, %c0_476, %c0_477], %435 {strides = array<i32>} : memref<4x16x128xf32, #tpu.memory_space<vmem>>, vector<1x16x128xf32>,
    %c3_478 = arith.constant 3 : index
    %c0_479 = arith.constant 0 : index
    %c0_480 = arith.constant 0 : index
    %436 = vector.load %arg1[%c3_478, %c0_479, %c0_480] : memref<4x16x16xf32, #tpu.memory_space<vmem>>, vector<1x16x16xf32>
    %437 = vector.shape_cast %436 : vector<1x16x16xf32> to vector<16x16xf32>
    %cst_481 = arith.constant dense<0.000000e+00> : vector<16x8xf32>
    %438 = tpu.matmul %437, %396, %cst_481 {dimension_numbers = #tpu.dot_dimension_numbers<[1], [0], [0], [1], [0, 0, 1, 1], [], []>} : vector<16x16xf32>, vector<16x8xf32>, vector<16x8xf32> -> vector<16x8xf32>
    %c3_482 = arith.constant 3 : index
    %c0_483 = arith.constant 0 : index
    %c0_484 = arith.constant 0 : index
    %439 = vector.load %arg7[%c3_482, %c0_483, %c0_484] : memref<4x16x128xf32, #tpu.memory_space<vmem>>, vector<1x16x128xf32>
    %440 = vector.shape_cast %439 : vector<1x16x128xf32> to vector<16x128xf32>
    %cst_485 = arith.constant dense<0.000000e+00> : vector<16x128xf32>
    %441 = tpu.matmul %438, %405, %cst_485 {dimension_numbers = #tpu.dot_dimension_numbers<[1], [0], [0], [1], [0, 0, 1, 1], [], []>} : vector<16x8xf32>, vector<8x128xf32>, vector<16x128xf32> -> vector<16x128xf32>
    %442 = arith.addf %440, %441 : vector<16x128xf32>
    %c3_486 = arith.constant 3 : index
    %c0_487 = arith.constant 0 : index
    %c0_488 = arith.constant 0 : index
    %443 = vector.load %arg7[%c3_486, %c0_487, %c0_488] : memref<4x16x128xf32, #tpu.memory_space<vmem>>, vector<1x16x128xf32>
    %444 = vector.shape_cast %443 : vector<1x16x128xf32> to vector<16x128xf32>
    %445 = vector.shape_cast %442 : vector<16x128xf32> to vector<1x16x128xf32>
    tpu.vector_store %arg7[%c3_486, %c0_487, %c0_488], %445 {strides = array<i32>} : memref<4x16x128xf32, #tpu.memory_space<vmem>>, vector<1x16x128xf32>,
    %c11 = arith.constant 11 : index
    %c0_489 = arith.constant 0 : index
    %c0_490 = arith.constant 0 : index
    %446 = vector.load %arg3[%c11, %c0_489, %c0_490] : memref<16x8x128xf32, #tpu.memory_space<vmem>>, vector<1x8x128xf32>
    %447 = vector.shape_cast %446 : vector<1x8x128xf32> to vector<8x128xf32>
    %c0_491 = arith.constant 0 : index
    %c0_492 = arith.constant 0 : index
    %c0_493 = arith.constant 0 : index
    %448 = vector.load %arg1[%c0_491, %c0_492, %c0_493] : memref<4x16x16xf32, #tpu.memory_space<vmem>>, vector<1x16x16xf32>
    %449 = vector.shape_cast %448 : vector<1x16x16xf32> to vector<16x16xf32>
    %cst_494 = arith.constant dense<0.000000e+00> : vector<16x8xf32>
    %450 = tpu.matmul %449, %408, %cst_494 {dimension_numbers = #tpu.dot_dimension_numbers<[1], [0], [0], [1], [0, 0, 1, 1], [], []>} : vector<16x16xf32>, vector<16x8xf32>, vector<16x8xf32> -> vector<16x8xf32>
    %c0_495 = arith.constant 0 : index
    %c0_496 = arith.constant 0 : index
    %c0_497 = arith.constant 0 : index
    %451 = vector.load %arg7[%c0_495, %c0_496, %c0_497] : memref<4x16x128xf32, #tpu.memory_space<vmem>>, vector<1x16x128xf32>
    %452 = vector.shape_cast %451 : vector<1x16x128xf32> to vector<16x128xf32>
    %cst_498 = arith.constant dense<0.000000e+00> : vector<16x128xf32>
    %453 = tpu.matmul %450, %447, %cst_498 {dimension_numbers = #tpu.dot_dimension_numbers<[1], [0], [0], [1], [0, 0, 1, 1], [], []>} : vector<16x8xf32>, vector<8x128xf32>, vector<16x128xf32> -> vector<16x128xf32>
    %454 = arith.addf %452, %453 : vector<16x128xf32>
    %c0_499 = arith.constant 0 : index
    %c0_500 = arith.constant 0 : index
    %c0_501 = arith.constant 0 : index
    %455 = vector.load %arg7[%c0_499, %c0_500, %c0_501] : memref<4x16x128xf32, #tpu.memory_space<vmem>>, vector<1x16x128xf32>
    %456 = vector.shape_cast %455 : vector<1x16x128xf32> to vector<16x128xf32>
    %457 = vector.shape_cast %454 : vector<16x128xf32> to vector<1x16x128xf32>
    tpu.vector_store %arg7[%c0_499, %c0_500, %c0_501], %457 {strides = array<i32>} : memref<4x16x128xf32, #tpu.memory_space<vmem>>, vector<1x16x128xf32>,
    %c1_502 = arith.constant 1 : index
    %c0_503 = arith.constant 0 : index
    %c0_504 = arith.constant 0 : index
    %458 = vector.load %arg1[%c1_502, %c0_503, %c0_504] : memref<4x16x16xf32, #tpu.memory_space<vmem>>, vector<1x16x16xf32>
    %459 = vector.shape_cast %458 : vector<1x16x16xf32> to vector<16x16xf32>
    %cst_505 = arith.constant dense<0.000000e+00> : vector<16x8xf32>
    %460 = tpu.matmul %459, %418, %cst_505 {dimension_numbers = #tpu.dot_dimension_numbers<[1], [0], [0], [1], [0, 0, 1, 1], [], []>} : vector<16x16xf32>, vector<16x8xf32>, vector<16x8xf32> -> vector<16x8xf32>
    %c1_506 = arith.constant 1 : index
    %c0_507 = arith.constant 0 : index
    %c0_508 = arith.constant 0 : index
    %461 = vector.load %arg7[%c1_506, %c0_507, %c0_508] : memref<4x16x128xf32, #tpu.memory_space<vmem>>, vector<1x16x128xf32>
    %462 = vector.shape_cast %461 : vector<1x16x128xf32> to vector<16x128xf32>
    %cst_509 = arith.constant dense<0.000000e+00> : vector<16x128xf32>
    %463 = tpu.matmul %460, %447, %cst_509 {dimension_numbers = #tpu.dot_dimension_numbers<[1], [0], [0], [1], [0, 0, 1, 1], [], []>} : vector<16x8xf32>, vector<8x128xf32>, vector<16x128xf32> -> vector<16x128xf32>
    %464 = arith.addf %462, %463 : vector<16x128xf32>
    %c1_510 = arith.constant 1 : index
    %c0_511 = arith.constant 0 : index
    %c0_512 = arith.constant 0 : index
    %465 = vector.load %arg7[%c1_510, %c0_511, %c0_512] : memref<4x16x128xf32, #tpu.memory_space<vmem>>, vector<1x16x128xf32>
    %466 = vector.shape_cast %465 : vector<1x16x128xf32> to vector<16x128xf32>
    %467 = vector.shape_cast %464 : vector<16x128xf32> to vector<1x16x128xf32>
    tpu.vector_store %arg7[%c1_510, %c0_511, %c0_512], %467 {strides = array<i32>} : memref<4x16x128xf32, #tpu.memory_space<vmem>>, vector<1x16x128xf32>,
    %c2_513 = arith.constant 2 : index
    %c0_514 = arith.constant 0 : index
    %c0_515 = arith.constant 0 : index
    %468 = vector.load %arg1[%c2_513, %c0_514, %c0_515] : memref<4x16x16xf32, #tpu.memory_space<vmem>>, vector<1x16x16xf32>
    %469 = vector.shape_cast %468 : vector<1x16x16xf32> to vector<16x16xf32>
    %cst_516 = arith.constant dense<0.000000e+00> : vector<16x8xf32>
    %470 = tpu.matmul %469, %428, %cst_516 {dimension_numbers = #tpu.dot_dimension_numbers<[1], [0], [0], [1], [0, 0, 1, 1], [], []>} : vector<16x16xf32>, vector<16x8xf32>, vector<16x8xf32> -> vector<16x8xf32>
    %c2_517 = arith.constant 2 : index
    %c0_518 = arith.constant 0 : index
    %c0_519 = arith.constant 0 : index
    %471 = vector.load %arg7[%c2_517, %c0_518, %c0_519] : memref<4x16x128xf32, #tpu.memory_space<vmem>>, vector<1x16x128xf32>
    %472 = vector.shape_cast %471 : vector<1x16x128xf32> to vector<16x128xf32>
    %cst_520 = arith.constant dense<0.000000e+00> : vector<16x128xf32>
    %473 = tpu.matmul %470, %447, %cst_520 {dimension_numbers = #tpu.dot_dimension_numbers<[1], [0], [0], [1], [0, 0, 1, 1], [], []>} : vector<16x8xf32>, vector<8x128xf32>, vector<16x128xf32> -> vector<16x128xf32>
    %474 = arith.addf %472, %473 : vector<16x128xf32>
    %c2_521 = arith.constant 2 : index
    %c0_522 = arith.constant 0 : index
    %c0_523 = arith.constant 0 : index
    %475 = vector.load %arg7[%c2_521, %c0_522, %c0_523] : memref<4x16x128xf32, #tpu.memory_space<vmem>>, vector<1x16x128xf32>
    %476 = vector.shape_cast %475 : vector<1x16x128xf32> to vector<16x128xf32>
    %477 = vector.shape_cast %474 : vector<16x128xf32> to vector<1x16x128xf32>
    tpu.vector_store %arg7[%c2_521, %c0_522, %c0_523], %477 {strides = array<i32>} : memref<4x16x128xf32, #tpu.memory_space<vmem>>, vector<1x16x128xf32>,
    %c3_524 = arith.constant 3 : index
    %c0_525 = arith.constant 0 : index
    %c0_526 = arith.constant 0 : index
    %478 = vector.load %arg1[%c3_524, %c0_525, %c0_526] : memref<4x16x16xf32, #tpu.memory_space<vmem>>, vector<1x16x16xf32>
    %479 = vector.shape_cast %478 : vector<1x16x16xf32> to vector<16x16xf32>
    %cst_527 = arith.constant dense<0.000000e+00> : vector<16x8xf32>
    %480 = tpu.matmul %479, %438, %cst_527 {dimension_numbers = #tpu.dot_dimension_numbers<[1], [0], [0], [1], [0, 0, 1, 1], [], []>} : vector<16x16xf32>, vector<16x8xf32>, vector<16x8xf32> -> vector<16x8xf32>
    %c3_528 = arith.constant 3 : index
    %c0_529 = arith.constant 0 : index
    %c0_530 = arith.constant 0 : index
    %481 = vector.load %arg7[%c3_528, %c0_529, %c0_530] : memref<4x16x128xf32, #tpu.memory_space<vmem>>, vector<1x16x128xf32>
    %482 = vector.shape_cast %481 : vector<1x16x128xf32> to vector<16x128xf32>
    %cst_531 = arith.constant dense<0.000000e+00> : vector<16x128xf32>
    %483 = tpu.matmul %480, %447, %cst_531 {dimension_numbers = #tpu.dot_dimension_numbers<[1], [0], [0], [1], [0, 0, 1, 1], [], []>} : vector<16x8xf32>, vector<8x128xf32>, vector<16x128xf32> -> vector<16x128xf32>
    %484 = arith.addf %482, %483 : vector<16x128xf32>
    %c3_532 = arith.constant 3 : index
    %c0_533 = arith.constant 0 : index
    %c0_534 = arith.constant 0 : index
    %485 = vector.load %arg7[%c3_532, %c0_533, %c0_534] : memref<4x16x128xf32, #tpu.memory_space<vmem>>, vector<1x16x128xf32>
    %486 = vector.shape_cast %485 : vector<1x16x128xf32> to vector<16x128xf32>
    %487 = vector.shape_cast %484 : vector<16x128xf32> to vector<1x16x128xf32>
    tpu.vector_store %arg7[%c3_532, %c0_533, %c0_534], %487 {strides = array<i32>} : memref<4x16x128xf32, #tpu.memory_space<vmem>>, vector<1x16x128xf32>,
    %c12 = arith.constant 12 : index
    %c0_535 = arith.constant 0 : index
    %c0_536 = arith.constant 0 : index
    %488 = vector.load %arg3[%c12, %c0_535, %c0_536] : memref<16x8x128xf32, #tpu.memory_space<vmem>>, vector<1x8x128xf32>
    %489 = vector.shape_cast %488 : vector<1x8x128xf32> to vector<8x128xf32>
    %c0_537 = arith.constant 0 : index
    %c0_538 = arith.constant 0 : index
    %c0_539 = arith.constant 0 : index
    %490 = vector.load %arg1[%c0_537, %c0_538, %c0_539] : memref<4x16x16xf32, #tpu.memory_space<vmem>>, vector<1x16x16xf32>
    %491 = vector.shape_cast %490 : vector<1x16x16xf32> to vector<16x16xf32>
    %cst_540 = arith.constant dense<0.000000e+00> : vector<16x8xf32>
    %492 = tpu.matmul %491, %450, %cst_540 {dimension_numbers = #tpu.dot_dimension_numbers<[1], [0], [0], [1], [0, 0, 1, 1], [], []>} : vector<16x16xf32>, vector<16x8xf32>, vector<16x8xf32> -> vector<16x8xf32>
    %c0_541 = arith.constant 0 : index
    %c0_542 = arith.constant 0 : index
    %c0_543 = arith.constant 0 : index
    %493 = vector.load %arg7[%c0_541, %c0_542, %c0_543] : memref<4x16x128xf32, #tpu.memory_space<vmem>>, vector<1x16x128xf32>
    %494 = vector.shape_cast %493 : vector<1x16x128xf32> to vector<16x128xf32>
    %cst_544 = arith.constant dense<0.000000e+00> : vector<16x128xf32>
    %495 = tpu.matmul %492, %489, %cst_544 {dimension_numbers = #tpu.dot_dimension_numbers<[1], [0], [0], [1], [0, 0, 1, 1], [], []>} : vector<16x8xf32>, vector<8x128xf32>, vector<16x128xf32> -> vector<16x128xf32>
    %496 = arith.addf %494, %495 : vector<16x128xf32>
    %c0_545 = arith.constant 0 : index
    %c0_546 = arith.constant 0 : index
    %c0_547 = arith.constant 0 : index
    %497 = vector.load %arg7[%c0_545, %c0_546, %c0_547] : memref<4x16x128xf32, #tpu.memory_space<vmem>>, vector<1x16x128xf32>
    %498 = vector.shape_cast %497 : vector<1x16x128xf32> to vector<16x128xf32>
    %499 = vector.shape_cast %496 : vector<16x128xf32> to vector<1x16x128xf32>
    tpu.vector_store %arg7[%c0_545, %c0_546, %c0_547], %499 {strides = array<i32>} : memref<4x16x128xf32, #tpu.memory_space<vmem>>, vector<1x16x128xf32>,
    %c1_548 = arith.constant 1 : index
    %c0_549 = arith.constant 0 : index
    %c0_550 = arith.constant 0 : index
    %500 = vector.load %arg1[%c1_548, %c0_549, %c0_550] : memref<4x16x16xf32, #tpu.memory_space<vmem>>, vector<1x16x16xf32>
    %501 = vector.shape_cast %500 : vector<1x16x16xf32> to vector<16x16xf32>
    %cst_551 = arith.constant dense<0.000000e+00> : vector<16x8xf32>
    %502 = tpu.matmul %501, %460, %cst_551 {dimension_numbers = #tpu.dot_dimension_numbers<[1], [0], [0], [1], [0, 0, 1, 1], [], []>} : vector<16x16xf32>, vector<16x8xf32>, vector<16x8xf32> -> vector<16x8xf32>
    %c1_552 = arith.constant 1 : index
    %c0_553 = arith.constant 0 : index
    %c0_554 = arith.constant 0 : index
    %503 = vector.load %arg7[%c1_552, %c0_553, %c0_554] : memref<4x16x128xf32, #tpu.memory_space<vmem>>, vector<1x16x128xf32>
    %504 = vector.shape_cast %503 : vector<1x16x128xf32> to vector<16x128xf32>
    %cst_555 = arith.constant dense<0.000000e+00> : vector<16x128xf32>
    %505 = tpu.matmul %502, %489, %cst_555 {dimension_numbers = #tpu.dot_dimension_numbers<[1], [0], [0], [1], [0, 0, 1, 1], [], []>} : vector<16x8xf32>, vector<8x128xf32>, vector<16x128xf32> -> vector<16x128xf32>
    %506 = arith.addf %504, %505 : vector<16x128xf32>
    %c1_556 = arith.constant 1 : index
    %c0_557 = arith.constant 0 : index
    %c0_558 = arith.constant 0 : index
    %507 = vector.load %arg7[%c1_556, %c0_557, %c0_558] : memref<4x16x128xf32, #tpu.memory_space<vmem>>, vector<1x16x128xf32>
    %508 = vector.shape_cast %507 : vector<1x16x128xf32> to vector<16x128xf32>
    %509 = vector.shape_cast %506 : vector<16x128xf32> to vector<1x16x128xf32>
    tpu.vector_store %arg7[%c1_556, %c0_557, %c0_558], %509 {strides = array<i32>} : memref<4x16x128xf32, #tpu.memory_space<vmem>>, vector<1x16x128xf32>,
    %c2_559 = arith.constant 2 : index
    %c0_560 = arith.constant 0 : index
    %c0_561 = arith.constant 0 : index
    %510 = vector.load %arg1[%c2_559, %c0_560, %c0_561] : memref<4x16x16xf32, #tpu.memory_space<vmem>>, vector<1x16x16xf32>
    %511 = vector.shape_cast %510 : vector<1x16x16xf32> to vector<16x16xf32>
    %cst_562 = arith.constant dense<0.000000e+00> : vector<16x8xf32>
    %512 = tpu.matmul %511, %470, %cst_562 {dimension_numbers = #tpu.dot_dimension_numbers<[1], [0], [0], [1], [0, 0, 1, 1], [], []>} : vector<16x16xf32>, vector<16x8xf32>, vector<16x8xf32> -> vector<16x8xf32>
    %c2_563 = arith.constant 2 : index
    %c0_564 = arith.constant 0 : index
    %c0_565 = arith.constant 0 : index
    %513 = vector.load %arg7[%c2_563, %c0_564, %c0_565] : memref<4x16x128xf32, #tpu.memory_space<vmem>>, vector<1x16x128xf32>
    %514 = vector.shape_cast %513 : vector<1x16x128xf32> to vector<16x128xf32>
    %cst_566 = arith.constant dense<0.000000e+00> : vector<16x128xf32>
    %515 = tpu.matmul %512, %489, %cst_566 {dimension_numbers = #tpu.dot_dimension_numbers<[1], [0], [0], [1], [0, 0, 1, 1], [], []>} : vector<16x8xf32>, vector<8x128xf32>, vector<16x128xf32> -> vector<16x128xf32>
    %516 = arith.addf %514, %515 : vector<16x128xf32>
    %c2_567 = arith.constant 2 : index
    %c0_568 = arith.constant 0 : index
    %c0_569 = arith.constant 0 : index
    %517 = vector.load %arg7[%c2_567, %c0_568, %c0_569] : memref<4x16x128xf32, #tpu.memory_space<vmem>>, vector<1x16x128xf32>
    %518 = vector.shape_cast %517 : vector<1x16x128xf32> to vector<16x128xf32>
    %519 = vector.shape_cast %516 : vector<16x128xf32> to vector<1x16x128xf32>
    tpu.vector_store %arg7[%c2_567, %c0_568, %c0_569], %519 {strides = array<i32>} : memref<4x16x128xf32, #tpu.memory_space<vmem>>, vector<1x16x128xf32>,
    %c3_570 = arith.constant 3 : index
    %c0_571 = arith.constant 0 : index
    %c0_572 = arith.constant 0 : index
    %520 = vector.load %arg1[%c3_570, %c0_571, %c0_572] : memref<4x16x16xf32, #tpu.memory_space<vmem>>, vector<1x16x16xf32>
    %521 = vector.shape_cast %520 : vector<1x16x16xf32> to vector<16x16xf32>
    %cst_573 = arith.constant dense<0.000000e+00> : vector<16x8xf32>
    %522 = tpu.matmul %521, %480, %cst_573 {dimension_numbers = #tpu.dot_dimension_numbers<[1], [0], [0], [1], [0, 0, 1, 1], [], []>} : vector<16x16xf32>, vector<16x8xf32>, vector<16x8xf32> -> vector<16x8xf32>
    %c3_574 = arith.constant 3 : index
    %c0_575 = arith.constant 0 : index
    %c0_576 = arith.constant 0 : index
    %523 = vector.load %arg7[%c3_574, %c0_575, %c0_576] : memref<4x16x128xf32, #tpu.memory_space<vmem>>, vector<1x16x128xf32>
    %524 = vector.shape_cast %523 : vector<1x16x128xf32> to vector<16x128xf32>
    %cst_577 = arith.constant dense<0.000000e+00> : vector<16x128xf32>
    %525 = tpu.matmul %522, %489, %cst_577 {dimension_numbers = #tpu.dot_dimension_numbers<[1], [0], [0], [1], [0, 0, 1, 1], [], []>} : vector<16x8xf32>, vector<8x128xf32>, vector<16x128xf32> -> vector<16x128xf32>
    %526 = arith.addf %524, %525 : vector<16x128xf32>
    %c3_578 = arith.constant 3 : index
    %c0_579 = arith.constant 0 : index
    %c0_580 = arith.constant 0 : index
    %527 = vector.load %arg7[%c3_578, %c0_579, %c0_580] : memref<4x16x128xf32, #tpu.memory_space<vmem>>, vector<1x16x128xf32>
    %528 = vector.shape_cast %527 : vector<1x16x128xf32> to vector<16x128xf32>
    %529 = vector.shape_cast %526 : vector<16x128xf32> to vector<1x16x128xf32>
    tpu.vector_store %arg7[%c3_578, %c0_579, %c0_580], %529 {strides = array<i32>} : memref<4x16x128xf32, #tpu.memory_space<vmem>>, vector<1x16x128xf32>,
    %c13 = arith.constant 13 : index
    %c0_581 = arith.constant 0 : index
    %c0_582 = arith.constant 0 : index
    %530 = vector.load %arg3[%c13, %c0_581, %c0_582] : memref<16x8x128xf32, #tpu.memory_space<vmem>>, vector<1x8x128xf32>
    %531 = vector.shape_cast %530 : vector<1x8x128xf32> to vector<8x128xf32>
    %c0_583 = arith.constant 0 : index
    %c0_584 = arith.constant 0 : index
    %c0_585 = arith.constant 0 : index
    %532 = vector.load %arg1[%c0_583, %c0_584, %c0_585] : memref<4x16x16xf32, #tpu.memory_space<vmem>>, vector<1x16x16xf32>
    %533 = vector.shape_cast %532 : vector<1x16x16xf32> to vector<16x16xf32>
    %cst_586 = arith.constant dense<0.000000e+00> : vector<16x8xf32>
    %534 = tpu.matmul %533, %492, %cst_586 {dimension_numbers = #tpu.dot_dimension_numbers<[1], [0], [0], [1], [0, 0, 1, 1], [], []>} : vector<16x16xf32>, vector<16x8xf32>, vector<16x8xf32> -> vector<16x8xf32>
    %c0_587 = arith.constant 0 : index
    %c0_588 = arith.constant 0 : index
    %c0_589 = arith.constant 0 : index
    %535 = vector.load %arg7[%c0_587, %c0_588, %c0_589] : memref<4x16x128xf32, #tpu.memory_space<vmem>>, vector<1x16x128xf32>
    %536 = vector.shape_cast %535 : vector<1x16x128xf32> to vector<16x128xf32>
    %cst_590 = arith.constant dense<0.000000e+00> : vector<16x128xf32>
    %537 = tpu.matmul %534, %531, %cst_590 {dimension_numbers = #tpu.dot_dimension_numbers<[1], [0], [0], [1], [0, 0, 1, 1], [], []>} : vector<16x8xf32>, vector<8x128xf32>, vector<16x128xf32> -> vector<16x128xf32>
    %538 = arith.addf %536, %537 : vector<16x128xf32>
    %c0_591 = arith.constant 0 : index
    %c0_592 = arith.constant 0 : index
    %c0_593 = arith.constant 0 : index
    %539 = vector.load %arg7[%c0_591, %c0_592, %c0_593] : memref<4x16x128xf32, #tpu.memory_space<vmem>>, vector<1x16x128xf32>
    %540 = vector.shape_cast %539 : vector<1x16x128xf32> to vector<16x128xf32>
    %541 = vector.shape_cast %538 : vector<16x128xf32> to vector<1x16x128xf32>
    tpu.vector_store %arg7[%c0_591, %c0_592, %c0_593], %541 {strides = array<i32>} : memref<4x16x128xf32, #tpu.memory_space<vmem>>, vector<1x16x128xf32>,
    %c1_594 = arith.constant 1 : index
    %c0_595 = arith.constant 0 : index
    %c0_596 = arith.constant 0 : index
    %542 = vector.load %arg1[%c1_594, %c0_595, %c0_596] : memref<4x16x16xf32, #tpu.memory_space<vmem>>, vector<1x16x16xf32>
    %543 = vector.shape_cast %542 : vector<1x16x16xf32> to vector<16x16xf32>
    %cst_597 = arith.constant dense<0.000000e+00> : vector<16x8xf32>
    %544 = tpu.matmul %543, %502, %cst_597 {dimension_numbers = #tpu.dot_dimension_numbers<[1], [0], [0], [1], [0, 0, 1, 1], [], []>} : vector<16x16xf32>, vector<16x8xf32>, vector<16x8xf32> -> vector<16x8xf32>
    %c1_598 = arith.constant 1 : index
    %c0_599 = arith.constant 0 : index
    %c0_600 = arith.constant 0 : index
    %545 = vector.load %arg7[%c1_598, %c0_599, %c0_600] : memref<4x16x128xf32, #tpu.memory_space<vmem>>, vector<1x16x128xf32>
    %546 = vector.shape_cast %545 : vector<1x16x128xf32> to vector<16x128xf32>
    %cst_601 = arith.constant dense<0.000000e+00> : vector<16x128xf32>
    %547 = tpu.matmul %544, %531, %cst_601 {dimension_numbers = #tpu.dot_dimension_numbers<[1], [0], [0], [1], [0, 0, 1, 1], [], []>} : vector<16x8xf32>, vector<8x128xf32>, vector<16x128xf32> -> vector<16x128xf32>
    %548 = arith.addf %546, %547 : vector<16x128xf32>
    %c1_602 = arith.constant 1 : index
    %c0_603 = arith.constant 0 : index
    %c0_604 = arith.constant 0 : index
    %549 = vector.load %arg7[%c1_602, %c0_603, %c0_604] : memref<4x16x128xf32, #tpu.memory_space<vmem>>, vector<1x16x128xf32>
    %550 = vector.shape_cast %549 : vector<1x16x128xf32> to vector<16x128xf32>
    %551 = vector.shape_cast %548 : vector<16x128xf32> to vector<1x16x128xf32>
    tpu.vector_store %arg7[%c1_602, %c0_603, %c0_604], %551 {strides = array<i32>} : memref<4x16x128xf32, #tpu.memory_space<vmem>>, vector<1x16x128xf32>,
    %c2_605 = arith.constant 2 : index
    %c0_606 = arith.constant 0 : index
    %c0_607 = arith.constant 0 : index
    %552 = vector.load %arg1[%c2_605, %c0_606, %c0_607] : memref<4x16x16xf32, #tpu.memory_space<vmem>>, vector<1x16x16xf32>
    %553 = vector.shape_cast %552 : vector<1x16x16xf32> to vector<16x16xf32>
    %cst_608 = arith.constant dense<0.000000e+00> : vector<16x8xf32>
    %554 = tpu.matmul %553, %512, %cst_608 {dimension_numbers = #tpu.dot_dimension_numbers<[1], [0], [0], [1], [0, 0, 1, 1], [], []>} : vector<16x16xf32>, vector<16x8xf32>, vector<16x8xf32> -> vector<16x8xf32>
    %c2_609 = arith.constant 2 : index
    %c0_610 = arith.constant 0 : index
    %c0_611 = arith.constant 0 : index
    %555 = vector.load %arg7[%c2_609, %c0_610, %c0_611] : memref<4x16x128xf32, #tpu.memory_space<vmem>>, vector<1x16x128xf32>
    %556 = vector.shape_cast %555 : vector<1x16x128xf32> to vector<16x128xf32>
    %cst_612 = arith.constant dense<0.000000e+00> : vector<16x128xf32>
    %557 = tpu.matmul %554, %531, %cst_612 {dimension_numbers = #tpu.dot_dimension_numbers<[1], [0], [0], [1], [0, 0, 1, 1], [], []>} : vector<16x8xf32>, vector<8x128xf32>, vector<16x128xf32> -> vector<16x128xf32>
    %558 = arith.addf %556, %557 : vector<16x128xf32>
    %c2_613 = arith.constant 2 : index
    %c0_614 = arith.constant 0 : index
    %c0_615 = arith.constant 0 : index
    %559 = vector.load %arg7[%c2_613, %c0_614, %c0_615] : memref<4x16x128xf32, #tpu.memory_space<vmem>>, vector<1x16x128xf32>
    %560 = vector.shape_cast %559 : vector<1x16x128xf32> to vector<16x128xf32>
    %561 = vector.shape_cast %558 : vector<16x128xf32> to vector<1x16x128xf32>
    tpu.vector_store %arg7[%c2_613, %c0_614, %c0_615], %561 {strides = array<i32>} : memref<4x16x128xf32, #tpu.memory_space<vmem>>, vector<1x16x128xf32>,
    %c3_616 = arith.constant 3 : index
    %c0_617 = arith.constant 0 : index
    %c0_618 = arith.constant 0 : index
    %562 = vector.load %arg1[%c3_616, %c0_617, %c0_618] : memref<4x16x16xf32, #tpu.memory_space<vmem>>, vector<1x16x16xf32>
    %563 = vector.shape_cast %562 : vector<1x16x16xf32> to vector<16x16xf32>
    %cst_619 = arith.constant dense<0.000000e+00> : vector<16x8xf32>
    %564 = tpu.matmul %563, %522, %cst_619 {dimension_numbers = #tpu.dot_dimension_numbers<[1], [0], [0], [1], [0, 0, 1, 1], [], []>} : vector<16x16xf32>, vector<16x8xf32>, vector<16x8xf32> -> vector<16x8xf32>
    %c3_620 = arith.constant 3 : index
    %c0_621 = arith.constant 0 : index
    %c0_622 = arith.constant 0 : index
    %565 = vector.load %arg7[%c3_620, %c0_621, %c0_622] : memref<4x16x128xf32, #tpu.memory_space<vmem>>, vector<1x16x128xf32>
    %566 = vector.shape_cast %565 : vector<1x16x128xf32> to vector<16x128xf32>
    %cst_623 = arith.constant dense<0.000000e+00> : vector<16x128xf32>
    %567 = tpu.matmul %564, %531, %cst_623 {dimension_numbers = #tpu.dot_dimension_numbers<[1], [0], [0], [1], [0, 0, 1, 1], [], []>} : vector<16x8xf32>, vector<8x128xf32>, vector<16x128xf32> -> vector<16x128xf32>
    %568 = arith.addf %566, %567 : vector<16x128xf32>
    %c3_624 = arith.constant 3 : index
    %c0_625 = arith.constant 0 : index
    %c0_626 = arith.constant 0 : index
    %569 = vector.load %arg7[%c3_624, %c0_625, %c0_626] : memref<4x16x128xf32, #tpu.memory_space<vmem>>, vector<1x16x128xf32>
    %570 = vector.shape_cast %569 : vector<1x16x128xf32> to vector<16x128xf32>
    %571 = vector.shape_cast %568 : vector<16x128xf32> to vector<1x16x128xf32>
    tpu.vector_store %arg7[%c3_624, %c0_625, %c0_626], %571 {strides = array<i32>} : memref<4x16x128xf32, #tpu.memory_space<vmem>>, vector<1x16x128xf32>,
    %c14 = arith.constant 14 : index
    %c0_627 = arith.constant 0 : index
    %c0_628 = arith.constant 0 : index
    %572 = vector.load %arg3[%c14, %c0_627, %c0_628] : memref<16x8x128xf32, #tpu.memory_space<vmem>>, vector<1x8x128xf32>
    %573 = vector.shape_cast %572 : vector<1x8x128xf32> to vector<8x128xf32>
    %c0_629 = arith.constant 0 : index
    %c0_630 = arith.constant 0 : index
    %c0_631 = arith.constant 0 : index
    %574 = vector.load %arg1[%c0_629, %c0_630, %c0_631] : memref<4x16x16xf32, #tpu.memory_space<vmem>>, vector<1x16x16xf32>
    %575 = vector.shape_cast %574 : vector<1x16x16xf32> to vector<16x16xf32>
    %cst_632 = arith.constant dense<0.000000e+00> : vector<16x8xf32>
    %576 = tpu.matmul %575, %534, %cst_632 {dimension_numbers = #tpu.dot_dimension_numbers<[1], [0], [0], [1], [0, 0, 1, 1], [], []>} : vector<16x16xf32>, vector<16x8xf32>, vector<16x8xf32> -> vector<16x8xf32>
    %c0_633 = arith.constant 0 : index
    %c0_634 = arith.constant 0 : index
    %c0_635 = arith.constant 0 : index
    %577 = vector.load %arg7[%c0_633, %c0_634, %c0_635] : memref<4x16x128xf32, #tpu.memory_space<vmem>>, vector<1x16x128xf32>
    %578 = vector.shape_cast %577 : vector<1x16x128xf32> to vector<16x128xf32>
    %cst_636 = arith.constant dense<0.000000e+00> : vector<16x128xf32>
    %579 = tpu.matmul %576, %573, %cst_636 {dimension_numbers = #tpu.dot_dimension_numbers<[1], [0], [0], [1], [0, 0, 1, 1], [], []>} : vector<16x8xf32>, vector<8x128xf32>, vector<16x128xf32> -> vector<16x128xf32>
    %580 = arith.addf %578, %579 : vector<16x128xf32>
    %c0_637 = arith.constant 0 : index
    %c0_638 = arith.constant 0 : index
    %c0_639 = arith.constant 0 : index
    %581 = vector.load %arg7[%c0_637, %c0_638, %c0_639] : memref<4x16x128xf32, #tpu.memory_space<vmem>>, vector<1x16x128xf32>
    %582 = vector.shape_cast %581 : vector<1x16x128xf32> to vector<16x128xf32>
    %583 = vector.shape_cast %580 : vector<16x128xf32> to vector<1x16x128xf32>
    tpu.vector_store %arg7[%c0_637, %c0_638, %c0_639], %583 {strides = array<i32>} : memref<4x16x128xf32, #tpu.memory_space<vmem>>, vector<1x16x128xf32>,
    %c1_640 = arith.constant 1 : index
    %c0_641 = arith.constant 0 : index
    %c0_642 = arith.constant 0 : index
    %584 = vector.load %arg1[%c1_640, %c0_641, %c0_642] : memref<4x16x16xf32, #tpu.memory_space<vmem>>, vector<1x16x16xf32>
    %585 = vector.shape_cast %584 : vector<1x16x16xf32> to vector<16x16xf32>
    %cst_643 = arith.constant dense<0.000000e+00> : vector<16x8xf32>
    %586 = tpu.matmul %585, %544, %cst_643 {dimension_numbers = #tpu.dot_dimension_numbers<[1], [0], [0], [1], [0, 0, 1, 1], [], []>} : vector<16x16xf32>, vector<16x8xf32>, vector<16x8xf32> -> vector<16x8xf32>
    %c1_644 = arith.constant 1 : index
    %c0_645 = arith.constant 0 : index
    %c0_646 = arith.constant 0 : index
    %587 = vector.load %arg7[%c1_644, %c0_645, %c0_646] : memref<4x16x128xf32, #tpu.memory_space<vmem>>, vector<1x16x128xf32>
    %588 = vector.shape_cast %587 : vector<1x16x128xf32> to vector<16x128xf32>
    %cst_647 = arith.constant dense<0.000000e+00> : vector<16x128xf32>
    %589 = tpu.matmul %586, %573, %cst_647 {dimension_numbers = #tpu.dot_dimension_numbers<[1], [0], [0], [1], [0, 0, 1, 1], [], []>} : vector<16x8xf32>, vector<8x128xf32>, vector<16x128xf32> -> vector<16x128xf32>
    %590 = arith.addf %588, %589 : vector<16x128xf32>
    %c1_648 = arith.constant 1 : index
    %c0_649 = arith.constant 0 : index
    %c0_650 = arith.constant 0 : index
    %591 = vector.load %arg7[%c1_648, %c0_649, %c0_650] : memref<4x16x128xf32, #tpu.memory_space<vmem>>, vector<1x16x128xf32>
    %592 = vector.shape_cast %591 : vector<1x16x128xf32> to vector<16x128xf32>
    %593 = vector.shape_cast %590 : vector<16x128xf32> to vector<1x16x128xf32>
    tpu.vector_store %arg7[%c1_648, %c0_649, %c0_650], %593 {strides = array<i32>} : memref<4x16x128xf32, #tpu.memory_space<vmem>>, vector<1x16x128xf32>,
    %c2_651 = arith.constant 2 : index
    %c0_652 = arith.constant 0 : index
    %c0_653 = arith.constant 0 : index
    %594 = vector.load %arg1[%c2_651, %c0_652, %c0_653] : memref<4x16x16xf32, #tpu.memory_space<vmem>>, vector<1x16x16xf32>
    %595 = vector.shape_cast %594 : vector<1x16x16xf32> to vector<16x16xf32>
    %cst_654 = arith.constant dense<0.000000e+00> : vector<16x8xf32>
    %596 = tpu.matmul %595, %554, %cst_654 {dimension_numbers = #tpu.dot_dimension_numbers<[1], [0], [0], [1], [0, 0, 1, 1], [], []>} : vector<16x16xf32>, vector<16x8xf32>, vector<16x8xf32> -> vector<16x8xf32>
    %c2_655 = arith.constant 2 : index
    %c0_656 = arith.constant 0 : index
    %c0_657 = arith.constant 0 : index
    %597 = vector.load %arg7[%c2_655, %c0_656, %c0_657] : memref<4x16x128xf32, #tpu.memory_space<vmem>>, vector<1x16x128xf32>
    %598 = vector.shape_cast %597 : vector<1x16x128xf32> to vector<16x128xf32>
    %cst_658 = arith.constant dense<0.000000e+00> : vector<16x128xf32>
    %599 = tpu.matmul %596, %573, %cst_658 {dimension_numbers = #tpu.dot_dimension_numbers<[1], [0], [0], [1], [0, 0, 1, 1], [], []>} : vector<16x8xf32>, vector<8x128xf32>, vector<16x128xf32> -> vector<16x128xf32>
    %600 = arith.addf %598, %599 : vector<16x128xf32>
    %c2_659 = arith.constant 2 : index
    %c0_660 = arith.constant 0 : index
    %c0_661 = arith.constant 0 : index
    %601 = vector.load %arg7[%c2_659, %c0_660, %c0_661] : memref<4x16x128xf32, #tpu.memory_space<vmem>>, vector<1x16x128xf32>
    %602 = vector.shape_cast %601 : vector<1x16x128xf32> to vector<16x128xf32>
    %603 = vector.shape_cast %600 : vector<16x128xf32> to vector<1x16x128xf32>
    tpu.vector_store %arg7[%c2_659, %c0_660, %c0_661], %603 {strides = array<i32>} : memref<4x16x128xf32, #tpu.memory_space<vmem>>, vector<1x16x128xf32>,
    %c3_662 = arith.constant 3 : index
    %c0_663 = arith.constant 0 : index
    %c0_664 = arith.constant 0 : index
    %604 = vector.load %arg1[%c3_662, %c0_663, %c0_664] : memref<4x16x16xf32, #tpu.memory_space<vmem>>, vector<1x16x16xf32>
    %605 = vector.shape_cast %604 : vector<1x16x16xf32> to vector<16x16xf32>
    %cst_665 = arith.constant dense<0.000000e+00> : vector<16x8xf32>
    %606 = tpu.matmul %605, %564, %cst_665 {dimension_numbers = #tpu.dot_dimension_numbers<[1], [0], [0], [1], [0, 0, 1, 1], [], []>} : vector<16x16xf32>, vector<16x8xf32>, vector<16x8xf32> -> vector<16x8xf32>
    %c3_666 = arith.constant 3 : index
    %c0_667 = arith.constant 0 : index
    %c0_668 = arith.constant 0 : index
    %607 = vector.load %arg7[%c3_666, %c0_667, %c0_668] : memref<4x16x128xf32, #tpu.memory_space<vmem>>, vector<1x16x128xf32>
    %608 = vector.shape_cast %607 : vector<1x16x128xf32> to vector<16x128xf32>
    %cst_669 = arith.constant dense<0.000000e+00> : vector<16x128xf32>
    %609 = tpu.matmul %606, %573, %cst_669 {dimension_numbers = #tpu.dot_dimension_numbers<[1], [0], [0], [1], [0, 0, 1, 1], [], []>} : vector<16x8xf32>, vector<8x128xf32>, vector<16x128xf32> -> vector<16x128xf32>
    %610 = arith.addf %608, %609 : vector<16x128xf32>
    %c3_670 = arith.constant 3 : index
    %c0_671 = arith.constant 0 : index
    %c0_672 = arith.constant 0 : index
    %611 = vector.load %arg7[%c3_670, %c0_671, %c0_672] : memref<4x16x128xf32, #tpu.memory_space<vmem>>, vector<1x16x128xf32>
    %612 = vector.shape_cast %611 : vector<1x16x128xf32> to vector<16x128xf32>
    %613 = vector.shape_cast %610 : vector<16x128xf32> to vector<1x16x128xf32>
    tpu.vector_store %arg7[%c3_670, %c0_671, %c0_672], %613 {strides = array<i32>} : memref<4x16x128xf32, #tpu.memory_space<vmem>>, vector<1x16x128xf32>,
    %c15 = arith.constant 15 : index
    %c0_673 = arith.constant 0 : index
    %c0_674 = arith.constant 0 : index
    %614 = vector.load %arg3[%c15, %c0_673, %c0_674] : memref<16x8x128xf32, #tpu.memory_space<vmem>>, vector<1x8x128xf32>
    %615 = vector.shape_cast %614 : vector<1x8x128xf32> to vector<8x128xf32>
    %c0_675 = arith.constant 0 : index
    %c0_676 = arith.constant 0 : index
    %c0_677 = arith.constant 0 : index
    %616 = vector.load %arg1[%c0_675, %c0_676, %c0_677] : memref<4x16x16xf32, #tpu.memory_space<vmem>>, vector<1x16x16xf32>
    %617 = vector.shape_cast %616 : vector<1x16x16xf32> to vector<16x16xf32>
    %cst_678 = arith.constant dense<0.000000e+00> : vector<16x8xf32>
    %618 = tpu.matmul %617, %576, %cst_678 {dimension_numbers = #tpu.dot_dimension_numbers<[1], [0], [0], [1], [0, 0, 1, 1], [], []>} : vector<16x16xf32>, vector<16x8xf32>, vector<16x8xf32> -> vector<16x8xf32>
    %c0_679 = arith.constant 0 : index
    %c0_680 = arith.constant 0 : index
    %c0_681 = arith.constant 0 : index
    %619 = vector.load %arg7[%c0_679, %c0_680, %c0_681] : memref<4x16x128xf32, #tpu.memory_space<vmem>>, vector<1x16x128xf32>
    %620 = vector.shape_cast %619 : vector<1x16x128xf32> to vector<16x128xf32>
    %cst_682 = arith.constant dense<0.000000e+00> : vector<16x128xf32>
    %621 = tpu.matmul %618, %615, %cst_682 {dimension_numbers = #tpu.dot_dimension_numbers<[1], [0], [0], [1], [0, 0, 1, 1], [], []>} : vector<16x8xf32>, vector<8x128xf32>, vector<16x128xf32> -> vector<16x128xf32>
    %622 = arith.addf %620, %621 : vector<16x128xf32>
    %c0_683 = arith.constant 0 : index
    %c0_684 = arith.constant 0 : index
    %c0_685 = arith.constant 0 : index
    %623 = vector.load %arg7[%c0_683, %c0_684, %c0_685] : memref<4x16x128xf32, #tpu.memory_space<vmem>>, vector<1x16x128xf32>
    %624 = vector.shape_cast %623 : vector<1x16x128xf32> to vector<16x128xf32>
    %625 = vector.shape_cast %622 : vector<16x128xf32> to vector<1x16x128xf32>
    tpu.vector_store %arg7[%c0_683, %c0_684, %c0_685], %625 {strides = array<i32>} : memref<4x16x128xf32, #tpu.memory_space<vmem>>, vector<1x16x128xf32>,
    %c1_686 = arith.constant 1 : index
    %c0_687 = arith.constant 0 : index
    %c0_688 = arith.constant 0 : index
    %626 = vector.load %arg1[%c1_686, %c0_687, %c0_688] : memref<4x16x16xf32, #tpu.memory_space<vmem>>, vector<1x16x16xf32>
    %627 = vector.shape_cast %626 : vector<1x16x16xf32> to vector<16x16xf32>
    %cst_689 = arith.constant dense<0.000000e+00> : vector<16x8xf32>
    %628 = tpu.matmul %627, %586, %cst_689 {dimension_numbers = #tpu.dot_dimension_numbers<[1], [0], [0], [1], [0, 0, 1, 1], [], []>} : vector<16x16xf32>, vector<16x8xf32>, vector<16x8xf32> -> vector<16x8xf32>
    %c1_690 = arith.constant 1 : index
    %c0_691 = arith.constant 0 : index
    %c0_692 = arith.constant 0 : index
    %629 = vector.load %arg7[%c1_690, %c0_691, %c0_692] : memref<4x16x128xf32, #tpu.memory_space<vmem>>, vector<1x16x128xf32>
    %630 = vector.shape_cast %629 : vector<1x16x128xf32> to vector<16x128xf32>
    %cst_693 = arith.constant dense<0.000000e+00> : vector<16x128xf32>
    %631 = tpu.matmul %628, %615, %cst_693 {dimension_numbers = #tpu.dot_dimension_numbers<[1], [0], [0], [1], [0, 0, 1, 1], [], []>} : vector<16x8xf32>, vector<8x128xf32>, vector<16x128xf32> -> vector<16x128xf32>
    %632 = arith.addf %630, %631 : vector<16x128xf32>
    %c1_694 = arith.constant 1 : index
    %c0_695 = arith.constant 0 : index
    %c0_696 = arith.constant 0 : index
    %633 = vector.load %arg7[%c1_694, %c0_695, %c0_696] : memref<4x16x128xf32, #tpu.memory_space<vmem>>, vector<1x16x128xf32>
    %634 = vector.shape_cast %633 : vector<1x16x128xf32> to vector<16x128xf32>
    %635 = vector.shape_cast %632 : vector<16x128xf32> to vector<1x16x128xf32>
    tpu.vector_store %arg7[%c1_694, %c0_695, %c0_696], %635 {strides = array<i32>} : memref<4x16x128xf32, #tpu.memory_space<vmem>>, vector<1x16x128xf32>,
    %c2_697 = arith.constant 2 : index
    %c0_698 = arith.constant 0 : index
    %c0_699 = arith.constant 0 : index
    %636 = vector.load %arg1[%c2_697, %c0_698, %c0_699] : memref<4x16x16xf32, #tpu.memory_space<vmem>>, vector<1x16x16xf32>
    %637 = vector.shape_cast %636 : vector<1x16x16xf32> to vector<16x16xf32>
    %cst_700 = arith.constant dense<0.000000e+00> : vector<16x8xf32>
    %638 = tpu.matmul %637, %596, %cst_700 {dimension_numbers = #tpu.dot_dimension_numbers<[1], [0], [0], [1], [0, 0, 1, 1], [], []>} : vector<16x16xf32>, vector<16x8xf32>, vector<16x8xf32> -> vector<16x8xf32>
    %c2_701 = arith.constant 2 : index
    %c0_702 = arith.constant 0 : index
    %c0_703 = arith.constant 0 : index
    %639 = vector.load %arg7[%c2_701, %c0_702, %c0_703] : memref<4x16x128xf32, #tpu.memory_space<vmem>>, vector<1x16x128xf32>
    %640 = vector.shape_cast %639 : vector<1x16x128xf32> to vector<16x128xf32>
    %cst_704 = arith.constant dense<0.000000e+00> : vector<16x128xf32>
    %641 = tpu.matmul %638, %615, %cst_704 {dimension_numbers = #tpu.dot_dimension_numbers<[1], [0], [0], [1], [0, 0, 1, 1], [], []>} : vector<16x8xf32>, vector<8x128xf32>, vector<16x128xf32> -> vector<16x128xf32>
    %642 = arith.addf %640, %641 : vector<16x128xf32>
    %c2_705 = arith.constant 2 : index
    %c0_706 = arith.constant 0 : index
    %c0_707 = arith.constant 0 : index
    %643 = vector.load %arg7[%c2_705, %c0_706, %c0_707] : memref<4x16x128xf32, #tpu.memory_space<vmem>>, vector<1x16x128xf32>
    %644 = vector.shape_cast %643 : vector<1x16x128xf32> to vector<16x128xf32>
    %645 = vector.shape_cast %642 : vector<16x128xf32> to vector<1x16x128xf32>
    tpu.vector_store %arg7[%c2_705, %c0_706, %c0_707], %645 {strides = array<i32>} : memref<4x16x128xf32, #tpu.memory_space<vmem>>, vector<1x16x128xf32>,
    %c3_708 = arith.constant 3 : index
    %c0_709 = arith.constant 0 : index
    %c0_710 = arith.constant 0 : index
    %646 = vector.load %arg1[%c3_708, %c0_709, %c0_710] : memref<4x16x16xf32, #tpu.memory_space<vmem>>, vector<1x16x16xf32>
    %647 = vector.shape_cast %646 : vector<1x16x16xf32> to vector<16x16xf32>
    %cst_711 = arith.constant dense<0.000000e+00> : vector<16x8xf32>
    %648 = tpu.matmul %647, %606, %cst_711 {dimension_numbers = #tpu.dot_dimension_numbers<[1], [0], [0], [1], [0, 0, 1, 1], [], []>} : vector<16x16xf32>, vector<16x8xf32>, vector<16x8xf32> -> vector<16x8xf32>
    %c3_712 = arith.constant 3 : index
    %c0_713 = arith.constant 0 : index
    %c0_714 = arith.constant 0 : index
    %649 = vector.load %arg7[%c3_712, %c0_713, %c0_714] : memref<4x16x128xf32, #tpu.memory_space<vmem>>, vector<1x16x128xf32>
    %650 = vector.shape_cast %649 : vector<1x16x128xf32> to vector<16x128xf32>
    %cst_715 = arith.constant dense<0.000000e+00> : vector<16x128xf32>
    %651 = tpu.matmul %648, %615, %cst_715 {dimension_numbers = #tpu.dot_dimension_numbers<[1], [0], [0], [1], [0, 0, 1, 1], [], []>} : vector<16x8xf32>, vector<8x128xf32>, vector<16x128xf32> -> vector<16x128xf32>
    %652 = arith.addf %650, %651 : vector<16x128xf32>
    %c3_716 = arith.constant 3 : index
    %c0_717 = arith.constant 0 : index
    %c0_718 = arith.constant 0 : index
    %653 = vector.load %arg7[%c3_716, %c0_717, %c0_718] : memref<4x16x128xf32, #tpu.memory_space<vmem>>, vector<1x16x128xf32>
    %654 = vector.shape_cast %653 : vector<1x16x128xf32> to vector<16x128xf32>
    %655 = vector.shape_cast %652 : vector<16x128xf32> to vector<1x16x128xf32>
    tpu.vector_store %arg7[%c3_716, %c0_717, %c0_718], %655 {strides = array<i32>} : memref<4x16x128xf32, #tpu.memory_space<vmem>>, vector<1x16x128xf32>,
    %c0_719 = arith.constant 0 : index
    %c0_720 = arith.constant 0 : index
    %656 = vector.load %arg4[%c0_719, %c0_720] : memref<128x128xf32, #tpu.memory_space<vmem>>, vector<128x128xf32>
    %c0_721 = arith.constant 0 : index
    %c0_722 = arith.constant 0 : index
    %657 = vector.load %arg5[%c0_721, %c0_722] : memref<1x128xf32, #tpu.memory_space<vmem>>, vector<1x128xf32>
    %c0_723 = arith.constant 0 : index
    %c0_724 = arith.constant 0 : index
    %658 = vector.load %arg6[%c0_723, %c0_724] : memref<1x128xf32, #tpu.memory_space<vmem>>, vector<1x128xf32>
    %c0_725 = arith.constant 0 : index
    %c0_726 = arith.constant 0 : index
    %c0_727 = arith.constant 0 : index
    %659 = vector.load %arg7[%c0_725, %c0_726, %c0_727] : memref<4x16x128xf32, #tpu.memory_space<vmem>>, vector<1x16x128xf32>
    %660 = vector.shape_cast %659 : vector<1x16x128xf32> to vector<16x128xf32>
    %cst_728 = arith.constant dense<0.000000e+00> : vector<128xf32>
    %661 = vector.multi_reduction <add>, %660, %cst_728 [0] : vector<16x128xf32> to vector<128xf32>
    %662 = vector.shape_cast %661 : vector<128xf32> to vector<1x128xf32>
    %c0_729 = arith.constant 0 : index
    %c0_730 = arith.constant 0 : index
    %663 = vector.load %arg8[%c0_729, %c0_730] : memref<4x128xf32, #tpu.memory_space<vmem>>, vector<1x128xf32>
    tpu.vector_store %arg8[%c0_729, %c0_730], %662 {strides = array<i32>} : memref<4x128xf32, #tpu.memory_space<vmem>>, vector<1x128xf32>,
    %c1_731 = arith.constant 1 : index
    %c0_732 = arith.constant 0 : index
    %c0_733 = arith.constant 0 : index
    %664 = vector.load %arg7[%c1_731, %c0_732, %c0_733] : memref<4x16x128xf32, #tpu.memory_space<vmem>>, vector<1x16x128xf32>
    %665 = vector.shape_cast %664 : vector<1x16x128xf32> to vector<16x128xf32>
    %cst_734 = arith.constant dense<0.000000e+00> : vector<128xf32>
    %666 = vector.multi_reduction <add>, %665, %cst_734 [0] : vector<16x128xf32> to vector<128xf32>
    %667 = vector.shape_cast %666 : vector<128xf32> to vector<1x128xf32>
    %c1_735 = arith.constant 1 : index
    %c0_736 = arith.constant 0 : index
    %668 = vector.load %arg8[%c1_735, %c0_736] : memref<4x128xf32, #tpu.memory_space<vmem>>, vector<1x128xf32>
    tpu.vector_store %arg8[%c1_735, %c0_736], %667 {strides = array<i32>} : memref<4x128xf32, #tpu.memory_space<vmem>>, vector<1x128xf32>,
    %c2_737 = arith.constant 2 : index
    %c0_738 = arith.constant 0 : index
    %c0_739 = arith.constant 0 : index
    %669 = vector.load %arg7[%c2_737, %c0_738, %c0_739] : memref<4x16x128xf32, #tpu.memory_space<vmem>>, vector<1x16x128xf32>
    %670 = vector.shape_cast %669 : vector<1x16x128xf32> to vector<16x128xf32>
    %cst_740 = arith.constant dense<0.000000e+00> : vector<128xf32>
    %671 = vector.multi_reduction <add>, %670, %cst_740 [0] : vector<16x128xf32> to vector<128xf32>
    %672 = vector.shape_cast %671 : vector<128xf32> to vector<1x128xf32>
    %c2_741 = arith.constant 2 : index
    %c0_742 = arith.constant 0 : index
    %673 = vector.load %arg8[%c2_741, %c0_742] : memref<4x128xf32, #tpu.memory_space<vmem>>, vector<1x128xf32>
    tpu.vector_store %arg8[%c2_741, %c0_742], %672 {strides = array<i32>} : memref<4x128xf32, #tpu.memory_space<vmem>>, vector<1x128xf32>,
    %c3_743 = arith.constant 3 : index
    %c0_744 = arith.constant 0 : index
    %c0_745 = arith.constant 0 : index
    %674 = vector.load %arg7[%c3_743, %c0_744, %c0_745] : memref<4x16x128xf32, #tpu.memory_space<vmem>>, vector<1x16x128xf32>
    %675 = vector.shape_cast %674 : vector<1x16x128xf32> to vector<16x128xf32>
    %cst_746 = arith.constant dense<0.000000e+00> : vector<128xf32>
    %676 = vector.multi_reduction <add>, %675, %cst_746 [0] : vector<16x128xf32> to vector<128xf32>
    %677 = vector.shape_cast %676 : vector<128xf32> to vector<1x128xf32>
    %c3_747 = arith.constant 3 : index
    %c0_748 = arith.constant 0 : index
    %678 = vector.load %arg8[%c3_747, %c0_748] : memref<4x128xf32, #tpu.memory_space<vmem>>, vector<1x128xf32>
    tpu.vector_store %arg8[%c3_747, %c0_748], %677 {strides = array<i32>} : memref<4x128xf32, #tpu.memory_space<vmem>>, vector<1x128xf32>,
    %c0_749 = arith.constant 0 : index
    %c0_750 = arith.constant 0 : index
    %679 = vector.load %arg8[%c0_749, %c0_750] : memref<4x128xf32, #tpu.memory_space<vmem>>, vector<4x128xf32>
    %cst_751 = arith.constant dense<0.000000e+00> : vector<4x128xf32>
    %680 = tpu.matmul %679, %656, %cst_751 {dimension_numbers = #tpu.dot_dimension_numbers<[1], [0], [0], [1], [0, 0, 1, 1], [], []>} : vector<4x128xf32>, vector<128x128xf32>, vector<4x128xf32> -> vector<4x128xf32>
    %c0_752 = arith.constant 0 : index
    %c0_753 = arith.constant 0 : index
    %c0_754 = arith.constant 0 : index
    %681 = vector.load %arg7[%c0_752, %c0_753, %c0_754] : memref<4x16x128xf32, #tpu.memory_space<vmem>>, vector<1x16x128xf32>
    %682 = vector.shape_cast %681 : vector<1x16x128xf32> to vector<16x128xf32>
    %683 = vector.extract_strided_slice %680 {offsets = [0, 0], sizes = [1, 128], strides = [1, 1]} : vector<4x128xf32> to vector<1x128xf32>
    %684 = vector.broadcast %683 : vector<1x128xf32> to vector<16x128xf32>
    %685 = arith.subf %682, %684 : vector<16x128xf32>
    %686 = arith.mulf %685, %685 : vector<16x128xf32>
    %cst_755 = arith.constant dense<0.000000e+00> : vector<128xf32>
    %687 = vector.multi_reduction <add>, %686, %cst_755 [0] : vector<16x128xf32> to vector<128xf32>
    %688 = vector.shape_cast %687 : vector<128xf32> to vector<1x128xf32>
    %c0_756 = arith.constant 0 : index
    %c0_757 = arith.constant 0 : index
    %689 = vector.load %arg8[%c0_756, %c0_757] : memref<4x128xf32, #tpu.memory_space<vmem>>, vector<1x128xf32>
    tpu.vector_store %arg8[%c0_756, %c0_757], %688 {strides = array<i32>} : memref<4x128xf32, #tpu.memory_space<vmem>>, vector<1x128xf32>,
    %c1_758 = arith.constant 1 : index
    %c0_759 = arith.constant 0 : index
    %c0_760 = arith.constant 0 : index
    %690 = vector.load %arg7[%c1_758, %c0_759, %c0_760] : memref<4x16x128xf32, #tpu.memory_space<vmem>>, vector<1x16x128xf32>
    %691 = vector.shape_cast %690 : vector<1x16x128xf32> to vector<16x128xf32>
    %692 = vector.extract_strided_slice %680 {offsets = [1, 0], sizes = [1, 128], strides = [1, 1]} : vector<4x128xf32> to vector<1x128xf32>
    %693 = vector.broadcast %692 : vector<1x128xf32> to vector<16x128xf32>
    %694 = arith.subf %691, %693 : vector<16x128xf32>
    %695 = arith.mulf %694, %694 : vector<16x128xf32>
    %cst_761 = arith.constant dense<0.000000e+00> : vector<128xf32>
    %696 = vector.multi_reduction <add>, %695, %cst_761 [0] : vector<16x128xf32> to vector<128xf32>
    %697 = vector.shape_cast %696 : vector<128xf32> to vector<1x128xf32>
    %c1_762 = arith.constant 1 : index
    %c0_763 = arith.constant 0 : index
    %698 = vector.load %arg8[%c1_762, %c0_763] : memref<4x128xf32, #tpu.memory_space<vmem>>, vector<1x128xf32>
    tpu.vector_store %arg8[%c1_762, %c0_763], %697 {strides = array<i32>} : memref<4x128xf32, #tpu.memory_space<vmem>>, vector<1x128xf32>,
    %c2_764 = arith.constant 2 : index
    %c0_765 = arith.constant 0 : index
    %c0_766 = arith.constant 0 : index
    %699 = vector.load %arg7[%c2_764, %c0_765, %c0_766] : memref<4x16x128xf32, #tpu.memory_space<vmem>>, vector<1x16x128xf32>
    %700 = vector.shape_cast %699 : vector<1x16x128xf32> to vector<16x128xf32>
    %701 = vector.extract_strided_slice %680 {offsets = [2, 0], sizes = [1, 128], strides = [1, 1]} : vector<4x128xf32> to vector<1x128xf32>
    %702 = vector.broadcast %701 : vector<1x128xf32> to vector<16x128xf32>
    %703 = arith.subf %700, %702 : vector<16x128xf32>
    %704 = arith.mulf %703, %703 : vector<16x128xf32>
    %cst_767 = arith.constant dense<0.000000e+00> : vector<128xf32>
    %705 = vector.multi_reduction <add>, %704, %cst_767 [0] : vector<16x128xf32> to vector<128xf32>
    %706 = vector.shape_cast %705 : vector<128xf32> to vector<1x128xf32>
    %c2_768 = arith.constant 2 : index
    %c0_769 = arith.constant 0 : index
    %707 = vector.load %arg8[%c2_768, %c0_769] : memref<4x128xf32, #tpu.memory_space<vmem>>, vector<1x128xf32>
    tpu.vector_store %arg8[%c2_768, %c0_769], %706 {strides = array<i32>} : memref<4x128xf32, #tpu.memory_space<vmem>>, vector<1x128xf32>,
    %c3_770 = arith.constant 3 : index
    %c0_771 = arith.constant 0 : index
    %c0_772 = arith.constant 0 : index
    %708 = vector.load %arg7[%c3_770, %c0_771, %c0_772] : memref<4x16x128xf32, #tpu.memory_space<vmem>>, vector<1x16x128xf32>
    %709 = vector.shape_cast %708 : vector<1x16x128xf32> to vector<16x128xf32>
    %710 = vector.extract_strided_slice %680 {offsets = [3, 0], sizes = [1, 128], strides = [1, 1]} : vector<4x128xf32> to vector<1x128xf32>
    %711 = vector.broadcast %710 : vector<1x128xf32> to vector<16x128xf32>
    %712 = arith.subf %709, %711 : vector<16x128xf32>
    %713 = arith.mulf %712, %712 : vector<16x128xf32>
    %cst_773 = arith.constant dense<0.000000e+00> : vector<128xf32>
    %714 = vector.multi_reduction <add>, %713, %cst_773 [0] : vector<16x128xf32> to vector<128xf32>
    %715 = vector.shape_cast %714 : vector<128xf32> to vector<1x128xf32>
    %c3_774 = arith.constant 3 : index
    %c0_775 = arith.constant 0 : index
    %716 = vector.load %arg8[%c3_774, %c0_775] : memref<4x128xf32, #tpu.memory_space<vmem>>, vector<1x128xf32>
    tpu.vector_store %arg8[%c3_774, %c0_775], %715 {strides = array<i32>} : memref<4x128xf32, #tpu.memory_space<vmem>>, vector<1x128xf32>,
    %c0_776 = arith.constant 0 : index
    %c0_777 = arith.constant 0 : index
    %717 = vector.load %arg8[%c0_776, %c0_777] : memref<4x128xf32, #tpu.memory_space<vmem>>, vector<4x128xf32>
    %cst_778 = arith.constant dense<0.000000e+00> : vector<4x128xf32>
    %718 = tpu.matmul %717, %656, %cst_778 {dimension_numbers = #tpu.dot_dimension_numbers<[1], [0], [0], [1], [0, 0, 1, 1], [], []>} : vector<4x128xf32>, vector<128x128xf32>, vector<4x128xf32> -> vector<4x128xf32>
    %cst_779 = arith.constant 9.99999974E-6 : f32
    %719 = vector.broadcast %cst_779 : f32 to vector<4x128xf32>
    %720 = arith.addf %718, %719 : vector<4x128xf32>
    %721 = math.rsqrt %720 : vector<4x128xf32>
    %722 = vector.broadcast %657 : vector<1x128xf32> to vector<4x128xf32>
    %723 = arith.mulf %721, %722 : vector<4x128xf32>
    %c0_780 = arith.constant 0 : index
    %c0_781 = arith.constant 0 : index
    %c0_782 = arith.constant 0 : index
    %724 = vector.load %arg7[%c0_780, %c0_781, %c0_782] : memref<4x16x128xf32, #tpu.memory_space<vmem>>, vector<1x16x128xf32>
    %725 = vector.shape_cast %724 : vector<1x16x128xf32> to vector<16x128xf32>
    %726 = vector.extract_strided_slice %680 {offsets = [0, 0], sizes = [1, 128], strides = [1, 1]} : vector<4x128xf32> to vector<1x128xf32>
    %727 = vector.broadcast %726 : vector<1x128xf32> to vector<16x128xf32>
    %728 = arith.subf %725, %727 : vector<16x128xf32>
    %729 = vector.extract_strided_slice %723 {offsets = [0, 0], sizes = [1, 128], strides = [1, 1]} : vector<4x128xf32> to vector<1x128xf32>
    %730 = vector.broadcast %729 : vector<1x128xf32> to vector<16x128xf32>
    %731 = arith.mulf %728, %730 : vector<16x128xf32>
    %732 = vector.broadcast %658 : vector<1x128xf32> to vector<16x128xf32>
    %733 = arith.addf %731, %732 : vector<16x128xf32>
    %cst_783 = arith.constant 0.000000e+00 : f32
    %734 = vector.broadcast %cst_783 : f32 to vector<16x128xf32>
    %735 = arith.maximumf %733, %734 : vector<16x128xf32>
    %c0_784 = arith.constant 0 : index
    %c0_785 = arith.constant 0 : index
    %c0_786 = arith.constant 0 : index
    %736 = vector.load %arg7[%c0_784, %c0_785, %c0_786] : memref<4x16x128xf32, #tpu.memory_space<vmem>>, vector<1x16x128xf32>
    %737 = vector.shape_cast %736 : vector<1x16x128xf32> to vector<16x128xf32>
    %738 = vector.shape_cast %735 : vector<16x128xf32> to vector<1x16x128xf32>
    tpu.vector_store %arg7[%c0_784, %c0_785, %c0_786], %738 {strides = array<i32>} : memref<4x16x128xf32, #tpu.memory_space<vmem>>, vector<1x16x128xf32>,
    %c1_787 = arith.constant 1 : index
    %c0_788 = arith.constant 0 : index
    %c0_789 = arith.constant 0 : index
    %739 = vector.load %arg7[%c1_787, %c0_788, %c0_789] : memref<4x16x128xf32, #tpu.memory_space<vmem>>, vector<1x16x128xf32>
    %740 = vector.shape_cast %739 : vector<1x16x128xf32> to vector<16x128xf32>
    %741 = vector.extract_strided_slice %680 {offsets = [1, 0], sizes = [1, 128], strides = [1, 1]} : vector<4x128xf32> to vector<1x128xf32>
    %742 = vector.broadcast %741 : vector<1x128xf32> to vector<16x128xf32>
    %743 = arith.subf %740, %742 : vector<16x128xf32>
    %744 = vector.extract_strided_slice %723 {offsets = [1, 0], sizes = [1, 128], strides = [1, 1]} : vector<4x128xf32> to vector<1x128xf32>
    %745 = vector.broadcast %744 : vector<1x128xf32> to vector<16x128xf32>
    %746 = arith.mulf %743, %745 : vector<16x128xf32>
    %747 = vector.broadcast %658 : vector<1x128xf32> to vector<16x128xf32>
    %748 = arith.addf %746, %747 : vector<16x128xf32>
    %cst_790 = arith.constant 0.000000e+00 : f32
    %749 = vector.broadcast %cst_790 : f32 to vector<16x128xf32>
    %750 = arith.maximumf %748, %749 : vector<16x128xf32>
    %c1_791 = arith.constant 1 : index
    %c0_792 = arith.constant 0 : index
    %c0_793 = arith.constant 0 : index
    %751 = vector.load %arg7[%c1_791, %c0_792, %c0_793] : memref<4x16x128xf32, #tpu.memory_space<vmem>>, vector<1x16x128xf32>
    %752 = vector.shape_cast %751 : vector<1x16x128xf32> to vector<16x128xf32>
    %753 = vector.shape_cast %750 : vector<16x128xf32> to vector<1x16x128xf32>
    tpu.vector_store %arg7[%c1_791, %c0_792, %c0_793], %753 {strides = array<i32>} : memref<4x16x128xf32, #tpu.memory_space<vmem>>, vector<1x16x128xf32>,
    %c2_794 = arith.constant 2 : index
    %c0_795 = arith.constant 0 : index
    %c0_796 = arith.constant 0 : index
    %754 = vector.load %arg7[%c2_794, %c0_795, %c0_796] : memref<4x16x128xf32, #tpu.memory_space<vmem>>, vector<1x16x128xf32>
    %755 = vector.shape_cast %754 : vector<1x16x128xf32> to vector<16x128xf32>
    %756 = vector.extract_strided_slice %680 {offsets = [2, 0], sizes = [1, 128], strides = [1, 1]} : vector<4x128xf32> to vector<1x128xf32>
    %757 = vector.broadcast %756 : vector<1x128xf32> to vector<16x128xf32>
    %758 = arith.subf %755, %757 : vector<16x128xf32>
    %759 = vector.extract_strided_slice %723 {offsets = [2, 0], sizes = [1, 128], strides = [1, 1]} : vector<4x128xf32> to vector<1x128xf32>
    %760 = vector.broadcast %759 : vector<1x128xf32> to vector<16x128xf32>
    %761 = arith.mulf %758, %760 : vector<16x128xf32>
    %762 = vector.broadcast %658 : vector<1x128xf32> to vector<16x128xf32>
    %763 = arith.addf %761, %762 : vector<16x128xf32>
    %cst_797 = arith.constant 0.000000e+00 : f32
    %764 = vector.broadcast %cst_797 : f32 to vector<16x128xf32>
    %765 = arith.maximumf %763, %764 : vector<16x128xf32>
    %c2_798 = arith.constant 2 : index
    %c0_799 = arith.constant 0 : index
    %c0_800 = arith.constant 0 : index
    %766 = vector.load %arg7[%c2_798, %c0_799, %c0_800] : memref<4x16x128xf32, #tpu.memory_space<vmem>>, vector<1x16x128xf32>
    %767 = vector.shape_cast %766 : vector<1x16x128xf32> to vector<16x128xf32>
    %768 = vector.shape_cast %765 : vector<16x128xf32> to vector<1x16x128xf32>
    tpu.vector_store %arg7[%c2_798, %c0_799, %c0_800], %768 {strides = array<i32>} : memref<4x16x128xf32, #tpu.memory_space<vmem>>, vector<1x16x128xf32>,
    %c3_801 = arith.constant 3 : index
    %c0_802 = arith.constant 0 : index
    %c0_803 = arith.constant 0 : index
    %769 = vector.load %arg7[%c3_801, %c0_802, %c0_803] : memref<4x16x128xf32, #tpu.memory_space<vmem>>, vector<1x16x128xf32>
    %770 = vector.shape_cast %769 : vector<1x16x128xf32> to vector<16x128xf32>
    %771 = vector.extract_strided_slice %680 {offsets = [3, 0], sizes = [1, 128], strides = [1, 1]} : vector<4x128xf32> to vector<1x128xf32>
    %772 = vector.broadcast %771 : vector<1x128xf32> to vector<16x128xf32>
    %773 = arith.subf %770, %772 : vector<16x128xf32>
    %774 = vector.extract_strided_slice %723 {offsets = [3, 0], sizes = [1, 128], strides = [1, 1]} : vector<4x128xf32> to vector<1x128xf32>
    %775 = vector.broadcast %774 : vector<1x128xf32> to vector<16x128xf32>
    %776 = arith.mulf %773, %775 : vector<16x128xf32>
    %777 = vector.broadcast %658 : vector<1x128xf32> to vector<16x128xf32>
    %778 = arith.addf %776, %777 : vector<16x128xf32>
    %cst_804 = arith.constant 0.000000e+00 : f32
    %779 = vector.broadcast %cst_804 : f32 to vector<16x128xf32>
    %780 = arith.maximumf %778, %779 : vector<16x128xf32>
    %c3_805 = arith.constant 3 : index
    %c0_806 = arith.constant 0 : index
    %c0_807 = arith.constant 0 : index
    %781 = vector.load %arg7[%c3_805, %c0_806, %c0_807] : memref<4x16x128xf32, #tpu.memory_space<vmem>>, vector<1x16x128xf32>
    %782 = vector.shape_cast %781 : vector<1x16x128xf32> to vector<16x128xf32>
    %783 = vector.shape_cast %780 : vector<16x128xf32> to vector<1x16x128xf32>
    tpu.vector_store %arg7[%c3_805, %c0_806, %c0_807], %783 {strides = array<i32>} : memref<4x16x128xf32, #tpu.memory_space<vmem>>, vector<1x16x128xf32>,
    return
  }
  func.func @transform_0(%arg0: i32) -> (i32, i32, i32) {
    %c0_i32 = arith.constant 0 : i32
    %c0_i32_0 = arith.constant 0 : i32
    %c0_i32_1 = arith.constant 0 : i32
    return %arg0, %c0_i32, %c0_i32_0 : i32, i32, i32
  }
  func.func @transform_1(%arg0: i32) -> (i32, i32, i32) {
    %c0_i32 = arith.constant 0 : i32
    %c0_i32_0 = arith.constant 0 : i32
    %c0_i32_1 = arith.constant 0 : i32
    return %arg0, %c0_i32, %c0_i32_0 : i32, i32, i32
  }
  func.func @transform_2(%arg0: i32) -> (i32, i32, i32) {
    %c0_i32 = arith.constant 0 : i32
    %c0_i32_0 = arith.constant 0 : i32
    %c0_i32_1 = arith.constant 0 : i32
    %c0_i32_2 = arith.constant 0 : i32
    return %c0_i32, %c0_i32_0, %c0_i32_1 : i32, i32, i32
  }
  func.func @transform_3(%arg0: i32) -> (i32, i32) {
    %c0_i32 = arith.constant 0 : i32
    %c0_i32_0 = arith.constant 0 : i32
    %c0_i32_1 = arith.constant 0 : i32
    return %c0_i32, %c0_i32_0 : i32, i32
  }
  func.func @transform_4(%arg0: i32) -> (i32, i32) {
    %c0_i32 = arith.constant 0 : i32
    %c0_i32_0 = arith.constant 0 : i32
    %c0_i32_1 = arith.constant 0 : i32
    return %c0_i32, %c0_i32_0 : i32, i32
  }
  func.func @transform_5(%arg0: i32) -> (i32, i32) {
    %c0_i32 = arith.constant 0 : i32
    %c0_i32_0 = arith.constant 0 : i32
    %c0_i32_1 = arith.constant 0 : i32
    return %c0_i32, %c0_i32_0 : i32, i32
  }
  func.func @transform_6(%arg0: i32) -> (i32, i32, i32) {
    %c0_i32 = arith.constant 0 : i32
    %c0_i32_0 = arith.constant 0 : i32
    %c0_i32_1 = arith.constant 0 : i32
    return %arg0, %c0_i32, %c0_i32_0 : i32, i32, i32
  }
}

</mosaic_0001>

<bundles_post_ra>
// kernel: tpu_custom_call.1
= control target key start
LH: loop header
LB: loop body
LE: loop exit
PB: predicated region body
PF: predicated region fallthrough
CT: control target
= control target key end

     0   :  { %11 = vsyncpa [#allocation4], 0  ;;  %s14436_s0 = inlined_call_operand.vmem [shape: f32[8,16,16], index: 0, kind: input, shape index: {}]   ;;  %s14437_s1 = inlined_call_operand.vmem [shape: f32[8,16,8], index: 1, kind: input, shape index: {}]   ;;  %s14438_s2 = inlined_call_operand.hbm [shape: f32[16,8,128], index: 2, kind: input, shape index: {}]   ;;  %s14439_s3 = inlined_call_operand.hbm [shape: f32[128,128], index: 3, kind: input, shape index: {}]   ;;  %s14440_s4 = inlined_call_operand.vmem [shape: f32[1,128], index: 4, kind: input, shape index: {}]   ;;  %s14441_s5 = inlined_call_operand.vmem [shape: f32[1,128], index: 5, kind: input, shape index: {}]   ;;  %s14442_s6 = inlined_call_operand.hbm [shape: f32[8,16,128], index: 6, kind: output, shape index: {}]  }
   0x1   :  { %12 = vsyncpa [#allocation7], 0 }
   0x2   :  { %13 = vsyncpa [#allocation5], 0 }
   0x3   :  { %15 = vsyncpa [#allocation5 + $0x1], 0  ;;  %s13445_s21 = smov 0   ;;  %s13447_s22 = smov 0  }
   0x4   :  { %s13449_s23 = smov 0   ;;  %s13451_s24 = smov 0  }
   0x5 LB: > { %s13466_s25 = sadd.s32 4294967295, %s13399_s24   ;;  %s11354_s26 = sadd.s32 4294967294, %s13399_s24   ;;  %s13399_s24 = sphi %s13451_s24, %s14456_s24   ;;  %s13395_s23 = sphi %s13449_s23, %s14455_s23   ;;  %s13391_s22 = sphi %s13447_s22, %s14454_s22   ;;  %s13387_s21 = sphi %s13445_s21, %s14453_s21  }
   0x6   : > { %s13470_s27 = sadd.s32 1, %s13399_s24   ;;  %s164_s28 = sadd.s32 1, %s13395_s23 }
   0x7   : > { %s161_s29 = ssub.s32 %s13399_s24, %s13470_s27  ;;  %p174_p0 = scmp.ne.s32.totalorder %s13395_s23, %s13391_s22 }
   0x8   : > { %p162_p1 = scmp.eq.s32.totalorder %s161_s29, 0  ;;  %p175_p2 = scmp.eq.s32.totalorder %s13466_s25, 1 }
   0x9   : > { %p180_p3 = scmp.ne.s32.totalorder %s13391_s22, %s13387_s21  ;;  %p181_p4 = scmp.eq.s32.totalorder %s11354_s26, 1 }
   0xa   : > { %s13481_s30 = scalar_select %p162_p1, %s13395_s23, %s164_s28  }
   0xb   : > { %p13483_p5 = por %p175_p2, %p174_p0  ;;  %p13487_p6 = por %p181_p4, %p180_p3 }
   0xc   : > { %p11355_p7 = scmp.ge.s32.totalorder %s13399_s24, 1  ;;  %p188_p8 = scmp.lt.s32.totalorder %s13399_s24, 3 }
   0xd   : > { %s14445_s8 = scalar_select %p13487_p6, 1, 0 }
   0xe   : > { %p14443_p9 = scmp.eq.s32.totalorder %s13466_s25, 0  ;;  %p13494_p10 = pnand %p11355_p7, %p188_p8 }
   0xf   : > { %s13401_s10 = smov [#allocation3]   ;;  %s13402_s13 = smov [#allocation6]  }
  0x10   : > { %s200_s11 = sshll.u32 %s13401_s10, 4  ;;  %p13221_p11 = pneg %p13494_p10  ;;  %s201_s11 = int_to_ptr.vmem [resolvable:$true] %s200_s11 }
  0x11   : > { %s213_s14 = sshll.u32 %s13402_s13, 4  ;;  %s13290_s15 = scalar_lea.vmem %s201_s11, 2048  ;;  %s214_s14 = int_to_ptr.vmem [resolvable:$true] %s213_s14 }
  0x12   : > { %p13502_p12 = pnand %p14443_p9, %p13221_p11  ;;  %p13291_p0 = scmp.ne.s32.totalorder %s201_s11, %s13290_s15 }
  0x13   : > { %p13298_p3 = scmp.lt.s32.totalorder %s201_s11, %s201_s11  ;;  %p13299_p4 = scmp.lt.s32.totalorder %s13290_s15, %s13290_s15 }
  0x14   : > { %p13281_p13 = pneg %p13502_p12 }
  0x15   : > { %p13300_p7 = por %p13299_p4, %p13298_p3 }
  0x16   : > { %p13293_p1 = pnand %p13291_p0, %p13281_p13 }
  0x18   : > { %p13294_p2 = pneg %p13293_p1 }
  0x1a   : > { %p13301_p8 = pnand %p13300_p7, %p13294_p2 }
  0x1c   : > { %13304 = shalt.err (!%p13301_p8)
}
  0x1d   : > { %s13403_s16 = smov 128   ;;  %s13404_s17 = smov 8  }
  0x1e   : > { %13224 = dma.hbm_to_vmem [thread:$0]  (!%p13502_p12), %s14438_s2, 2048, %s201_s11, [#allocation4], %s13403_s16, %s13403_s16, %s13404_s17  }
  0x1f   : > { %s13316_s20 = scalar_lea.vmem %s214_s14, 2048  ;;  %p13324_p9 = scmp.lt.s32.totalorder %s214_s14, %s214_s14 }
  0x20   : > { %p13317_p11 = scmp.ne.s32.totalorder %s214_s14, %s13316_s20  ;;  %p13325_p6 = scmp.lt.s32.totalorder %s13316_s20, %s13316_s20 }
  0x22   : > { %p13319_p0 = pnand %p13317_p11, %p13281_p13  ;;  %p13326_p3 = por %p13325_p6, %p13324_p9 }
  0x24   : > { %p13320_p1 = pneg %p13319_p0 }
  0x26   : > { %p13327_p2 = pnand %p13326_p3, %p13320_p1 }
  0x28   : > { %13330 = shalt.err (!%p13327_p2)
}
  0x29   : > { %13227 = dma.hbm_to_vmem [thread:$0]  (!%p13502_p12), %s14439_s3, 2048, %s214_s14, [#allocation7], %s13403_s16, %s13403_s16, %s13404_s17  }
  0x2a   : > { %255 = sbr.rel (%p13494_p10) target bundleno = 3713 (0xe81), region = 44  ;;  %p14448_p4 = scmp.eq.s32.totalorder (!%p13494_p10), %s13466_s25, 0 }
  0x2f   : > { %13374 = dma.done.wait (%p14448_p4), [#allocation4], 2048   ;;  %p14449_p13 = pmov %p14448_p4 }
  0x30   : > { %p14450_p7 = pmov %p14448_p4 }
  0x31   : > { %13376 = vsyncadd (%p14449_p13), [#allocation4], 4294965248 }
  0x32   : > { %13378 = dma.done.wait (%p14450_p7), [#allocation7], 2048   ;;  %p14451_p6 = pmov %p14448_p4 }
  0x33   : > { %s11363_s29 = sshll.u32 %s13466_s25, 2  ;;  %vm323_vm0 = vcmask 64512   ;;  %v322_v0 = vld [vmem:[#allocation3] sm:$0xff]  ;;  %vm663_vm1 = vcmask 130048   ;;  %v660_v17 = vld [vmem:[#allocation3 + $0x8] sm:$0xff]  ;;  %v1346_v30 = vld [vmem:[#allocation3 + $0x10] sm:$0xff] }
  0x34   : > { %13380 = vsyncadd (%p14451_p6), [#allocation7], 4294965248  ;;  %p297_p9 = scmp.lt.s32.totalorder %s11363_s29, 7  ;;  %12401 = vmatprep.subr.mxu0 %v322_v0  ;;  %12406 = vmatprep.subr.mxu1 %v322_v0  ;;  %v13659_v39 = vld [vmem:[#allocation3 + $0x18] sm:$0xff]  ;;  %vm13406_vm2 = vmmov 0   ;;  %s293_s16 = sand.u32 1, %s13391_s22  }
  0x35   : > { %12402 = vmatpush3.msra.mxu0 %v322_v0  ;;  %12407 = vmatpush3.msra.mxu1 %v322_v0  ;;  %s11362_s19 = sshll.u32 %s293_s16, 6  ;;  %s11934_s28 = sshll.u32 %s13466_s25, 10 }
  0x36   : > { %s14458_s29 = smov (!%p297_p9, %s11363_s29), 7  ;;  %12411 = vmatprep.subr.mxu0 %v322_v0  ;;  %12416 = vmatprep.subr.mxu1 %v322_v0  ;;  %s14396_s25 = scalar_lea.sflag [#allocation5], %s293_s16 }
  0x37   : > { %s11931_s10 = sshll.u32 %s14458_s29, 4  ;;  %s295_s29 = scalar_lea.vmem [#allocation8], %s11362_s19 }
  0x38   : > { %s13538_s12 = scalar_lea.vmem %s14437_s1, %s11931_s10  ;;  %s13547_s15 = scalar_lea.vmem %s14436_s0, %s11931_s10 }
  0x39   : > { %v311_v1 = vld [vmem:[%s13538_s12] sm:$0xff]  ;;  %v312_v2 = vld [vmem:[%s13538_s12 + $0x8] sm:$0xff]  ;;  %v11369_v6 = vld [vmem:[%s13538_s12 + $0x10] sm:$0xff]  ;;  %s11258_s10 = sshll.u32 %s295_s29, 4  ;;  %s13407_s14 = smov [#allocation8]   ;;  %s14392_s10 = int_to_ptr.vmem [resolvable:$true] %s11258_s10 }
  0x3a   : > { %12403 = vmatprep.mubr.msk.f32.mxu0 %vm323_vm0, %v311_v1  ;;  %v11371_v3 = vld [vmem:[%s13538_s12 + $0x20] sm:$0xff]  ;;  %v11372_v4 = vld [vmem:[%s13538_s12 + $0x28] sm:$0xff]  ;;  %v11370_v7 = vld [vmem:[%s13538_s12 + $0x18] sm:$0xff]  ;;  %12408 = vmatprep.mubr.msk.f32.mxu1 %vm323_vm0, %v11369_v6  ;;  %s13331_s13 = scalar_lea.vmem %s14392_s10, 1024 }
  0x3b   : > { %12404 = vmatmul.mubr.msk.f32.vlgmr.msra.gmra.mxu0 %vm323_vm0, %v312_v2  ;;  %v13553_v5 = vld [vmem:[%s13547_s15] sm:$0xff]  ;;  %12409 = vmatmul.mubr.msk.f32.vlgmr.msra.gmra.mxu1 %vm323_vm0, %v11370_v7  ;;  %v13563_v8 = vld [vmem:[%s13547_s15 + $0x8] sm:$0xff]  ;;  %v13566_v9 = vld [vmem:[%s13547_s15 + $0x10] sm:$0xff]  ;;  %p13332_p10 = scmp.ne.s32.totalorder %s14392_s10, %s13331_s13 }
  0x3c   : > { %12412 = vmatpush3.msra.mxu0 %v322_v0  ;;  %12413 = vmatprep.mubr.msk.f32.mxu0 %vm323_vm0, %v11371_v3  ;;  %v11373_v10 = vld [vmem:[%s13538_s12 + $0x30] sm:$0xff]  ;;  %v13575_v11 = vld [vmem:[%s13547_s15 + $0x18] sm:$0xff]  ;;  %v13579_v13 = vld [vmem:[%s13547_s15 + $0x20] sm:$0xff] }
  0x3d   : > { %12421 = vmatprep.subr.mxu0 %v312_v2  ;;  %12417 = vmatpush3.msra.mxu1 %v322_v0  ;;  %v11374_v12 = vld [vmem:[%s13538_s12 + $0x38] sm:$0xff]  ;;  %v13587_v14 = vld [vmem:[%s13547_s15 + $0x28] sm:$0xff]  ;;  %v13590_v15 = vld [vmem:[%s13547_s15 + $0x30] sm:$0xff]  ;;  %s14390_s12 = scalar_lea.hbm %s14442_s6, %s11934_s28  ;;  %p13333_p12 = pnand %p13332_p10, %p13483_p5 }
  0x3e   : > { %12418 = vmatprep.mubr.msk.f32.mxu1 %vm323_vm0, %v11373_v10  ;;  %v13597_v16 = vld [vmem:[%s13547_s15 + $0x38] sm:$0xff]  ;;  %12428 = vmatprep.subr.mxu1 %v660_v17 }
  0x3f   : > { %12414 = vmatmul.mubr.msk.f32.vlgmr.msra.gmra.mxu0 %vm323_vm0, %v11372_v4  ;;  %12419 = vmatmul.mubr.msk.f32.vlgmr.msra.gmra.mxu1 %vm323_vm0, %v11374_v12  ;;  %p13334_p8 = pneg %p13333_p12 }
  0x40   : > { %12422 = vmatpush3.msra.mxu0 %v312_v2  ;;  %12425 = vmatprep.mubr.msk.f32.mxu0 %vm663_vm1, %v13553_v5 }
  0x41   : > { %12423 = vmatprep.subr.mxu0 %v311_v1  ;;  %12429 = vmatpush3.msra.mxu1 %v660_v17 }
  0x42   : > { %12424 = vmatpush3.msra.mxu0 %v311_v1  ;;  %12440 = vmatprep.subr.mxu1 %v660_v17 }
  0x43   : > { %12426 = vmatmul.mubr.msk.f32.vlgmr.msra.gmra.mxu0 %vm663_vm1, %v13563_v8  ;;  %12433 = vmatprep.subr.mxu0 %v11370_v7 }
  0x44   : > { %12434 = vmatpush3.msra.mxu0 %v11370_v7  ;;  %12437 = vmatprep.mubr.msk.f32.mxu0 %vm663_vm1, %v13566_v9 }
  0x45   : > { %12435 = vmatprep.subr.mxu0 %v11369_v6 }
  0x46   : > { %12436 = vmatpush3.msra.mxu0 %v11369_v6 }
  0x47   : > { %12438 = vmatmul.mubr.msk.f32.vlgmr.msra.gmra.mxu0 %vm663_vm1, %v13575_v11  ;;  %12445 = vmatprep.subr.mxu0 %v11372_v4 }
  0x48   : > { %12446 = vmatpush3.msra.mxu0 %v11372_v4  ;;  %12449 = vmatprep.mubr.msk.f32.mxu0 %vm663_vm1, %v13579_v13 }
  0x49   : > { %12447 = vmatprep.subr.mxu0 %v11371_v3 }
  0x4a   : > { %12448 = vmatpush3.msra.mxu0 %v11371_v3 }
  0x4b   : > { %12450 = vmatmul.mubr.msk.f32.vlgmr.msra.gmra.mxu0 %vm663_vm1, %v13587_v14  ;;  %12457 = vmatprep.subr.mxu0 %v11374_v12 }
  0x4c   : > { %12458 = vmatpush3.msra.mxu0 %v11374_v12  ;;  %12461 = vmatprep.mubr.msk.f32.mxu0 %vm663_vm1, %v13590_v15 }
  0x4d   : > { %12459 = vmatprep.subr.mxu0 %v11373_v10 }
  0x4e   : > { %12460 = vmatpush3.msra.mxu0 %v11373_v10 }
  0x4f   : > { %12462 = vmatmul.mubr.msk.f32.vlgmr.msra.gmra.mxu0 %vm663_vm1, %v13597_v16 }
  0x50   : > { %12473 = vmatprep.mubr.msk.f32.mxu0 %vm663_vm1, %v13553_v5 }
  0xfb   : > { %v13603_v18 = vpop.f32.mrf.mxu0  ;;  %v12410_v40 = vpop.f32.mrf.mxu1 }
  0xfd   : > { %v13605_v19 = vpop.f32.mrf.mxu0  ;;  %v13664_v41 = vpop.f32.mrf.mxu1 }
  0xff   : > { %v13607_v20 = vpop.f32.mrf.mxu0  ;;  %v12420_v42 = vpop.f32.mrf.mxu1 }
 0x101   : > { %v13609_v21 = vpop.f32.mrf.mxu0  ;;  %v13666_v43 = vpop.f32.mrf.mxu1 }
 0x103   : > { %v12427_v22 = vpop.f32.mrf.mxu0 }
 0x104   : > { %12469 = vmatprep.subr.mxu0 %v12427_v22 }
 0x105   : > { %v736_v23 = vpop.f32.mrf.mxu0  ;;  %12470 = vmatpush3.msra.mxu0 %v12427_v22 }
 0x106   : > { %12430 = vmatprep.mubr.msk.f32.mxu1 %vm323_vm0, %v736_v23  ;;  %12471 = vmatprep.subr.mxu0 %v736_v23 }
 0x107   : > { %12431 = vmatmul.mubr.msk.f32.vlgmr.msra.gmra.mxu1 %vm323_vm0, %v12427_v22  ;;  %v12439_v24 = vpop.f32.mrf.mxu0  ;;  %12472 = vmatpush3.msra.mxu0 %v736_v23 }
 0x108   : > { %12474 = vmatmul.mubr.msk.f32.vlgmr.msra.gmra.mxu0 %vm663_vm1, %v13563_v8  ;;  %12481 = vmatprep.subr.mxu0 %v12439_v24 }
 0x109   : > { %v907_v25 = vpop.f32.mrf.mxu0  ;;  %12482 = vmatpush3.msra.mxu0 %v12439_v24  ;;  %12441 = vmatpush3.msra.mxu1 %v660_v17 }
 0x10a   : > { %12442 = vmatprep.mubr.msk.f32.mxu1 %vm323_vm0, %v907_v25  ;;  %12483 = vmatprep.subr.mxu0 %v907_v25 }
 0x10b   : > { %12443 = vmatmul.mubr.msk.f32.vlgmr.msra.gmra.mxu1 %vm323_vm0, %v12439_v24  ;;  %v12451_v26 = vpop.f32.mrf.mxu0  ;;  %12484 = vmatpush3.msra.mxu0 %v907_v25 }
 0x10c   : > { %12485 = vmatprep.mubr.msk.f32.mxu0 %vm663_vm1, %v13566_v9  ;;  %12493 = vmatprep.subr.mxu0 %v12451_v26 }
 0x10d   : > { %12486 = vmatmul.mubr.msk.f32.vlgmr.msra.gmra.mxu0 %vm663_vm1, %v13575_v11  ;;  %v1078_v27 = vpop.f32.mrf.mxu0  ;;  %12452 = vmatprep.subr.mxu1 %v660_v17 }
 0x10e   : > { %12494 = vmatpush3.msra.mxu0 %v12451_v26  ;;  %12453 = vmatpush3.msra.mxu1 %v660_v17 }
 0x10f   : > { %12454 = vmatprep.mubr.msk.f32.mxu1 %vm323_vm0, %v1078_v27  ;;  %12495 = vmatprep.subr.mxu0 %v1078_v27  ;;  %v12463_v28 = vpop.f32.mrf.mxu0 }
 0x110   : > { %12455 = vmatmul.mubr.msk.f32.vlgmr.msra.gmra.mxu1 %vm323_vm0, %v12451_v26  ;;  %12496 = vmatpush3.msra.mxu0 %v1078_v27 }
 0x111   : > { %12497 = vmatprep.mubr.msk.f32.mxu0 %vm663_vm1, %v13579_v13  ;;  %12505 = vmatprep.subr.mxu0 %v12463_v28  ;;  %v1249_v29 = vpop.f32.mrf.mxu0 }
 0x112   : > { %12498 = vmatmul.mubr.msk.f32.vlgmr.msra.gmra.mxu0 %vm663_vm1, %v13587_v14  ;;  %12464 = vmatprep.subr.mxu1 %v660_v17 }
 0x113   : > { %12506 = vmatpush3.msra.mxu0 %v12463_v28  ;;  %12465 = vmatpush3.msra.mxu1 %v660_v17 }
 0x114   : > { %12466 = vmatprep.mubr.msk.f32.mxu1 %vm323_vm0, %v1249_v29  ;;  %12507 = vmatprep.subr.mxu0 %v1249_v29 }
 0x115   : > { %12467 = vmatmul.mubr.msk.f32.vlgmr.msra.gmra.mxu1 %vm323_vm0, %v12463_v28  ;;  %12508 = vmatpush3.msra.mxu0 %v1249_v29 }
 0x116   : > { %12509 = vmatprep.mubr.msk.f32.mxu0 %vm663_vm1, %v13590_v15  ;;  %12476 = vmatprep.subr.mxu1 %v1346_v30 }
 0x117   : > { %12510 = vmatmul.mubr.msk.f32.vlgmr.msra.gmra.mxu0 %vm663_vm1, %v13597_v16  ;;  %12477 = vmatpush3.msra.mxu1 %v1346_v30 }
 0x118   : > { %12521 = vmatprep.mubr.msk.f32.mxu0 %vm663_vm1, %v13553_v5  ;;  %12488 = vmatprep.subr.mxu1 %v1346_v30 }
 0x1c7   : > { %v12432_v44 = vpop.f32.mrf.mxu1 }
 0x1c8   : > { %v12475_v31 = vpop.f32.mrf.mxu0  ;;  %v829_v52 = vadd.f32 %v12432_v44, %v13603_v18 }
 0x1c9   : > { %12517 = vmatprep.subr.mxu0 %v12475_v31  ;;  %v13668_v45 = vpop.f32.mrf.mxu1 }
 0x1ca   : > { %v1421_v32 = vpop.f32.mrf.mxu0  ;;  %12518 = vmatpush3.msra.mxu0 %v12475_v31 }
 0x1cb   : > { %12478 = vmatprep.mubr.msk.f32.mxu1 %vm323_vm0, %v1421_v32  ;;  %12519 = vmatprep.subr.mxu0 %v1421_v32  ;;  %v12444_v46 = vpop.f32.mrf.mxu1 }
 0x1cc   : > { %12479 = vmatmul.mubr.msk.f32.vlgmr.msra.gmra.mxu1 %vm323_vm0, %v12475_v31  ;;  %12520 = vmatpush3.msra.mxu0 %v1421_v32  ;;  %v1000_v58 = vadd.f32 %v12444_v46, %v12410_v40 }
 0x1cd   : > { %v12487_v33 = vpop.f32.mrf.mxu0  ;;  %12522 = vmatmul.mubr.msk.f32.vlgmr.msra.gmra.mxu0 %vm663_vm1, %v13563_v8  ;;  %12489 = vmatpush3.msra.mxu1 %v1346_v30  ;;  %v13670_v47 = vpop.f32.mrf.mxu1 }
 0x1ce   : > { %12529 = vmatprep.subr.mxu0 %v12487_v33  ;;  %12533 = vmatprep.mubr.msk.f32.mxu0 %vm663_vm1, %v13566_v9  ;;  %v999_v28 = vadd.f32 %v13670_v47, %v13664_v41 }
 0x1cf   : > { %v1591_v34 = vpop.f32.mrf.mxu0  ;;  %12530 = vmatpush3.msra.mxu0 %v12487_v33  ;;  %12500 = vmatprep.subr.mxu1 %v1346_v30 }
 0x1d0   : > { %12490 = vmatprep.mubr.msk.f32.mxu1 %vm323_vm0, %v1591_v34  ;;  %12531 = vmatprep.subr.mxu0 %v1591_v34  ;;  %v12456_v48 = vpop.f32.mrf.mxu1 }
 0x1d1   : > { %12491 = vmatmul.mubr.msk.f32.vlgmr.msra.gmra.mxu1 %vm323_vm0, %v12487_v33  ;;  %12532 = vmatpush3.msra.mxu0 %v1591_v34  ;;  %v1171_v0 = vadd.f32 %v12456_v48, %v13607_v20  ;;  %v2710_v20 = vld [vmem:[#allocation3 + $0x20] sm:$0xff] }
 0x1d2   : > { %v12499_v35 = vpop.f32.mrf.mxu0  ;;  %12534 = vmatmul.mubr.msk.f32.vlgmr.msra.gmra.mxu0 %vm663_vm1, %v13575_v11  ;;  %12501 = vmatpush3.msra.mxu1 %v1346_v30  ;;  %v13672_v49 = vpop.f32.mrf.mxu1 }
 0x1d3   : > { %12541 = vmatprep.subr.mxu0 %v12499_v35  ;;  %12545 = vmatprep.mubr.msk.f32.mxu0 %vm663_vm1, %v13579_v13 }
 0x1d4   : > { %v1761_v36 = vpop.f32.mrf.mxu0  ;;  %12542 = vmatpush3.msra.mxu0 %v12499_v35  ;;  %12512 = vmatprep.subr.mxu1 %v1346_v30 }
 0x1d5   : > { %12502 = vmatprep.mubr.msk.f32.mxu1 %vm323_vm0, %v1761_v36  ;;  %12543 = vmatprep.subr.mxu0 %v1761_v36  ;;  %v12468_v50 = vpop.f32.mrf.mxu1 }
 0x1d6   : > { %12503 = vmatmul.mubr.msk.f32.vlgmr.msra.gmra.mxu1 %vm323_vm0, %v12499_v35  ;;  %12544 = vmatpush3.msra.mxu0 %v1761_v36  ;;  %v1342_v7 = vadd.f32 %v12468_v50, %v12420_v42  ;;  %v1170_v36 = vadd.f32 %v13672_v49, %v13609_v21  ;;  %v3392_v49 = vld [vmem:[#allocation3 + $0x28] sm:$0xff]  ;;  %v828_v50 = vadd.f32 %v13668_v45, %v13605_v19 }
 0x1d7   : > { %v12511_v37 = vpop.f32.mrf.mxu0  ;;  %12546 = vmatmul.mubr.msk.f32.vlgmr.msra.gmra.mxu0 %vm663_vm1, %v13587_v14  ;;  %12513 = vmatpush3.msra.mxu1 %v1346_v30  ;;  %v13674_v51 = vpop.f32.mrf.mxu1 }
 0x1d8   : > { %12553 = vmatprep.subr.mxu0 %v12511_v37  ;;  %12557 = vmatprep.mubr.msk.f32.mxu0 %vm663_vm1, %v13590_v15 }
 0x1d9   : > { %v1931_v38 = vpop.f32.mrf.mxu0  ;;  %12554 = vmatpush3.msra.mxu0 %v12511_v37  ;;  %12524 = vmatprep.subr.mxu1 %v13659_v39 }
 0x1da   : > { %12514 = vmatprep.mubr.msk.f32.mxu1 %vm323_vm0, %v1931_v38  ;;  %12555 = vmatprep.subr.mxu0 %v1931_v38 }
 0x1db   : > { %12515 = vmatmul.mubr.msk.f32.vlgmr.msra.gmra.mxu1 %vm323_vm0, %v12511_v37  ;;  %12556 = vmatpush3.msra.mxu0 %v1931_v38 }
 0x1dc   : > { %12558 = vmatmul.mubr.msk.f32.vlgmr.msra.gmra.mxu0 %vm663_vm1, %v13597_v16  ;;  %12525 = vmatpush3.msra.mxu1 %v13659_v39 }
 0x1dd   : > { %12569 = vmatprep.mubr.msk.f32.mxu0 %vm663_vm1, %v13553_v5  ;;  %12536 = vmatprep.subr.mxu1 %v13659_v39 }
 0x28c   : > { %v12480_v53 = vpop.f32.mrf.mxu1 }
 0x28d   : > { %v13677_v54 = vadd.f32 %v12480_v53, %v829_v52  ;;  %v12523_v55 = vpop.f32.mrf.mxu0 }
 0x28e   : > { %v13679_v56 = vpop.f32.mrf.mxu1  ;;  %12565 = vmatprep.subr.mxu0 %v12523_v55 }
 0x28f   : > { %v2103_v57 = vpop.f32.mrf.mxu0  ;;  %12566 = vmatpush3.msra.mxu0 %v12523_v55  ;;  %v1513_v53 = vadd.f32 %v13679_v56, %v828_v50 }
 0x290   : > { %12526 = vmatprep.mubr.msk.f32.mxu1 %vm323_vm0, %v2103_v57  ;;  %12567 = vmatprep.subr.mxu0 %v2103_v57 }
 0x291   : > { %v12492_v59 = vpop.f32.mrf.mxu1  ;;  %12527 = vmatmul.mubr.msk.f32.vlgmr.msra.gmra.mxu1 %vm323_vm0, %v12523_v55  ;;  %12568 = vmatpush3.msra.mxu0 %v2103_v57 }
 0x292   : > { %v13683_v60 = vadd.f32 %v12492_v59, %v1000_v58  ;;  %v12535_v61 = vpop.f32.mrf.mxu0  ;;  %12570 = vmatmul.mubr.msk.f32.vlgmr.msra.gmra.mxu0 %vm663_vm1, %v13563_v8  ;;  %12537 = vmatpush3.msra.mxu1 %v13659_v39 }
 0x293   : > { %v1674_v62 = vpop.f32.mrf.mxu1  ;;  %12577 = vmatprep.subr.mxu0 %v12535_v61  ;;  %12581 = vmatprep.mubr.msk.f32.mxu0 %vm663_vm1, %v13566_v9 }
 0x294   : > { %v2273_v63 = vpop.f32.mrf.mxu0  ;;  %12578 = vmatpush3.msra.mxu0 %v12535_v61  ;;  %12548 = vmatprep.subr.mxu1 %v13659_v39  ;;  %v1683_v30 = vadd.f32 %v1674_v62, %v999_v28 }
 0x295   : > { %12538 = vmatprep.mubr.msk.f32.mxu1 %vm323_vm0, %v2273_v63  ;;  %12579 = vmatprep.subr.mxu0 %v2273_v63 }
 0x296   : > { %v12504_v1 = vpop.f32.mrf.mxu1  ;;  %12539 = vmatmul.mubr.msk.f32.vlgmr.msra.gmra.mxu1 %vm323_vm0, %v12535_v61  ;;  %12580 = vmatpush3.msra.mxu0 %v2273_v63 }
 0x297   : > { %v13694_v2 = vadd.f32 %v12504_v1, %v1171_v0  ;;  %v12547_v3 = vpop.f32.mrf.mxu0  ;;  %12582 = vmatmul.mubr.msk.f32.vlgmr.msra.gmra.mxu0 %vm663_vm1, %v13575_v11  ;;  %12549 = vmatpush3.msra.mxu1 %v13659_v39 }
 0x298   : > { %v1844_v4 = vpop.f32.mrf.mxu1  ;;  %12589 = vmatprep.subr.mxu0 %v12547_v3  ;;  %12593 = vmatprep.mubr.msk.f32.mxu0 %vm663_vm1, %v13579_v13 }
 0x299   : > { %v2443_v6 = vpop.f32.mrf.mxu0  ;;  %12590 = vmatpush3.msra.mxu0 %v12547_v3  ;;  %12560 = vmatprep.subr.mxu1 %v13659_v39  ;;  %v1853_v38 = vadd.f32 %v1844_v4, %v1170_v36  ;;  %v13851_v36 = vld [vmem:[%s13547_s15 + $0x28] sm:$0xff] }
 0x29a   : > { %12550 = vmatprep.mubr.msk.f32.mxu1 %vm323_vm0, %v2443_v6  ;;  %12591 = vmatprep.subr.mxu0 %v2443_v6 }
 0x29b   : > { %v12516_v10 = vpop.f32.mrf.mxu1  ;;  %12551 = vmatmul.mubr.msk.f32.vlgmr.msra.gmra.mxu1 %vm323_vm0, %v12547_v3  ;;  %12592 = vmatpush3.msra.mxu0 %v2443_v6 }
 0x29c   : > { %v13704_v12 = vadd.f32 %v12516_v10, %v1342_v7  ;;  %v12559_v17 = vpop.f32.mrf.mxu0  ;;  %12594 = vmatmul.mubr.msk.f32.vlgmr.msra.gmra.mxu0 %vm663_vm1, %v13587_v14  ;;  %12561 = vmatpush3.msra.mxu1 %v13659_v39 }
 0x29d   : > { %12601 = vmatprep.subr.mxu0 %v12559_v17  ;;  %12605 = vmatprep.mubr.msk.f32.mxu0 %vm663_vm1, %v13590_v15  ;;  %v13717_v22 = vpop.f32.mrf.mxu1 }
 0x29e   : > { %v2613_v18 = vpop.f32.mrf.mxu0  ;;  %12602 = vmatpush3.msra.mxu0 %v12559_v17  ;;  %12572 = vmatprep.subr.mxu1 %v2710_v20 }
 0x29f   : > { %12562 = vmatprep.mubr.msk.f32.mxu1 %vm323_vm0, %v2613_v18  ;;  %12603 = vmatprep.subr.mxu0 %v2613_v18 }
 0x2a0   : > { %12563 = vmatmul.mubr.msk.f32.vlgmr.msra.gmra.mxu1 %vm323_vm0, %v12559_v17  ;;  %12604 = vmatpush3.msra.mxu0 %v2613_v18 }
 0x2a1   : > { %12606 = vmatmul.mubr.msk.f32.vlgmr.msra.gmra.mxu0 %vm663_vm1, %v13597_v16  ;;  %12573 = vmatpush3.msra.mxu1 %v2710_v20 }
 0x2a2   : > { %12617 = vmatprep.mubr.msk.f32.mxu0 %vm663_vm1, %v13553_v5  ;;  %12584 = vmatprep.subr.mxu1 %v2710_v20 }
 0x351   : > { %v12528_v23 = vpop.f32.mrf.mxu1 }
 0x352   : > { %v13720_v24 = vadd.f32 %v12528_v23, %v13677_v54  ;;  %v12571_v25 = vpop.f32.mrf.mxu0 }
 0x353   : > { %v13722_v26 = vpop.f32.mrf.mxu1  ;;  %12613 = vmatprep.subr.mxu0 %v12571_v25 }
 0x354   : > { %v2785_v27 = vpop.f32.mrf.mxu0  ;;  %12614 = vmatpush3.msra.mxu0 %v12571_v25  ;;  %v2195_v55 = vadd.f32 %v13722_v26, %v1513_v53 }
 0x355   : > { %12574 = vmatprep.mubr.msk.f32.mxu1 %vm323_vm0, %v2785_v27  ;;  %12615 = vmatprep.subr.mxu0 %v2785_v27 }
 0x356   : > { %v12540_v29 = vpop.f32.mrf.mxu1  ;;  %12575 = vmatmul.mubr.msk.f32.vlgmr.msra.gmra.mxu1 %vm323_vm0, %v12571_v25  ;;  %12616 = vmatpush3.msra.mxu0 %v2785_v27 }
 0x357   : > { %v13729_v31 = vadd.f32 %v12540_v29, %v13683_v60  ;;  %v12583_v32 = vpop.f32.mrf.mxu0  ;;  %12618 = vmatmul.mubr.msk.f32.vlgmr.msra.gmra.mxu0 %vm663_vm1, %v13563_v8  ;;  %12585 = vmatpush3.msra.mxu1 %v2710_v20 }
 0x358   : > { %v2356_v33 = vpop.f32.mrf.mxu1  ;;  %12625 = vmatprep.subr.mxu0 %v12583_v32  ;;  %12629 = vmatprep.mubr.msk.f32.mxu0 %vm663_vm1, %v13566_v9 }
 0x359   : > { %v13735_v34 = vadd.f32 %v2356_v33, %v1683_v30  ;;  %v2955_v35 = vpop.f32.mrf.mxu0  ;;  %12626 = vmatpush3.msra.mxu0 %v12583_v32  ;;  %12596 = vmatprep.subr.mxu1 %v2710_v20 }
 0x35a   : > { %12586 = vmatprep.mubr.msk.f32.mxu1 %vm323_vm0, %v2955_v35  ;;  %12627 = vmatprep.subr.mxu0 %v2955_v35 }
 0x35b   : > { %v12552_v37 = vpop.f32.mrf.mxu1  ;;  %12587 = vmatmul.mubr.msk.f32.vlgmr.msra.gmra.mxu1 %vm323_vm0, %v12583_v32  ;;  %12628 = vmatpush3.msra.mxu0 %v2955_v35 }
 0x35c   : > { %v13742_v39 = vadd.f32 %v12552_v37, %v13694_v2  ;;  %v12595_v40 = vpop.f32.mrf.mxu0  ;;  %12630 = vmatmul.mubr.msk.f32.vlgmr.msra.gmra.mxu0 %vm663_vm1, %v13575_v11  ;;  %12597 = vmatpush3.msra.mxu1 %v2710_v20  ;;  %v13855_v37 = vld [vmem:[%s13547_s15 + $0x30] sm:$0xff] }
 0x35d   : > { %v2526_v41 = vpop.f32.mrf.mxu1  ;;  %12637 = vmatprep.subr.mxu0 %v12595_v40  ;;  %12641 = vmatprep.mubr.msk.f32.mxu0 %vm663_vm1, %v13579_v13 }
 0x35e   : > { %v13748_v21 = vadd.f32 %v2526_v41, %v1853_v38  ;;  %v3125_v42 = vpop.f32.mrf.mxu0  ;;  %12638 = vmatpush3.msra.mxu0 %v12595_v40  ;;  %12608 = vmatprep.subr.mxu1 %v2710_v20  ;;  %v13866_v41 = vld [vmem:[%s13547_s15 + $0x38] sm:$0xff] }
 0x35f   : > { %12598 = vmatprep.mubr.msk.f32.mxu1 %vm323_vm0, %v3125_v42  ;;  %12639 = vmatprep.subr.mxu0 %v3125_v42 }
 0x360   : > { %v12564_v44 = vpop.f32.mrf.mxu1  ;;  %12599 = vmatmul.mubr.msk.f32.vlgmr.msra.gmra.mxu1 %vm323_vm0, %v12595_v40  ;;  %12640 = vmatpush3.msra.mxu0 %v3125_v42  ;;  %v13873_v42 = vld [vmem:[%s13547_s15] sm:$0xff] }
 0x361   : > { %v13753_v46 = vadd.f32 %v12564_v44, %v13704_v12  ;;  %v12607_v47 = vpop.f32.mrf.mxu0  ;;  %12642 = vmatmul.mubr.msk.f32.vlgmr.msra.gmra.mxu0 %vm663_vm1, %v13587_v14  ;;  %12609 = vmatpush3.msra.mxu1 %v2710_v20 }
 0x362   : > { %12649 = vmatprep.subr.mxu0 %v12607_v47  ;;  %12653 = vmatprep.mubr.msk.f32.mxu0 %vm663_vm1, %v13590_v15  ;;  %v13767_v52 = vpop.f32.mrf.mxu1 }
 0x363   : > { %v3295_v48 = vpop.f32.mrf.mxu0  ;;  %12650 = vmatpush3.msra.mxu0 %v12607_v47  ;;  %12620 = vmatprep.subr.mxu1 %v3392_v49 }
 0x364   : > { %12610 = vmatprep.mubr.msk.f32.mxu1 %vm323_vm0, %v3295_v48  ;;  %12651 = vmatprep.subr.mxu0 %v3295_v48 }
 0x365   : > { %12611 = vmatmul.mubr.msk.f32.vlgmr.msra.gmra.mxu1 %vm323_vm0, %v12607_v47  ;;  %12652 = vmatpush3.msra.mxu0 %v3295_v48 }
 0x366   : > { %12654 = vmatmul.mubr.msk.f32.vlgmr.msra.gmra.mxu0 %vm663_vm1, %v13597_v16  ;;  %12621 = vmatpush3.msra.mxu1 %v3392_v49 }
 0x367   : > { %12665 = vmatprep.mubr.msk.f32.mxu0 %vm663_vm1, %v13553_v5  ;;  %12632 = vmatprep.subr.mxu1 %v3392_v49 }
 0x416   : > { %v12576_v54 = vpop.f32.mrf.mxu1 }
 0x417   : > { %v13772_v57 = vadd.f32 %v12576_v54, %v13720_v24  ;;  %v12619_v58 = vpop.f32.mrf.mxu0  ;;  %v13886_v54 = vld [vmem:[%s13547_s15 + $0x8] sm:$0xff] }
 0x418   : > { %v2868_v59 = vpop.f32.mrf.mxu1  ;;  %12661 = vmatprep.subr.mxu0 %v12619_v58 }
 0x419   : > { %v13774_v60 = vadd.f32 %v2868_v59, %v2195_v55  ;;  %v3467_v61 = vpop.f32.mrf.mxu0  ;;  %12662 = vmatpush3.msra.mxu0 %v12619_v58  ;;  %v13890_v55 = vld [vmem:[%s13547_s15 + $0x10] sm:$0xff] }
 0x41a   : > { %12622 = vmatprep.mubr.msk.f32.mxu1 %vm323_vm0, %v3467_v61  ;;  %12663 = vmatprep.subr.mxu0 %v3467_v61 }
 0x41b   : > { %v12588_v19 = vpop.f32.mrf.mxu1  ;;  %12623 = vmatmul.mubr.msk.f32.vlgmr.msra.gmra.mxu1 %vm323_vm0, %v12619_v58  ;;  %12664 = vmatpush3.msra.mxu0 %v3467_v61 }
 0x41c   : > { %v13779_v45 = vadd.f32 %v12588_v19, %v13729_v31  ;;  %v12631_v56 = vpop.f32.mrf.mxu0  ;;  %12666 = vmatmul.mubr.msk.f32.vlgmr.msra.gmra.mxu0 %vm663_vm1, %v13563_v8  ;;  %12633 = vmatpush3.msra.mxu1 %v3392_v49  ;;  %v13837_v31 = vld [vmem:[%s13547_s15 + $0x20] sm:$0xff] }
 0x41d   : > { %v3038_v62 = vpop.f32.mrf.mxu1  ;;  %12673 = vmatprep.subr.mxu0 %v12631_v56  ;;  %12677 = vmatprep.mubr.msk.f32.mxu0 %vm663_vm1, %v13566_v9 }
 0x41e   : > { %v13786_v63 = vadd.f32 %v3038_v62, %v13735_v34  ;;  %v3637_v0 = vpop.f32.mrf.mxu0  ;;  %12674 = vmatpush3.msra.mxu0 %v12631_v56  ;;  %12644 = vmatprep.subr.mxu1 %v3392_v49 }
 0x41f   : > { %12634 = vmatprep.mubr.msk.f32.mxu1 %vm323_vm0, %v3637_v0  ;;  %12675 = vmatprep.subr.mxu0 %v3637_v0 }
 0x420   : > { %v12600_v1 = vpop.f32.mrf.mxu1  ;;  %12635 = vmatmul.mubr.msk.f32.vlgmr.msra.gmra.mxu1 %vm323_vm0, %v12631_v56  ;;  %12676 = vmatpush3.msra.mxu0 %v3637_v0 }
 0x421   : > { %v13791_v2 = vadd.f32 %v12600_v1, %v13742_v39  ;;  %v12643_v3 = vpop.f32.mrf.mxu0  ;;  %12678 = vmatmul.mubr.msk.f32.vlgmr.msra.gmra.mxu0 %vm663_vm1, %v13575_v11  ;;  %12645 = vmatpush3.msra.mxu1 %v3392_v49 }
 0x422   : > { %v3208_v4 = vpop.f32.mrf.mxu1  ;;  %12685 = vmatprep.subr.mxu0 %v12643_v3  ;;  %12689 = vmatprep.mubr.msk.f32.mxu0 %vm663_vm1, %v13579_v13 }
 0x423   : > { %v13798_v6 = vadd.f32 %v3208_v4, %v13748_v21  ;;  %v3807_v7 = vpop.f32.mrf.mxu0  ;;  %12686 = vmatpush3.msra.mxu0 %v12643_v3  ;;  %12656 = vmatprep.subr.mxu1 %v3392_v49  ;;  %v4756_v21 = vld [vmem:[#allocation3 + $0x38] sm:$0xff] }
 0x424   : > { %12646 = vmatprep.mubr.msk.f32.mxu1 %vm323_vm0, %v3807_v7  ;;  %12687 = vmatprep.subr.mxu0 %v3807_v7 }
 0x425   : > { %v12612_v10 = vpop.f32.mrf.mxu1  ;;  %12647 = vmatmul.mubr.msk.f32.vlgmr.msra.gmra.mxu1 %vm323_vm0, %v12643_v3  ;;  %12688 = vmatpush3.msra.mxu0 %v3807_v7 }
 0x426   : > { %v13803_v12 = vadd.f32 %v12612_v10, %v13753_v46  ;;  %v12655_v17 = vpop.f32.mrf.mxu0  ;;  %12690 = vmatmul.mubr.msk.f32.vlgmr.msra.gmra.mxu0 %vm663_vm1, %v13587_v14  ;;  %12657 = vmatpush3.msra.mxu1 %v3392_v49  ;;  %v4074_v14 = vld [vmem:[#allocation3 + $0x30] sm:$0xff]  ;;  %v5438_v10 = vld [vmem:[#allocation3 + $0x40] sm:$0xff] }
 0x427   : > { %12697 = vmatprep.subr.mxu0 %v12655_v17  ;;  %12701 = vmatprep.mubr.msk.f32.mxu0 %vm663_vm1, %v13590_v15  ;;  %v13815_v18 = vpop.f32.mrf.mxu1 }
 0x428   : > { %v3977_v13 = vpop.f32.mrf.mxu0  ;;  %12698 = vmatpush3.msra.mxu0 %v12655_v17  ;;  %12668 = vmatprep.subr.mxu1 %v4074_v14 }
 0x429   : > { %12658 = vmatprep.mubr.msk.f32.mxu1 %vm323_vm0, %v3977_v13  ;;  %12699 = vmatprep.subr.mxu0 %v3977_v13 }
 0x42a   : > { %12659 = vmatmul.mubr.msk.f32.vlgmr.msra.gmra.mxu1 %vm323_vm0, %v12655_v17  ;;  %12700 = vmatpush3.msra.mxu0 %v3977_v13 }
 0x42b   : > { %12702 = vmatmul.mubr.msk.f32.vlgmr.msra.gmra.mxu0 %vm663_vm1, %v13597_v16  ;;  %12669 = vmatpush3.msra.mxu1 %v4074_v14 }
 0x42c   : > { %12713 = vmatprep.mubr.msk.f32.mxu0 %vm663_vm1, %v13553_v5  ;;  %12680 = vmatprep.subr.mxu1 %v4074_v14 }
 0x4db   : > { %v12624_v15 = vpop.f32.mrf.mxu1 }
 0x4dc   : > { %v13818_v20 = vadd.f32 %v12624_v15, %v13772_v57  ;;  %v12667_v23 = vpop.f32.mrf.mxu0 }
 0x4dd   : > { %v3550_v24 = vpop.f32.mrf.mxu1  ;;  %12709 = vmatprep.subr.mxu0 %v12667_v23 }
 0x4de   : > { %v13821_v25 = vadd.f32 %v3550_v24, %v13774_v60  ;;  %v4149_v16 = vpop.f32.mrf.mxu0  ;;  %12710 = vmatpush3.msra.mxu0 %v12667_v23 }
 0x4df   : > { %12670 = vmatprep.mubr.msk.f32.mxu1 %vm323_vm0, %v4149_v16  ;;  %12711 = vmatprep.subr.mxu0 %v4149_v16 }
 0x4e0   : > { %v12636_v5 = vpop.f32.mrf.mxu1  ;;  %12671 = vmatmul.mubr.msk.f32.vlgmr.msra.gmra.mxu1 %vm323_vm0, %v12667_v23  ;;  %12712 = vmatpush3.msra.mxu0 %v4149_v16 }
 0x4e1   : > { %v13826_v26 = vadd.f32 %v12636_v5, %v13779_v45  ;;  %v12679_v27 = vpop.f32.mrf.mxu0  ;;  %12714 = vmatmul.mubr.msk.f32.vlgmr.msra.gmra.mxu0 %vm663_vm1, %v13563_v8  ;;  %12681 = vmatpush3.msra.mxu1 %v4074_v14  ;;  %v13904_v45 = vld [vmem:[%s13547_s15 + $0x18] sm:$0xff] }
 0x4e2   : > { %v3720_v28 = vpop.f32.mrf.mxu1  ;;  %12721 = vmatprep.subr.mxu0 %v12679_v27  ;;  %12725 = vmatprep.mubr.msk.f32.mxu0 %vm663_vm1, %v13566_v9 }
 0x4e3   : > { %v13833_v29 = vadd.f32 %v3720_v28, %v13786_v63  ;;  %v4319_v30 = vpop.f32.mrf.mxu0  ;;  %12722 = vmatpush3.msra.mxu0 %v12679_v27  ;;  %12692 = vmatprep.subr.mxu1 %v4074_v14 }
 0x4e4   : > { %12682 = vmatprep.mubr.msk.f32.mxu1 %vm323_vm0, %v4319_v30  ;;  %12723 = vmatprep.subr.mxu0 %v4319_v30 }
 0x4e5   : > { %v12648_v32 = vpop.f32.mrf.mxu1  ;;  %12683 = vmatmul.mubr.msk.f32.vlgmr.msra.gmra.mxu1 %vm323_vm0, %v12679_v27  ;;  %12724 = vmatpush3.msra.mxu0 %v4319_v30 }
 0x4e6   : > { %v13841_v8 = vadd.f32 %v12648_v32, %v13791_v2  ;;  %v12691_v9 = vpop.f32.mrf.mxu0  ;;  %12726 = vmatmul.mubr.msk.f32.vlgmr.msra.gmra.mxu0 %vm663_vm1, %v13575_v11  ;;  %12693 = vmatpush3.msra.mxu1 %v4074_v14 }
 0x4e7   : > { %v3890_v33 = vpop.f32.mrf.mxu1  ;;  %12733 = vmatprep.subr.mxu0 %v12691_v9  ;;  %12737 = vmatprep.mubr.msk.f32.mxu0 %vm663_vm1, %v13837_v31 }
 0x4e8   : > { %v13848_v34 = vadd.f32 %v3890_v33, %v13798_v6  ;;  %v4489_v35 = vpop.f32.mrf.mxu0  ;;  %12734 = vmatpush3.msra.mxu0 %v12691_v9  ;;  %12704 = vmatprep.subr.mxu1 %v4074_v14 }
 0x4e9   : > { %12694 = vmatprep.mubr.msk.f32.mxu1 %vm323_vm0, %v4489_v35  ;;  %12735 = vmatprep.subr.mxu0 %v4489_v35 }
 0x4ea   : > { %v12660_v11 = vpop.f32.mrf.mxu1  ;;  %12695 = vmatmul.mubr.msk.f32.vlgmr.msra.gmra.mxu1 %vm323_vm0, %v12691_v9  ;;  %12736 = vmatpush3.msra.mxu0 %v4489_v35 }
 0x4eb   : > { %v13859_v38 = vadd.f32 %v12660_v11, %v13803_v12  ;;  %v12703_v39 = vpop.f32.mrf.mxu0  ;;  %12738 = vmatmul.mubr.msk.f32.vlgmr.msra.gmra.mxu0 %vm663_vm1, %v13851_v36  ;;  %12705 = vmatpush3.msra.mxu1 %v4074_v14 }
 0x4ec   : > { %12745 = vmatprep.subr.mxu0 %v12703_v39  ;;  %12749 = vmatprep.mubr.msk.f32.mxu0 %vm663_vm1, %v13855_v37  ;;  %v13877_v44 = vpop.f32.mrf.mxu1 }
 0x4ed   : > { %v4659_v40 = vpop.f32.mrf.mxu0  ;;  %12746 = vmatpush3.msra.mxu0 %v12703_v39  ;;  %12716 = vmatprep.subr.mxu1 %v4756_v21 }
 0x4ee   : > { %12706 = vmatprep.mubr.msk.f32.mxu1 %vm323_vm0, %v4659_v40  ;;  %12747 = vmatprep.subr.mxu0 %v4659_v40 }
 0x4ef   : > { %12707 = vmatmul.mubr.msk.f32.vlgmr.msra.gmra.mxu1 %vm323_vm0, %v12703_v39  ;;  %12748 = vmatpush3.msra.mxu0 %v4659_v40 }
 0x4f0   : > { %12750 = vmatmul.mubr.msk.f32.vlgmr.msra.gmra.mxu0 %vm663_vm1, %v13866_v41  ;;  %12717 = vmatpush3.msra.mxu1 %v4756_v21 }
 0x4f1   : > { %12728 = vmatprep.subr.mxu1 %v4756_v21  ;;  %12761 = vmatprep.mubr.msk.f32.mxu0 %vm663_vm1, %v13873_v42 }
 0x5a0   : > { %v12672_v46 = vpop.f32.mrf.mxu1 }
 0x5a1   : > { %v13880_v47 = vadd.f32 %v12672_v46, %v13818_v20  ;;  %v12715_v48 = vpop.f32.mrf.mxu0 }
 0x5a2   : > { %v4232_v49 = vpop.f32.mrf.mxu1  ;;  %12757 = vmatprep.subr.mxu0 %v12715_v48 }
 0x5a3   : > { %v13883_v50 = vadd.f32 %v4232_v49, %v13821_v25  ;;  %v4831_v53 = vpop.f32.mrf.mxu0  ;;  %12758 = vmatpush3.msra.mxu0 %v12715_v48 }
 0x5a4   : > { %12718 = vmatprep.mubr.msk.f32.mxu1 %vm323_vm0, %v4831_v53  ;;  %12759 = vmatprep.subr.mxu0 %v4831_v53 }
 0x5a5   : > { %v12684_v57 = vpop.f32.mrf.mxu1  ;;  %12719 = vmatmul.mubr.msk.f32.vlgmr.msra.gmra.mxu1 %vm323_vm0, %v12715_v48  ;;  %12760 = vmatpush3.msra.mxu0 %v4831_v53 }
 0x5a6   : > { %v13894_v58 = vadd.f32 %v12684_v57, %v13826_v26  ;;  %v12727_v59 = vpop.f32.mrf.mxu0  ;;  %12762 = vmatmul.mubr.msk.f32.vlgmr.msra.gmra.mxu0 %vm663_vm1, %v13886_v54  ;;  %12729 = vmatpush3.msra.mxu1 %v4756_v21 }
 0x5a7   : > { %v4402_v60 = vpop.f32.mrf.mxu1  ;;  %12769 = vmatprep.subr.mxu0 %v12727_v59  ;;  %12773 = vmatprep.mubr.msk.f32.mxu0 %vm663_vm1, %v13890_v55 }
 0x5a8   : > { %v13901_v61 = vadd.f32 %v4402_v60, %v13833_v29  ;;  %v5001_v19 = vpop.f32.mrf.mxu0  ;;  %12770 = vmatpush3.msra.mxu0 %v12727_v59  ;;  %12740 = vmatprep.subr.mxu1 %v4756_v21 }
 0x5a9   : > { %12730 = vmatprep.mubr.msk.f32.mxu1 %vm323_vm0, %v5001_v19  ;;  %12771 = vmatprep.subr.mxu0 %v5001_v19 }
 0x5aa   : > { %v12696_v56 = vpop.f32.mrf.mxu1  ;;  %12731 = vmatmul.mubr.msk.f32.vlgmr.msra.gmra.mxu1 %vm323_vm0, %v12727_v59  ;;  %12772 = vmatpush3.msra.mxu0 %v5001_v19 }
 0x5ab   : > { %v13909_v62 = vadd.f32 %v12696_v56, %v13841_v8  ;;  %v12739_v63 = vpop.f32.mrf.mxu0  ;;  %12774 = vmatmul.mubr.msk.f32.vlgmr.msra.gmra.mxu0 %vm663_vm1, %v13904_v45  ;;  %12741 = vmatpush3.msra.mxu1 %v4756_v21 }
 0x5ac   : > { %v4572_v0 = vpop.f32.mrf.mxu1  ;;  %12781 = vmatprep.subr.mxu0 %v12739_v63  ;;  %12785 = vmatprep.mubr.msk.f32.mxu0 %vm663_vm1, %v13837_v31 }
 0x5ad   : > { %v13916_v1 = vadd.f32 %v4572_v0, %v13848_v34  ;;  %v5171_v2 = vpop.f32.mrf.mxu0  ;;  %12782 = vmatpush3.msra.mxu0 %v12739_v63  ;;  %12752 = vmatprep.subr.mxu1 %v4756_v21 }
 0x5ae   : > { %12742 = vmatprep.mubr.msk.f32.mxu1 %vm323_vm0, %v5171_v2  ;;  %12783 = vmatprep.subr.mxu0 %v5171_v2 }
 0x5af   : > { %v12708_v3 = vpop.f32.mrf.mxu1  ;;  %12743 = vmatmul.mubr.msk.f32.vlgmr.msra.gmra.mxu1 %vm323_vm0, %v12739_v63  ;;  %12784 = vmatpush3.msra.mxu0 %v5171_v2 }
 0x5b0   : > { %v13921_v4 = vadd.f32 %v12708_v3, %v13859_v38  ;;  %v12751_v6 = vpop.f32.mrf.mxu0  ;;  %12786 = vmatmul.mubr.msk.f32.vlgmr.msra.gmra.mxu0 %vm663_vm1, %v13851_v36  ;;  %12753 = vmatpush3.msra.mxu1 %v4756_v21  ;;  %v6120_v38 = vld [vmem:[#allocation3 + $0x48] sm:$0xff] }
 0x5b1   : > { %12793 = vmatprep.subr.mxu0 %v12751_v6  ;;  %12797 = vmatprep.mubr.msk.f32.mxu0 %vm663_vm1, %v13855_v37  ;;  %v13933_v12 = vpop.f32.mrf.mxu1 }
 0x5b2   : > { %v5341_v7 = vpop.f32.mrf.mxu0  ;;  %12794 = vmatpush3.msra.mxu0 %v12751_v6  ;;  %12764 = vmatprep.subr.mxu1 %v5438_v10 }
 0x5b3   : > { %12754 = vmatprep.mubr.msk.f32.mxu1 %vm323_vm0, %v5341_v7  ;;  %12795 = vmatprep.subr.mxu0 %v5341_v7 }
 0x5b4   : > { %12755 = vmatmul.mubr.msk.f32.vlgmr.msra.gmra.mxu1 %vm323_vm0, %v12751_v6  ;;  %12796 = vmatpush3.msra.mxu0 %v5341_v7  ;;  %v6802_v6 = vld [vmem:[#allocation3 + $0x50] sm:$0xff] }
 0x5b5   : > { %12798 = vmatmul.mubr.msk.f32.vlgmr.msra.gmra.mxu0 %vm663_vm1, %v13866_v41  ;;  %12765 = vmatpush3.msra.mxu1 %v5438_v10 }
 0x5b6   : > { %12809 = vmatprep.mubr.msk.f32.mxu0 %vm663_vm1, %v13873_v42  ;;  %12776 = vmatprep.subr.mxu1 %v5438_v10 }
 0x665   : > { %v12720_v17 = vpop.f32.mrf.mxu1 }
 0x666   : > { %v13936_v13 = vadd.f32 %v12720_v17, %v13880_v47  ;;  %v12763_v14 = vpop.f32.mrf.mxu0 }
 0x667   : > { %v4914_v15 = vpop.f32.mrf.mxu1  ;;  %12805 = vmatprep.subr.mxu0 %v12763_v14 }
 0x668   : > { %v13939_v20 = vadd.f32 %v4914_v15, %v13883_v50  ;;  %v5513_v23 = vpop.f32.mrf.mxu0  ;;  %12806 = vmatpush3.msra.mxu0 %v12763_v14 }
 0x669   : > { %12766 = vmatprep.mubr.msk.f32.mxu1 %vm323_vm0, %v5513_v23  ;;  %12807 = vmatprep.subr.mxu0 %v5513_v23 }
 0x66a   : > { %v12732_v24 = vpop.f32.mrf.mxu1  ;;  %12767 = vmatmul.mubr.msk.f32.vlgmr.msra.gmra.mxu1 %vm323_vm0, %v12763_v14  ;;  %12808 = vmatpush3.msra.mxu0 %v5513_v23 }
 0x66b   : > { %v13944_v25 = vadd.f32 %v12732_v24, %v13894_v58  ;;  %v12775_v16 = vpop.f32.mrf.mxu0  ;;  %12810 = vmatmul.mubr.msk.f32.vlgmr.msra.gmra.mxu0 %vm663_vm1, %v13886_v54  ;;  %12777 = vmatpush3.msra.mxu1 %v5438_v10 }
 0x66c   : > { %v5084_v5 = vpop.f32.mrf.mxu1  ;;  %12817 = vmatprep.subr.mxu0 %v12775_v16  ;;  %12821 = vmatprep.mubr.msk.f32.mxu0 %vm663_vm1, %v13890_v55 }
 0x66d   : > { %v13951_v26 = vadd.f32 %v5084_v5, %v13901_v61  ;;  %v5683_v27 = vpop.f32.mrf.mxu0  ;;  %12818 = vmatpush3.msra.mxu0 %v12775_v16  ;;  %12788 = vmatprep.subr.mxu1 %v5438_v10 }
 0x66e   : > { %12778 = vmatprep.mubr.msk.f32.mxu1 %vm323_vm0, %v5683_v27  ;;  %12819 = vmatprep.subr.mxu0 %v5683_v27 }
 0x66f   : > { %v12744_v28 = vpop.f32.mrf.mxu1  ;;  %12779 = vmatmul.mubr.msk.f32.vlgmr.msra.gmra.mxu1 %vm323_vm0, %v12775_v16  ;;  %12820 = vmatpush3.msra.mxu0 %v5683_v27 }
 0x670   : > { %v13956_v29 = vadd.f32 %v12744_v28, %v13909_v62  ;;  %v12787_v30 = vpop.f32.mrf.mxu0  ;;  %12822 = vmatmul.mubr.msk.f32.vlgmr.msra.gmra.mxu0 %vm663_vm1, %v13904_v45  ;;  %12789 = vmatpush3.msra.mxu1 %v5438_v10 }
 0x671   : > { %v5254_v32 = vpop.f32.mrf.mxu1  ;;  %12829 = vmatprep.subr.mxu0 %v12787_v30  ;;  %12833 = vmatprep.mubr.msk.f32.mxu0 %vm663_vm1, %v13837_v31 }
 0x672   : > { %v13963_v8 = vadd.f32 %v5254_v32, %v13916_v1  ;;  %v5853_v9 = vpop.f32.mrf.mxu0  ;;  %12830 = vmatpush3.msra.mxu0 %v12787_v30  ;;  %12800 = vmatprep.subr.mxu1 %v5438_v10 }
 0x673   : > { %12790 = vmatprep.mubr.msk.f32.mxu1 %vm323_vm0, %v5853_v9  ;;  %12831 = vmatprep.subr.mxu0 %v5853_v9 }
 0x674   : > { %v12756_v33 = vpop.f32.mrf.mxu1  ;;  %12791 = vmatmul.mubr.msk.f32.vlgmr.msra.gmra.mxu1 %vm323_vm0, %v12787_v30  ;;  %12832 = vmatpush3.msra.mxu0 %v5853_v9 }
 0x675   : > { %v13968_v34 = vadd.f32 %v12756_v33, %v13921_v4  ;;  %v12799_v35 = vpop.f32.mrf.mxu0  ;;  %12834 = vmatmul.mubr.msk.f32.vlgmr.msra.gmra.mxu0 %vm663_vm1, %v13851_v36  ;;  %12801 = vmatpush3.msra.mxu1 %v5438_v10 }
 0x676   : > { %12841 = vmatprep.subr.mxu0 %v12799_v35  ;;  %12845 = vmatprep.mubr.msk.f32.mxu0 %vm663_vm1, %v13855_v37  ;;  %v13980_v39 = vpop.f32.mrf.mxu1 }
 0x677   : > { %v6023_v11 = vpop.f32.mrf.mxu0  ;;  %12842 = vmatpush3.msra.mxu0 %v12799_v35  ;;  %12812 = vmatprep.subr.mxu1 %v6120_v38 }
 0x678   : > { %12802 = vmatprep.mubr.msk.f32.mxu1 %vm323_vm0, %v6023_v11  ;;  %12843 = vmatprep.subr.mxu0 %v6023_v11 }
 0x679   : > { %12803 = vmatmul.mubr.msk.f32.vlgmr.msra.gmra.mxu1 %vm323_vm0, %v12799_v35  ;;  %12844 = vmatpush3.msra.mxu0 %v6023_v11  ;;  %v7484_v11 = vld [vmem:[#allocation3 + $0x58] sm:$0xff] }
 0x67a   : > { %12846 = vmatmul.mubr.msk.f32.vlgmr.msra.gmra.mxu0 %vm663_vm1, %v13866_v41  ;;  %12813 = vmatpush3.msra.mxu1 %v6120_v38 }
 0x67b   : > { %12857 = vmatprep.mubr.msk.f32.mxu0 %vm663_vm1, %v13873_v42  ;;  %12824 = vmatprep.subr.mxu1 %v6120_v38 }
 0x72a   : > { %v12768_v40 = vpop.f32.mrf.mxu1 }
 0x72b   : > { %v13983_v21 = vadd.f32 %v12768_v40, %v13936_v13  ;;  %v12811_v46 = vpop.f32.mrf.mxu0 }
 0x72c   : > { %v5596_v47 = vpop.f32.mrf.mxu1  ;;  %12853 = vmatprep.subr.mxu0 %v12811_v46 }
 0x72d   : > { %v13986_v48 = vadd.f32 %v5596_v47, %v13939_v20  ;;  %v6195_v49 = vpop.f32.mrf.mxu0  ;;  %12854 = vmatpush3.msra.mxu0 %v12811_v46 }
 0x72e   : > { %12814 = vmatprep.mubr.msk.f32.mxu1 %vm323_vm0, %v6195_v49  ;;  %12855 = vmatprep.subr.mxu0 %v6195_v49 }
 0x72f   : > { %v12780_v50 = vpop.f32.mrf.mxu1  ;;  %12815 = vmatmul.mubr.msk.f32.vlgmr.msra.gmra.mxu1 %vm323_vm0, %v12811_v46  ;;  %12856 = vmatpush3.msra.mxu0 %v6195_v49 }
 0x730   : > { %v13991_v53 = vadd.f32 %v12780_v50, %v13944_v25  ;;  %v12823_v57 = vpop.f32.mrf.mxu0  ;;  %12858 = vmatmul.mubr.msk.f32.vlgmr.msra.gmra.mxu0 %vm663_vm1, %v13886_v54  ;;  %12825 = vmatpush3.msra.mxu1 %v6120_v38 }
 0x731   : > { %v5766_v58 = vpop.f32.mrf.mxu1  ;;  %12865 = vmatprep.subr.mxu0 %v12823_v57  ;;  %12869 = vmatprep.mubr.msk.f32.mxu0 %vm663_vm1, %v13890_v55 }
 0x732   : > { %v13998_v59 = vadd.f32 %v5766_v58, %v13951_v26  ;;  %v6365_v60 = vpop.f32.mrf.mxu0  ;;  %12866 = vmatpush3.msra.mxu0 %v12823_v57  ;;  %12836 = vmatprep.subr.mxu1 %v6120_v38 }
 0x733   : > { %12826 = vmatprep.mubr.msk.f32.mxu1 %vm323_vm0, %v6365_v60  ;;  %12867 = vmatprep.subr.mxu0 %v6365_v60 }
 0x734   : > { %v12792_v61 = vpop.f32.mrf.mxu1  ;;  %12827 = vmatmul.mubr.msk.f32.vlgmr.msra.gmra.mxu1 %vm323_vm0, %v12823_v57  ;;  %12868 = vmatpush3.msra.mxu0 %v6365_v60 }
 0x735   : > { %v14003_v19 = vadd.f32 %v12792_v61, %v13956_v29  ;;  %v12835_v56 = vpop.f32.mrf.mxu0  ;;  %12870 = vmatmul.mubr.msk.f32.vlgmr.msra.gmra.mxu0 %vm663_vm1, %v13904_v45  ;;  %12837 = vmatpush3.msra.mxu1 %v6120_v38 }
 0x736   : > { %v5936_v62 = vpop.f32.mrf.mxu1  ;;  %12877 = vmatprep.subr.mxu0 %v12835_v56  ;;  %12881 = vmatprep.mubr.msk.f32.mxu0 %vm663_vm1, %v13837_v31 }
 0x737   : > { %v14010_v63 = vadd.f32 %v5936_v62, %v13963_v8  ;;  %v6535_v0 = vpop.f32.mrf.mxu0  ;;  %12878 = vmatpush3.msra.mxu0 %v12835_v56  ;;  %12848 = vmatprep.subr.mxu1 %v6120_v38 }
 0x738   : > { %12838 = vmatprep.mubr.msk.f32.mxu1 %vm323_vm0, %v6535_v0  ;;  %12879 = vmatprep.subr.mxu0 %v6535_v0 }
 0x739   : > { %v12804_v1 = vpop.f32.mrf.mxu1  ;;  %12839 = vmatmul.mubr.msk.f32.vlgmr.msra.gmra.mxu1 %vm323_vm0, %v12835_v56  ;;  %12880 = vmatpush3.msra.mxu0 %v6535_v0 }
 0x73a   : > { %v14015_v2 = vadd.f32 %v12804_v1, %v13968_v34  ;;  %v12847_v3 = vpop.f32.mrf.mxu0  ;;  %12882 = vmatmul.mubr.msk.f32.vlgmr.msra.gmra.mxu0 %vm663_vm1, %v13851_v36  ;;  %12849 = vmatpush3.msra.mxu1 %v6120_v38 }
 0x73b   : > { %12889 = vmatprep.subr.mxu0 %v12847_v3  ;;  %12893 = vmatprep.mubr.msk.f32.mxu0 %vm663_vm1, %v13855_v37  ;;  %v14027_v7 = vpop.f32.mrf.mxu1 }
 0x73c   : > { %v6705_v4 = vpop.f32.mrf.mxu0  ;;  %12890 = vmatpush3.msra.mxu0 %v12847_v3  ;;  %12860 = vmatprep.subr.mxu1 %v6802_v6 }
 0x73d   : > { %12850 = vmatprep.mubr.msk.f32.mxu1 %vm323_vm0, %v6705_v4  ;;  %12891 = vmatprep.subr.mxu0 %v6705_v4 }
 0x73e   : > { %12851 = vmatmul.mubr.msk.f32.vlgmr.msra.gmra.mxu1 %vm323_vm0, %v12847_v3  ;;  %12892 = vmatpush3.msra.mxu0 %v6705_v4 }
 0x73f   : > { %12894 = vmatmul.mubr.msk.f32.vlgmr.msra.gmra.mxu0 %vm663_vm1, %v13866_v41  ;;  %12861 = vmatpush3.msra.mxu1 %v6802_v6 }
 0x740   : > { %12905 = vmatprep.mubr.msk.f32.mxu0 %vm663_vm1, %v13873_v42  ;;  %12872 = vmatprep.subr.mxu1 %v6802_v6 }
 0x7ef   : > { %v12816_v10 = vpop.f32.mrf.mxu1 }
 0x7f0   : > { %v14030_v17 = vadd.f32 %v12816_v10, %v13983_v21  ;;  %v12859_v13 = vpop.f32.mrf.mxu0 }
 0x7f1   : > { %v6278_v14 = vpop.f32.mrf.mxu1  ;;  %12901 = vmatprep.subr.mxu0 %v12859_v13 }
 0x7f2   : > { %v14033_v15 = vadd.f32 %v6278_v14, %v13986_v48  ;;  %v6877_v20 = vpop.f32.mrf.mxu0  ;;  %12902 = vmatpush3.msra.mxu0 %v12859_v13  ;;  %v14149_v14 = vld [vmem:[%s13547_s15 + $0x38] sm:$0xff] }
 0x7f3   : > { %12862 = vmatprep.mubr.msk.f32.mxu1 %vm323_vm0, %v6877_v20  ;;  %12903 = vmatprep.subr.mxu0 %v6877_v20 }
 0x7f4   : > { %v12828_v23 = vpop.f32.mrf.mxu1  ;;  %12863 = vmatmul.mubr.msk.f32.vlgmr.msra.gmra.mxu1 %vm323_vm0, %v12859_v13  ;;  %12904 = vmatpush3.msra.mxu0 %v6877_v20  ;;  %v9531_v20 = vld [vmem:[%s13547_s15] sm:$0xff] }
 0x7f5   : > { %v14038_v24 = vadd.f32 %v12828_v23, %v13991_v53  ;;  %v12871_v25 = vpop.f32.mrf.mxu0  ;;  %12906 = vmatmul.mubr.msk.f32.vlgmr.msra.gmra.mxu0 %vm663_vm1, %v13886_v54  ;;  %12873 = vmatpush3.msra.mxu1 %v6802_v6 }
 0x7f6   : > { %v6448_v16 = vpop.f32.mrf.mxu1  ;;  %12913 = vmatprep.subr.mxu0 %v12871_v25  ;;  %12917 = vmatprep.mubr.msk.f32.mxu0 %vm663_vm1, %v13890_v55 }
 0x7f7   : > { %v14045_v5 = vadd.f32 %v6448_v16, %v13998_v59  ;;  %v7047_v26 = vpop.f32.mrf.mxu0  ;;  %12914 = vmatpush3.msra.mxu0 %v12871_v25  ;;  %12884 = vmatprep.subr.mxu1 %v6802_v6  ;;  %v11835_v16 = vld [vmem:[%s13547_s15 + $0x10] sm:$0xff] }
 0x7f8   : > { %12874 = vmatprep.mubr.msk.f32.mxu1 %vm323_vm0, %v7047_v26  ;;  %12915 = vmatprep.subr.mxu0 %v7047_v26 }
 0x7f9   : > { %v12840_v27 = vpop.f32.mrf.mxu1  ;;  %12875 = vmatmul.mubr.msk.f32.vlgmr.msra.gmra.mxu1 %vm323_vm0, %v12871_v25  ;;  %12916 = vmatpush3.msra.mxu0 %v7047_v26  ;;  %v9532_v25 = vld [vmem:[%s13547_s15 + $0x8] sm:$0xff] }
 0x7fa   : > { %v14050_v28 = vadd.f32 %v12840_v27, %v14003_v19  ;;  %v12883_v29 = vpop.f32.mrf.mxu0  ;;  %12918 = vmatmul.mubr.msk.f32.vlgmr.msra.gmra.mxu0 %vm663_vm1, %v13904_v45  ;;  %12885 = vmatpush3.msra.mxu1 %v6802_v6  ;;  %v11836_v27 = vld [vmem:[%s13547_s15 + $0x18] sm:$0xff] }
 0x7fb   : > { %v6618_v30 = vpop.f32.mrf.mxu1  ;;  %12925 = vmatprep.subr.mxu0 %v12883_v29  ;;  %12929 = vmatprep.mubr.msk.f32.mxu0 %vm663_vm1, %v13837_v31 }
 0x7fc   : > { %v14057_v32 = vadd.f32 %v6618_v30, %v14010_v63  ;;  %v7217_v8 = vpop.f32.mrf.mxu0  ;;  %12926 = vmatpush3.msra.mxu0 %v12883_v29  ;;  %12896 = vmatprep.subr.mxu1 %v6802_v6 }
 0x7fd   : > { %12886 = vmatprep.mubr.msk.f32.mxu1 %vm323_vm0, %v7217_v8  ;;  %12927 = vmatprep.subr.mxu0 %v7217_v8 }
 0x7fe   : > { %v12852_v9 = vpop.f32.mrf.mxu1  ;;  %12887 = vmatmul.mubr.msk.f32.vlgmr.msra.gmra.mxu1 %vm323_vm0, %v12883_v29  ;;  %12928 = vmatpush3.msra.mxu0 %v7217_v8  ;;  %v9530_v8 = vld [vmem:[#allocation3 + $0x70] sm:$0xff] }
 0x7ff   : > { %v14062_v33 = vadd.f32 %v12852_v9, %v14015_v2  ;;  %v12895_v34 = vpop.f32.mrf.mxu0  ;;  %12930 = vmatmul.mubr.msk.f32.vlgmr.msra.gmra.mxu0 %vm663_vm1, %v13851_v36  ;;  %12897 = vmatpush3.msra.mxu1 %v6802_v6 }
 0x800   : > { %12937 = vmatprep.subr.mxu0 %v12895_v34  ;;  %12941 = vmatprep.mubr.msk.f32.mxu0 %vm663_vm1, %v13855_v37  ;;  %v14074_v38 = vpop.f32.mrf.mxu1 }
 0x801   : > { %v7387_v35 = vpop.f32.mrf.mxu0  ;;  %12938 = vmatpush3.msra.mxu0 %v12895_v34  ;;  %12908 = vmatprep.subr.mxu1 %v7484_v11 }
 0x802   : > { %12898 = vmatprep.mubr.msk.f32.mxu1 %vm323_vm0, %v7387_v35  ;;  %12939 = vmatprep.subr.mxu0 %v7387_v35 }
 0x803   : > { %12899 = vmatmul.mubr.msk.f32.vlgmr.msra.gmra.mxu1 %vm323_vm0, %v12895_v34  ;;  %12940 = vmatpush3.msra.mxu0 %v7387_v35 }
 0x804   : > { %12942 = vmatmul.mubr.msk.f32.vlgmr.msra.gmra.mxu0 %vm663_vm1, %v13866_v41  ;;  %12909 = vmatpush3.msra.mxu1 %v7484_v11 }
 0x805   : > { %12953 = vmatprep.mubr.msk.f32.mxu0 %vm663_vm1, %v13873_v42  ;;  %12920 = vmatprep.subr.mxu1 %v7484_v11 }
 0x8b4   : > { %v12864_v40 = vpop.f32.mrf.mxu1 }
 0x8b5   : > { %v14077_v21 = vadd.f32 %v12864_v40, %v14030_v17  ;;  %v12907_v46 = vpop.f32.mrf.mxu0  ;;  %v14141_v17 = vld [vmem:[%s13547_s15 + $0x30] sm:$0xff] }
 0x8b6   : > { %v6960_v47 = vpop.f32.mrf.mxu1  ;;  %12949 = vmatprep.subr.mxu0 %v12907_v46 }
 0x8b7   : > { %v14080_v48 = vadd.f32 %v6960_v47, %v14033_v15  ;;  %v7559_v49 = vpop.f32.mrf.mxu0  ;;  %12950 = vmatpush3.msra.mxu0 %v12907_v46  ;;  %v8848_v15 = vld [vmem:[#allocation3 + $0x68] sm:$0xff] }
 0x8b8   : > { %12910 = vmatprep.mubr.msk.f32.mxu1 %vm323_vm0, %v7559_v49  ;;  %12951 = vmatprep.subr.mxu0 %v7559_v49 }
 0x8b9   : > { %v12876_v50 = vpop.f32.mrf.mxu1  ;;  %12911 = vmatmul.mubr.msk.f32.vlgmr.msra.gmra.mxu1 %vm323_vm0, %v12907_v46  ;;  %12952 = vmatpush3.msra.mxu0 %v7559_v49  ;;  %v10212_v49 = vld [vmem:[#allocation3 + $0x78] sm:$0xff] }
 0x8ba   : > { %v14085_v53 = vadd.f32 %v12876_v50, %v14038_v24  ;;  %v12919_v57 = vpop.f32.mrf.mxu0  ;;  %12954 = vmatmul.mubr.msk.f32.vlgmr.msra.gmra.mxu0 %vm663_vm1, %v13886_v54  ;;  %12921 = vmatpush3.msra.mxu1 %v7484_v11 }
 0x8bb   : > { %v7130_v58 = vpop.f32.mrf.mxu1  ;;  %12961 = vmatprep.subr.mxu0 %v12919_v57  ;;  %12965 = vmatprep.mubr.msk.f32.mxu0 %vm663_vm1, %v13890_v55 }
 0x8bc   : > { %v14092_v59 = vadd.f32 %v7130_v58, %v14045_v5  ;;  %v7729_v60 = vpop.f32.mrf.mxu0  ;;  %12962 = vmatpush3.msra.mxu0 %v12919_v57  ;;  %12932 = vmatprep.subr.mxu1 %v7484_v11 }
 0x8bd   : > { %12922 = vmatprep.mubr.msk.f32.mxu1 %vm323_vm0, %v7729_v60  ;;  %12963 = vmatprep.subr.mxu0 %v7729_v60 }
 0x8be   : > { %v12888_v61 = vpop.f32.mrf.mxu1  ;;  %12923 = vmatmul.mubr.msk.f32.vlgmr.msra.gmra.mxu1 %vm323_vm0, %v12919_v57  ;;  %12964 = vmatpush3.msra.mxu0 %v7729_v60 }
 0x8bf   : > { %v14097_v19 = vadd.f32 %v12888_v61, %v14050_v28  ;;  %v12931_v56 = vpop.f32.mrf.mxu0  ;;  %12966 = vmatmul.mubr.msk.f32.vlgmr.msra.gmra.mxu0 %vm663_vm1, %v13904_v45  ;;  %12933 = vmatpush3.msra.mxu1 %v7484_v11 }
 0x8c0   : > { %v7300_v62 = vpop.f32.mrf.mxu1  ;;  %12973 = vmatprep.subr.mxu0 %v12931_v56  ;;  %12977 = vmatprep.mubr.msk.f32.mxu0 %vm663_vm1, %v13837_v31 }
 0x8c1   : > { %v14104_v63 = vadd.f32 %v7300_v62, %v14057_v32  ;;  %v7899_v0 = vpop.f32.mrf.mxu0  ;;  %12974 = vmatpush3.msra.mxu0 %v12931_v56  ;;  %12944 = vmatprep.subr.mxu1 %v7484_v11 }
 0x8c2   : > { %12934 = vmatprep.mubr.msk.f32.mxu1 %vm323_vm0, %v7899_v0  ;;  %12975 = vmatprep.subr.mxu0 %v7899_v0 }
 0x8c3   : > { %v12900_v1 = vpop.f32.mrf.mxu1  ;;  %12935 = vmatmul.mubr.msk.f32.vlgmr.msra.gmra.mxu1 %vm323_vm0, %v12931_v56  ;;  %12976 = vmatpush3.msra.mxu0 %v7899_v0 }
 0x8c4   : > { %v14109_v2 = vadd.f32 %v12900_v1, %v14062_v33  ;;  %v12943_v3 = vpop.f32.mrf.mxu0  ;;  %12978 = vmatmul.mubr.msk.f32.vlgmr.msra.gmra.mxu0 %vm663_vm1, %v13851_v36  ;;  %12945 = vmatpush3.msra.mxu1 %v7484_v11  ;;  %v8166_v36 = vld [vmem:[#allocation3 + $0x60] sm:$0xff] }
 0x8c5   : > { %12985 = vmatprep.subr.mxu0 %v12943_v3  ;;  %12989 = vmatprep.mubr.msk.f32.mxu0 %vm663_vm1, %v13855_v37  ;;  %v14207_v1 = vpop.f32.mrf.mxu1 }
 0x8c6   : > { %v8069_v31 = vpop.f32.mrf.mxu0  ;;  %12986 = vmatpush3.msra.mxu0 %v12943_v3  ;;  %12956 = vmatprep.subr.mxu1 %v8166_v36 }
 0x8c7   : > { %12946 = vmatprep.mubr.msk.f32.mxu1 %vm323_vm0, %v8069_v31  ;;  %12987 = vmatprep.subr.mxu0 %v8069_v31 }
 0x8c8   : > { %12947 = vmatmul.mubr.msk.f32.vlgmr.msra.gmra.mxu1 %vm323_vm0, %v12943_v3  ;;  %12988 = vmatpush3.msra.mxu0 %v8069_v31  ;;  %v13405_v31 = vmov 0.0  }
 0x8c9   : > { %12990 = vmatmul.mubr.msk.f32.vlgmr.msra.gmra.mxu0 %vm663_vm1, %v13866_v41  ;;  %12957 = vmatpush3.msra.mxu1 %v8166_v36 }
 0x8ca   : > { %13001 = vmatprep.mubr.msk.f32.mxu0 %vm663_vm1, %v13873_v42  ;;  %12968 = vmatprep.subr.mxu1 %v8166_v36  ;;  %v14129_v42 = vld [vmem:[%s13547_s15 + $0x20] sm:$0xff] }
 0x979   : > { %v14209_v3 = vpop.f32.mrf.mxu1 }
 0x97a   : > { %v12955_v4 = vpop.f32.mrf.mxu0 }
 0x97b   : > { %12997 = vmatprep.subr.mxu0 %v12955_v4 }
 0x97c   : > { %v8241_v37 = vpop.f32.mrf.mxu0  ;;  %12998 = vmatpush3.msra.mxu0 %v12955_v4 }
 0x97d   : > { %12958 = vmatprep.mubr.msk.f32.mxu1 %vm323_vm0, %v8241_v37  ;;  %12999 = vmatprep.subr.mxu0 %v8241_v37 }
 0x97e   : > { %12959 = vmatmul.mubr.msk.f32.vlgmr.msra.gmra.mxu1 %vm323_vm0, %v12955_v4  ;;  %13000 = vmatpush3.msra.mxu0 %v8241_v37  ;;  %v14213_v4 = vpop.f32.mrf.mxu1  ;;  %v10907_v37 = vld [vmem:[#allocation6 + $0x70] sm:$0xff] }
 0x97f   : > { %v12967_v6 = vpop.f32.mrf.mxu0  ;;  %13002 = vmatmul.mubr.msk.f32.vlgmr.msra.gmra.mxu0 %vm663_vm1, %v13886_v54  ;;  %12969 = vmatpush3.msra.mxu1 %v8166_v36 }
 0x980   : > { %13009 = vmatprep.subr.mxu0 %v12967_v6  ;;  %13013 = vmatprep.mubr.msk.f32.mxu0 %vm663_vm1, %v13890_v55  ;;  %v14137_v55 = vld [vmem:[%s13547_s15 + $0x28] sm:$0xff]  ;;  %s13335_s15 = sshll.u32 %s13407_s14, 4  ;;  %s13336_s15 = int_to_ptr.vmem [resolvable:$false] %s13335_s15 }
 0x981   : > { %v8411_v41 = vpop.f32.mrf.mxu0  ;;  %13010 = vmatpush3.msra.mxu0 %v12967_v6  ;;  %12980 = vmatprep.subr.mxu1 %v8166_v36  ;;  %s13337_s17 = scalar_lea.vmem %s13336_s15, 2048  ;;  %p13338_p11 = scmp.lt.s32.totalorder %s14392_s10, %s13336_s15 }
 0x982   : > { %12970 = vmatprep.mubr.msk.f32.mxu1 %vm323_vm0, %v8411_v41  ;;  %13011 = vmatprep.subr.mxu0 %v8411_v41  ;;  %p13339_p0 = scmp.lt.s32.totalorder %s13337_s17, %s13331_s13 }
 0x983   : > { %12971 = vmatmul.mubr.msk.f32.vlgmr.msra.gmra.mxu1 %vm323_vm0, %v12967_v6  ;;  %13012 = vmatpush3.msra.mxu0 %v8411_v41  ;;  %v10906_v6 = vld [vmem:[#allocation6 + $0x68] sm:$0xff]  ;;  %v14219_v41 = vpop.f32.mrf.mxu1 }
 0x984   : > { %v12979_v10 = vpop.f32.mrf.mxu0  ;;  %13014 = vmatmul.mubr.msk.f32.vlgmr.msra.gmra.mxu0 %vm663_vm1, %v13904_v45  ;;  %12981 = vmatpush3.msra.mxu1 %v8166_v36  ;;  %p13340_p1 = por %p13339_p0, %p13338_p11 }
 0x985   : > { %13021 = vmatprep.subr.mxu0 %v12979_v10  ;;  %13025 = vmatprep.mubr.msk.f32.mxu0 %vm663_vm1, %v14129_v42 }
 0x986   : > { %v8581_v54 = vpop.f32.mrf.mxu0  ;;  %13022 = vmatpush3.msra.mxu0 %v12979_v10  ;;  %12992 = vmatprep.subr.mxu1 %v8166_v36  ;;  %p13341_p3 = pnand %p13340_p1, %p13334_p8 }
 0x987   : > { %12982 = vmatprep.mubr.msk.f32.mxu1 %vm323_vm0, %v8581_v54  ;;  %13023 = vmatprep.subr.mxu0 %v8581_v54 }
 0x988   : > { %12983 = vmatmul.mubr.msk.f32.vlgmr.msra.gmra.mxu1 %vm323_vm0, %v12979_v10  ;;  %13024 = vmatpush3.msra.mxu0 %v8581_v54  ;;  %v10904_v10 = vld [vmem:[#allocation6 + $0x58] sm:$0xff]  ;;  %v14225_v54 = vpop.f32.mrf.mxu1 }
 0x989   : > { %v12991_v45 = vpop.f32.mrf.mxu0  ;;  %13026 = vmatmul.mubr.msk.f32.vlgmr.msra.gmra.mxu0 %vm663_vm1, %v14137_v55  ;;  %12993 = vmatpush3.msra.mxu1 %v8166_v36  ;;  %v10908_v36 = vld [vmem:[#allocation6 + $0x78] sm:$0xff] }
 0x98a   : > { %13033 = vmatprep.subr.mxu0 %v12991_v45  ;;  %13037 = vmatprep.mubr.msk.f32.mxu0 %vm663_vm1, %v14141_v17 }
 0x98b   : > { %v8751_v13 = vpop.f32.mrf.mxu0  ;;  %13034 = vmatpush3.msra.mxu0 %v12991_v45  ;;  %13004 = vmatprep.subr.mxu1 %v8848_v15 }
 0x98c   : > { %12994 = vmatprep.mubr.msk.f32.mxu1 %vm323_vm0, %v8751_v13  ;;  %13035 = vmatprep.subr.mxu0 %v8751_v13 }
 0x98d   : > { %12995 = vmatmul.mubr.msk.f32.vlgmr.msra.gmra.mxu1 %vm323_vm0, %v12991_v45  ;;  %13036 = vmatpush3.msra.mxu0 %v8751_v13  ;;  %v14231_v45 = vpop.f32.mrf.mxu1  ;;  %v10901_v13 = vld [vmem:[#allocation6 + $0x40] sm:$0xff] }
 0x98e   : > { %13038 = vmatmul.mubr.msk.f32.vlgmr.msra.gmra.mxu0 %vm663_vm1, %v14149_v14  ;;  %13005 = vmatpush3.msra.mxu1 %v8848_v15 }
 0x98f   : > { %13016 = vmatprep.subr.mxu1 %v8848_v15  ;;  %13049 = vmatprep.mubr.msk.f32.mxu0 %vm663_vm1, %v9531_v20 }
 0xa3f   : > { %v13003_v23 = vpop.f32.mrf.mxu0 }
 0xa40   : > { %13045 = vmatprep.subr.mxu0 %v13003_v23 }
 0xa41   : > { %v8923_v24 = vpop.f32.mrf.mxu0  ;;  %13046 = vmatpush3.msra.mxu0 %v13003_v23 }
 0xa42   : > { %13006 = vmatprep.mubr.msk.f32.mxu1 %vm323_vm0, %v8923_v24  ;;  %13047 = vmatprep.subr.mxu0 %v8923_v24 }
 0xa43   : > { %13007 = vmatmul.mubr.msk.f32.vlgmr.msra.gmra.mxu1 %vm323_vm0, %v13003_v23  ;;  %13048 = vmatpush3.msra.mxu0 %v8923_v24  ;;  %v10898_v23 = vld [vmem:[#allocation6 + $0x28] sm:$0xff]  ;;  %v10897_v24 = vld [vmem:[#allocation6 + $0x20] sm:$0xff] }
 0xa44   : > { %v13015_v5 = vpop.f32.mrf.mxu0  ;;  %13050 = vmatmul.mubr.msk.f32.vlgmr.msra.gmra.mxu0 %vm663_vm1, %v9532_v25  ;;  %13017 = vmatpush3.msra.mxu1 %v8848_v15 }
 0xa45   : > { %13057 = vmatprep.subr.mxu0 %v13015_v5  ;;  %13061 = vmatprep.mubr.msk.f32.mxu0 %vm663_vm1, %v11835_v16 }
 0xa46   : > { %v9093_v26 = vpop.f32.mrf.mxu0  ;;  %13058 = vmatpush3.msra.mxu0 %v13015_v5  ;;  %13028 = vmatprep.subr.mxu1 %v8848_v15 }
 0xa47   : > { %13018 = vmatprep.mubr.msk.f32.mxu1 %vm323_vm0, %v9093_v26  ;;  %13059 = vmatprep.subr.mxu0 %v9093_v26 }
 0xa48   : > { %13019 = vmatmul.mubr.msk.f32.vlgmr.msra.gmra.mxu1 %vm323_vm0, %v13015_v5  ;;  %13060 = vmatpush3.msra.mxu0 %v9093_v26  ;;  %v10895_v5 = vld [vmem:[#allocation6 + $0x10] sm:$0xff] }
 0xa49   : > { %v13027_v28 = vpop.f32.mrf.mxu0  ;;  %13062 = vmatmul.mubr.msk.f32.vlgmr.msra.gmra.mxu0 %vm663_vm1, %v11836_v27  ;;  %13029 = vmatpush3.msra.mxu1 %v8848_v15 }
 0xa4a   : > { %13069 = vmatprep.subr.mxu0 %v13027_v28  ;;  %13073 = vmatprep.mubr.msk.f32.mxu0 %vm663_vm1, %v14129_v42 }
 0xa4b   : > { %v9263_v29 = vpop.f32.mrf.mxu0  ;;  %13070 = vmatpush3.msra.mxu0 %v13027_v28  ;;  %13040 = vmatprep.subr.mxu1 %v8848_v15 }
 0xa4c   : > { %13030 = vmatprep.mubr.msk.f32.mxu1 %vm323_vm0, %v9263_v29  ;;  %13071 = vmatprep.subr.mxu0 %v9263_v29 }
 0xa4d   : > { %13031 = vmatmul.mubr.msk.f32.vlgmr.msra.gmra.mxu1 %vm323_vm0, %v13027_v28  ;;  %13072 = vmatpush3.msra.mxu0 %v9263_v29  ;;  %v10893_v29 = vld [vmem:[#allocation6] sm:$0xff] }
 0xa4e   : > { %v13039_v30 = vpop.f32.mrf.mxu0  ;;  %13074 = vmatmul.mubr.msk.f32.vlgmr.msra.gmra.mxu0 %vm663_vm1, %v14137_v55  ;;  %13041 = vmatpush3.msra.mxu1 %v8848_v15  ;;  %v10899_v15 = vld [vmem:[#allocation6 + $0x30] sm:$0xff] }
 0xa4f   : > { %13081 = vmatprep.subr.mxu0 %v13039_v30  ;;  %13085 = vmatprep.mubr.msk.f32.mxu0 %vm663_vm1, %v14141_v17 }
 0xa50   : > { %v9433_v32 = vpop.f32.mrf.mxu0  ;;  %13082 = vmatpush3.msra.mxu0 %v13039_v30  ;;  %13052 = vmatprep.subr.mxu1 %v9530_v8 }
 0xa51   : > { %13042 = vmatprep.mubr.msk.f32.mxu1 %vm323_vm0, %v9433_v32  ;;  %13083 = vmatprep.subr.mxu0 %v9433_v32 }
 0xa52   : > { %13043 = vmatmul.mubr.msk.f32.vlgmr.msra.gmra.mxu1 %vm323_vm0, %v13039_v30  ;;  %13084 = vmatpush3.msra.mxu0 %v9433_v32 }
 0xa53   : > { %13086 = vmatmul.mubr.msk.f32.vlgmr.msra.gmra.mxu0 %vm663_vm1, %v14149_v14  ;;  %13053 = vmatpush3.msra.mxu1 %v9530_v8 }
 0xa54   : > { %13097 = vmatprep.mubr.msk.f32.mxu0 %vm663_vm1, %v9531_v20  ;;  %13064 = vmatprep.subr.mxu1 %v9530_v8  ;;  %v14239_v20 = vpop.f32.mrf.mxu1 }
 0xb04   : > { %v13051_v9 = vpop.f32.mrf.mxu0 }
 0xb05   : > { %13093 = vmatprep.subr.mxu0 %v13051_v9 }
 0xb06   : > { %v9605_v33 = vpop.f32.mrf.mxu0  ;;  %13094 = vmatpush3.msra.mxu0 %v13051_v9 }
 0xb07   : > { %13054 = vmatprep.mubr.msk.f32.mxu1 %vm323_vm0, %v9605_v33  ;;  %13095 = vmatprep.subr.mxu0 %v9605_v33 }
 0xb08   : > { %13055 = vmatmul.mubr.msk.f32.vlgmr.msra.gmra.mxu1 %vm323_vm0, %v13051_v9  ;;  %13096 = vmatpush3.msra.mxu0 %v9605_v33 }
 0xb09   : > { %v13063_v34 = vpop.f32.mrf.mxu0  ;;  %13098 = vmatmul.mubr.msk.f32.vlgmr.msra.gmra.mxu0 %vm663_vm1, %v9532_v25  ;;  %13065 = vmatpush3.msra.mxu1 %v9530_v8  ;;  %v14245_v25 = vpop.f32.mrf.mxu1 }
 0xb0a   : > { %13105 = vmatprep.subr.mxu0 %v13063_v34  ;;  %13109 = vmatprep.mubr.msk.f32.mxu0 %vm663_vm1, %v11835_v16  ;;  %v10896_v16 = vld [vmem:[#allocation6 + $0x18] sm:$0xff] }
 0xb0b   : > { %v9775_v35 = vpop.f32.mrf.mxu0  ;;  %13106 = vmatpush3.msra.mxu0 %v13063_v34  ;;  %13076 = vmatprep.subr.mxu1 %v9530_v8  ;;  %v14251_v26 = vpop.f32.mrf.mxu1 }
 0xb0c   : > { %13066 = vmatprep.mubr.msk.f32.mxu1 %vm323_vm0, %v9775_v35  ;;  %13107 = vmatprep.subr.mxu0 %v9775_v35 }
 0xb0d   : > { %13067 = vmatmul.mubr.msk.f32.vlgmr.msra.gmra.mxu1 %vm323_vm0, %v13063_v34  ;;  %13108 = vmatpush3.msra.mxu0 %v9775_v35  ;;  %v12960_v28 = vpop.f32.mrf.mxu1 }
 0xb0e   : > { %v13075_v11 = vpop.f32.mrf.mxu0  ;;  %13110 = vmatmul.mubr.msk.f32.vlgmr.msra.gmra.mxu0 %vm663_vm1, %v11836_v27  ;;  %13077 = vmatpush3.msra.mxu1 %v9530_v8  ;;  %v10894_v27 = vld [vmem:[#allocation6 + $0x8] sm:$0xff] }
 0xb0f   : > { %13117 = vmatprep.subr.mxu0 %v13075_v11  ;;  %13121 = vmatprep.mubr.msk.f32.mxu0 %vm663_vm1, %v14129_v42  ;;  %v10905_v42 = vld [vmem:[#allocation6 + $0x60] sm:$0xff]  ;;  %v8324_v30 = vpop.f32.mrf.mxu1 }
 0xb10   : > { %v9945_v40 = vpop.f32.mrf.mxu0  ;;  %13118 = vmatpush3.msra.mxu0 %v13075_v11  ;;  %13088 = vmatprep.subr.mxu1 %v9530_v8 }
 0xb11   : > { %13078 = vmatprep.mubr.msk.f32.mxu1 %vm323_vm0, %v9945_v40  ;;  %13119 = vmatprep.subr.mxu0 %v9945_v40  ;;  %v12972_v32 = vpop.f32.mrf.mxu1 }
 0xb12   : > { %13079 = vmatmul.mubr.msk.f32.vlgmr.msra.gmra.mxu1 %vm323_vm0, %v13075_v11  ;;  %13120 = vmatpush3.msra.mxu0 %v9945_v40 }
 0xb13   : > { %v13087_v46 = vpop.f32.mrf.mxu0  ;;  %13122 = vmatmul.mubr.msk.f32.vlgmr.msra.gmra.mxu0 %vm663_vm1, %v14137_v55  ;;  %13089 = vmatpush3.msra.mxu1 %v9530_v8  ;;  %v10903_v55 = vld [vmem:[#allocation6 + $0x50] sm:$0xff]  ;;  %v8494_v8 = vpop.f32.mrf.mxu1 }
 0xb14   : > { %13129 = vmatprep.subr.mxu0 %v13087_v46  ;;  %13133 = vmatprep.mubr.msk.f32.mxu0 %vm663_vm1, %v14141_v17  ;;  %v10902_v17 = vld [vmem:[#allocation6 + $0x48] sm:$0xff] }
 0xb15   : > { %v10115_v47 = vpop.f32.mrf.mxu0  ;;  %13130 = vmatpush3.msra.mxu0 %v13087_v46  ;;  %13100 = vmatprep.subr.mxu1 %v10212_v49  ;;  %v12984_v9 = vpop.f32.mrf.mxu1 }
 0xb16   : > { %13090 = vmatprep.mubr.msk.f32.mxu1 %vm323_vm0, %v10115_v47  ;;  %13131 = vmatprep.subr.mxu0 %v10115_v47 }
 0xb17   : > { %13091 = vmatmul.mubr.msk.f32.vlgmr.msra.gmra.mxu1 %vm323_vm0, %v13087_v46  ;;  %13132 = vmatpush3.msra.mxu0 %v10115_v47  ;;  %v8664_v33 = vpop.f32.mrf.mxu1 }
 0xb18   : > { %13134 = vmatmul.mubr.msk.f32.vlgmr.msra.gmra.mxu0 %vm663_vm1, %v14149_v14  ;;  %13101 = vmatpush3.msra.mxu1 %v10212_v49  ;;  %v10900_v14 = vld [vmem:[#allocation6 + $0x38] sm:$0xff] }
 0xb19   : > { %13112 = vmatprep.subr.mxu1 %v10212_v49  ;;  %13141 = vmatprep.subr.mxu0 %v13405_v31  ;;  %v14261_v34 = vpop.f32.mrf.mxu1 }
 0xb1a   : > { %13142 = vmatpush3.msra.mxu0 %v10908_v36  ;;  %13173 = vmatprep.mubr.msk.f32.mxu0 %vm13406_vm2, %v13405_v31 }
 0xb1b   : > { %13143 = vmatprep.subr.mxu0 %v13405_v31  ;;  %v14263_v35 = vpop.f32.mrf.mxu1 }
 0xb1c   : > { %13144 = vmatpush3.msra.mxu0 %v10907_v37 }
 0xb1d   : > { %13145 = vmatprep.subr.mxu0 %v13405_v31  ;;  %v13008_v11 = vpop.f32.mrf.mxu1 }
 0xb1e   : > { %13146 = vmatpush3.msra.mxu0 %v10906_v6 }
 0xb1f   : > { %13147 = vmatprep.subr.mxu0 %v13405_v31  ;;  %v9006_v40 = vpop.f32.mrf.mxu1 }
 0xb20   : > { %13148 = vmatpush3.msra.mxu0 %v10905_v42 }
 0xb21   : > { %13149 = vmatprep.subr.mxu0 %v13405_v31  ;;  %v13020_v46 = vpop.f32.mrf.mxu1 }
 0xb22   : > { %13150 = vmatpush3.msra.mxu0 %v10904_v10 }
 0xb23   : > { %13151 = vmatprep.subr.mxu0 %v13405_v31  ;;  %v9176_v47 = vpop.f32.mrf.mxu1 }
 0xb24   : > { %13152 = vmatpush3.msra.mxu0 %v10903_v55 }
 0xb25   : > { %13153 = vmatprep.subr.mxu0 %v13405_v31 }
 0xb26   : > { %13154 = vmatpush3.msra.mxu0 %v10902_v17 }
 0xb27   : > { %13155 = vmatprep.subr.mxu0 %v13405_v31 }
 0xb28   : > { %13156 = vmatpush3.msra.mxu0 %v10901_v13 }
 0xb29   : > { %13157 = vmatprep.subr.mxu0 %v13405_v31 }
 0xb2a   : > { %13158 = vmatpush3.msra.mxu0 %v10900_v14 }
 0xb2b   : > { %13159 = vmatprep.subr.mxu0 %v13405_v31 }
 0xb2c   : > { %13160 = vmatpush3.msra.mxu0 %v10899_v15 }
 0xb2d   : > { %13161 = vmatprep.subr.mxu0 %v13405_v31 }
 0xb2e   : > { %13162 = vmatpush3.msra.mxu0 %v10898_v23 }
 0xb2f   : > { %13163 = vmatprep.subr.mxu0 %v13405_v31 }
 0xb30   : > { %13164 = vmatpush3.msra.mxu0 %v10897_v24 }
 0xb31   : > { %13165 = vmatprep.subr.mxu0 %v13405_v31 }
 0xb32   : > { %13166 = vmatpush3.msra.mxu0 %v10896_v16 }
 0xb33   : > { %13167 = vmatprep.subr.mxu0 %v13405_v31 }
 0xb34   : > { %13168 = vmatpush3.msra.mxu0 %v10895_v5 }
 0xb35   : > { %13169 = vmatprep.subr.mxu0 %v13405_v31 }
 0xb36   : > { %13170 = vmatpush3.msra.mxu0 %v10894_v27 }
 0xb37   : > { %13171 = vmatprep.subr.mxu0 %v13405_v31 }
 0xb38   : > { %13172 = vmatpush3.msra.mxu0 %v10893_v29 }
 0xbc9   : > { %v13099_v50 = vpop.f32.mrf.mxu0 }
 0xbcb   : > { %v10287_v57 = vpop.f32.mrf.mxu0 }
 0xbcc   : > { %13102 = vmatprep.mubr.msk.f32.mxu1 %vm323_vm0, %v10287_v57 }
 0xbcd   : > { %13103 = vmatmul.mubr.msk.f32.vlgmr.msra.gmra.mxu1 %vm323_vm0, %v13099_v50 }
 0xbce   : > { %v13111_v58 = vpop.f32.mrf.mxu0  ;;  %13113 = vmatpush3.msra.mxu1 %v10212_v49 }
 0xbcf   : > { %13124 = vmatprep.subr.mxu1 %v10212_v49 }
 0xbd0   : > { %v10457_v60 = vpop.f32.mrf.mxu0 }
 0xbd1   : > { %13114 = vmatprep.mubr.msk.f32.mxu1 %vm323_vm0, %v10457_v60 }
 0xbd2   : > { %13115 = vmatmul.mubr.msk.f32.vlgmr.msra.gmra.mxu1 %vm323_vm0, %v13111_v58 }
 0xbd3   : > { %v13123_v61 = vpop.f32.mrf.mxu0  ;;  %13125 = vmatpush3.msra.mxu1 %v10212_v49 }
 0xbd4   : > { %13136 = vmatprep.subr.mxu1 %v10212_v49 }
 0xbd5   : > { %v10627_v56 = vpop.f32.mrf.mxu0 }
 0xbd6   : > { %13126 = vmatprep.mubr.msk.f32.mxu1 %vm323_vm0, %v10627_v56 }
 0xbd7   : > { %13127 = vmatmul.mubr.msk.f32.vlgmr.msra.gmra.mxu1 %vm323_vm0, %v13123_v61 }
 0xbd8   : > { %v13135_v62 = vpop.f32.mrf.mxu0  ;;  %13137 = vmatpush3.msra.mxu1 %v10212_v49  ;;  %v13032_v49 = vpop.f32.mrf.mxu1 }
 0xbd9   : > { %13176 = vmatprep.subr.mxu1 %v13405_v31 }
 0xbda   : > { %v10797_v0 = vpop.f32.mrf.mxu0  ;;  %v9346_v50 = vpop.f32.mrf.mxu1 }
 0xbdb   : > { %13138 = vmatprep.mubr.msk.f32.mxu1 %vm323_vm0, %v10797_v0 }
 0xbdc   : > { %13139 = vmatmul.mubr.msk.f32.vlgmr.msra.gmra.mxu1 %vm323_vm0, %v13135_v62  ;;  %v14265_v57 = vpop.f32.mrf.mxu1 }
 0xbdd   : > { %13177 = vmatpush3.msra.mxu1 %v10908_v36  ;;  %13208 = vmatprep.mubr.msk.f32.mxu1 %vm13406_vm2, %v13405_v31 }
 0xbde   : > { %13178 = vmatprep.subr.mxu1 %v13405_v31  ;;  %v14267_v58 = vpop.f32.mrf.mxu1 }
 0xbdf   : > { %13179 = vmatpush3.msra.mxu1 %v10907_v37 }
 0xbe0   : > { %13180 = vmatprep.subr.mxu1 %v13405_v31  ;;  %v13056_v60 = vpop.f32.mrf.mxu1 }
 0xbe1   : > { %13181 = vmatpush3.msra.mxu1 %v10906_v6 }
 0xbe2   : > { %13182 = vmatprep.subr.mxu1 %v13405_v31  ;;  %v9688_v61 = vpop.f32.mrf.mxu1 }
 0xbe3   : > { %13183 = vmatpush3.msra.mxu1 %v10905_v42 }
 0xbe4   : > { %13184 = vmatprep.subr.mxu1 %v13405_v31  ;;  %v13068_v56 = vpop.f32.mrf.mxu1 }
 0xbe5   : > { %13185 = vmatpush3.msra.mxu1 %v10904_v10  ;;  %v7652_v10 = vadd.f32 %v14209_v3, %v14077_v21  ;;  %v7821_v21 = vadd.f32 %v14225_v54, %v14092_v59  ;;  %v7991_v59 = vadd.f32 %v14239_v20, %v14104_v63 }
 0xbe6   : > { %13186 = vmatprep.subr.mxu1 %v13405_v31  ;;  %v9858_v62 = vpop.f32.mrf.mxu1 }
 0xbe7   : > { %13187 = vmatpush3.msra.mxu1 %v10903_v55  ;;  %v7651_v55 = vadd.f32 %v14213_v4, %v14080_v48 }
 0xbe8   : > { %13188 = vmatprep.subr.mxu1 %v13405_v31  ;;  %v13080_v0 = vpop.f32.mrf.mxu1 }
 0xbe9   : > { %13189 = vmatpush3.msra.mxu1 %v10902_v17 }
 0xbea   : > { %13190 = vmatprep.subr.mxu1 %v13405_v31  ;;  %v10028_v36 = vpop.f32.mrf.mxu1 }
 0xbeb   : > { %13191 = vmatpush3.msra.mxu1 %v10901_v13  ;;  %v8334_v13 = vadd.f32 %v12960_v28, %v7652_v10 }
 0xbec   : > { %13192 = vmatprep.subr.mxu1 %v13405_v31  ;;  %v13092_v42 = vpop.f32.mrf.mxu1 }
 0xbed   : > { %13193 = vmatpush3.msra.mxu1 %v10900_v14  ;;  %v8333_v14 = vadd.f32 %v8324_v30, %v7651_v55 }
 0xbee   : > { %13194 = vmatprep.subr.mxu1 %v13405_v31 }
 0xbef   : > { %13195 = vmatpush3.msra.mxu1 %v10899_v15 }
 0xbf0   : > { %13196 = vmatprep.subr.mxu1 %v13405_v31 }
 0xbf1   : > { %13197 = vmatpush3.msra.mxu1 %v10898_v23  ;;  %v10198_v23 = vpop.f32.mrf.mxu1 }
 0xbf2   : > { %13198 = vmatprep.subr.mxu1 %v13405_v31 }
 0xbf3   : > { %13199 = vmatpush3.msra.mxu1 %v10897_v24 }
 0xbf4   : > { %13200 = vmatprep.subr.mxu1 %v13405_v31 }
 0xbf5   : > { %13201 = vmatpush3.msra.mxu1 %v10896_v16  ;;  %v8503_v16 = vadd.f32 %v8494_v8, %v7821_v21 }
 0xbf6   : > { %13202 = vmatprep.subr.mxu1 %v13405_v31 }
 0xbf7   : > { %13203 = vmatpush3.msra.mxu1 %v10895_v5 }
 0xbf8   : > { %13204 = vmatprep.subr.mxu1 %v13405_v31 }
 0xbf9   : > { %13205 = vmatpush3.msra.mxu1 %v10894_v27 }
 0xbfa   : > { %13206 = vmatprep.subr.mxu1 %v13405_v31  ;;  %v1341_v31 = vadd.f32 %v13674_v51, %v13666_v43  ;;  %v9016_v43 = vadd.f32 %v13008_v11, %v8334_v13  ;;  %v9015_v51 = vadd.f32 %v9006_v40, %v8333_v14  ;;  %v8673_v11 = vadd.f32 %v8664_v33, %v7991_v59 }
 0xbfb   : > { %13207 = vmatpush3.msra.mxu1 %v10893_v29  ;;  %v9185_v29 = vadd.f32 %v9176_v47, %v8503_v16 }
 0xbfc   : > { %v2023_v37 = vadd.f32 %v13717_v22, %v1341_v31  ;;  %v9698_v24 = vadd.f32 %v13056_v60, %v9016_v43  ;;  %v9697_v48 = vadd.f32 %v9688_v61, %v9015_v51  ;;  %v9355_v63 = vadd.f32 %v9346_v50, %v8673_v11 }
 0xbfd   : > { %v8162_v60 = vadd.f32 %v14245_v25, %v14109_v2 }
 0xbfe   : > { %v2705_v6 = vadd.f32 %v13767_v52, %v2023_v37  ;;  %v7822_v52 = vadd.f32 %v14219_v41, %v14085_v53  ;;  %v7992_v53 = vadd.f32 %v14231_v45, %v14097_v19 }
 0xc00   : > { %v3387_v17 = vadd.f32 %v13815_v18, %v2705_v6  ;;  %v8504_v4 = vadd.f32 %v12972_v32, %v7822_v52  ;;  %v9867_v32 = vadd.f32 %v9858_v62, %v9185_v29  ;;  %v8674_v8 = vadd.f32 %v12984_v9, %v7992_v53 }
 0xc01   : > { %v11024_v29 = vlaneseq }
 0xc02   : > { %v4069_v15 = vadd.f32 %v13877_v44, %v3387_v17  ;;  %v9186_v28 = vadd.f32 %v13020_v46, %v8504_v4  ;;  %v9356_v45 = vadd.f32 %v13032_v49, %v8674_v8 }
 0xc03   : > { %v14311_v53 = vshrl.u32 %v11024_v29, 7 }
 0xc04   : > { %v4751_v22 = vadd.f32 %v13933_v12, %v4069_v15  ;;  %v9868_v30 = vadd.f32 %v13068_v56, %v9186_v28  ;;  %v10038_v61 = vadd.f32 %v13080_v0, %v9356_v45  ;;  %v10037_v56 = vadd.f32 %v10028_v36, %v9355_v63 }
 0xc05   : > { %v11026_v59 = vsub.s32 0, %v14311_v53 }
 0xc06   : > { %v5433_v18 = vadd.f32 %v13980_v39, %v4751_v22 }
 0xc08   : > { %v6115_v12 = vadd.f32 %v14027_v7, %v5433_v18 }
 0xc0a   : > { %v6797_v54 = vadd.f32 %v14074_v38, %v6115_v12 }
 0xc0c   : > { %v7479_v46 = vadd.f32 %v14207_v1, %v6797_v54  ;;  %v8844_v1 = vadd.f32 %v14261_v34, %v8162_v60  ;;  %v11080_v54 = vsub.s32 3, %v14311_v53 }
 0xc0e   : > { %v8161_v38 = vadd.f32 %v14251_v26, %v7479_v46  ;;  %v9526_v2 = vadd.f32 %v14265_v57, %v8844_v1 }
 0xc10   : > { %v8843_v31 = vadd.f32 %v14263_v35, %v8161_v38  ;;  %v10208_v0 = vadd.f32 %v13092_v42, %v9526_v2 }
 0xc12   : > { %v9525_v25 = vadd.f32 %v14267_v58, %v8843_v31 }
 0xc14   : > { %v10207_v36 = vadd.f32 %v10198_v23, %v9525_v25 }
 0xc8d   : > { %v13104_v3 = vpop.f32.mrf.mxu1 }
 0xc8e   : > { %v14285_v44 = vadd.f32 %v13104_v3, %v9698_v24 }
 0xc8f   : > { %v10370_v5 = vpop.f32.mrf.mxu1 }
 0xc90   : > { %v14287_v27 = vadd.f32 %v10370_v5, %v9697_v48 }
 0xc92   : > { %v10913_v39 = vadd.f32 %v14285_v44, %v14287_v27  ;;  %v13116_v41 = vpop.f32.mrf.mxu1 }
 0xc93   : > { %v14298_v47 = vadd.f32 %v13116_v41, %v9868_v30  ;;  %v11062_v41 = vsub.s32 2, %v14311_v53 }
 0xc94   : > { %v10914_v40 = vrot.slane %v10913_v39, 4  ;;  %v10540_v7 = vpop.f32.mrf.mxu1 }
 0xc95   : > { %v14300_v19 = vadd.f32 %v10540_v7, %v9867_v32 }
 0xc96   : > { %v10915_v20 = vadd.f32 %v10914_v40, %v10913_v39  ;;  %v11044_v39 = vsub.s32 1, %v14311_v53 }
 0xc97   : > { %v10923_v9 = vadd.f32 %v14298_v47, %v14300_v19  ;;  %v13128_v33 = vpop.f32.mrf.mxu1 }
 0xc98   : > { %v10916_v62 = vrot.slane %v10915_v20, 2  ;;  %v10720_v50 = vadd.f32 %v13128_v33, %v10038_v61 }
 0xc99   : > { %v10924_v37 = vrot.slane %v10923_v9, 4  ;;  %v10710_v49 = vpop.f32.mrf.mxu1 }
 0xc9a   : > { %v10719_v6 = vadd.f32 %v10710_v49, %v10037_v56  ;;  %v10917_v10 = vadd.f32 %v10916_v62, %v10915_v20 }
 0xc9b   : > { %v10925_v26 = vadd.f32 %v10924_v37, %v10923_v9 }
 0xc9c   : > { %v10933_v55 = vadd.f32 %v10720_v50, %v10719_v6  ;;  %v13140_v17 = vpop.f32.mrf.mxu1  ;;  %v10918_v13 = vrot.slane %v10917_v10, 1 }
 0xc9d   : > { %v10926_v14 = vrot.slane %v10925_v26, 2  ;;  %v10890_v35 = vadd.f32 %v13140_v17, %v10208_v0 }
 0xc9e   : > { %v10934_v15 = vrot.slane %v10933_v55, 4  ;;  %v10880_v34 = vpop.f32.mrf.mxu1  ;;  %v10919_v43 = vadd.f32 %v10918_v13, %v10917_v10 }
 0xc9f   : > { %v10889_v51 = vadd.f32 %v10880_v34, %v10207_v36  ;;  %v10927_v22 = vadd.f32 %v10926_v14, %v10925_v26 }
 0xca0   : > { %v10935_v52 = vadd.f32 %v10934_v15, %v10933_v55  ;;  %10920 = vst [vmem:[#allocation2] sm:$0x1] %v10919_v43 }
 0xca1   : > { %v10943_v21 = vadd.f32 %v10890_v35, %v10889_v51  ;;  %v10928_v3 = vrot.slane %v10927_v22, 1 }
 0xca2   : > { %v10936_v57 = vrot.slane %v10935_v52, 2 }
 0xca3   : > { %v10944_v24 = vrot.slane %v10943_v21, 4  ;;  %v10929_v58 = vadd.f32 %v10928_v3, %v10927_v22 }
 0xca4   : > { %v10937_v48 = vadd.f32 %v10936_v57, %v10935_v52 }
 0xca5   : > { %v10945_v18 = vadd.f32 %v10944_v24, %v10943_v21  ;;  %10930 = vst [vmem:[#allocation2 + $0x1] sm:$0x1] %v10929_v58 }
 0xca6   : > { %v10938_v4 = vrot.slane %v10937_v48, 1 }
 0xca7   : > { %v10946_v42 = vrot.slane %v10945_v18, 2 }
 0xca8   : > { %v10939_v23 = vadd.f32 %v10938_v4, %v10937_v48 }
 0xca9   : > { %v10947_v16 = vadd.f32 %v10946_v42, %v10945_v18 }
 0xcaa   : > { %10940 = vst [vmem:[#allocation2 + $0x2] sm:$0x1] %v10939_v23 }
 0xcab   : > { %v10948_v5 = vrot.slane %v10947_v16, 1 }
 0xcad   : > { %v10949_v12 = vadd.f32 %v10948_v5, %v10947_v16  ;;  %v11911_v16 = vld [vmem:[%s14440_s4] ss:$0 sm:$0xff] }
 0xcaf   : > { %10950 = vst [vmem:[#allocation2 + $0x3] sm:$0x1] %v10949_v12 }
 0xcb6   : > { %v10951_v28 = vld [vmem:[#allocation2] sm:$0xf] }
 0xcb7   : > { %13174 = vmatmul.mubr.f32.vlgmr.msra.gmra.mxu0 %v10951_v28 }
 0xd77   : > { %v11018_v30 = vpop.f32.mrf.mxu0 }
 0xd78   : > { %v11027_v32 = vrot.slane %v11018_v30, %v11026_v59  ;;  %v11045_v8 = vrot.slane %v11018_v30, %v11044_v39  ;;  %v11063_v11 = vrot.slane %v11018_v30, %v11062_v41  ;;  %v11081_v40 = vrot.slane %v11018_v30, %v11080_v54 }
 0xd79   : > { %v13175_v7 = vpop.f32.mrf.mxu0 }
 0xd7a   : > { %v14326_v46 = vsub.f32 %v14287_v27, %v11027_v32  ;;  %v14329_v45 = vsub.f32 %v14285_v44, %v11027_v32  ;;  %v14332_v63 = vsub.f32 %v14300_v19, %v11045_v8  ;;  %v14335_v20 = vsub.f32 %v14298_v47, %v11045_v8  ;;  %v11912_v8 = vld [vmem:[%s14441_s5] ss:$0 sm:$0xff] }
 0xd7b   : > { %v14337_v60 = vsub.f32 %v10719_v6, %v11063_v11  ;;  %v14339_v38 = vsub.f32 %v10720_v50, %v11063_v11  ;;  %v14341_v9 = vsub.f32 %v10889_v51, %v11081_v40  ;;  %v14343_v33 = vsub.f32 %v10890_v35, %v11081_v40 }
 0xd7c   : > { %v11030_v27 = vmul.f32 %v14326_v46, %v14326_v46  ;;  %v11031_v44 = vmul.f32 %v14329_v45, %v14329_v45  ;;  %v11048_v19 = vmul.f32 %v14332_v63, %v14332_v63  ;;  %v11049_v47 = vmul.f32 %v14335_v20, %v14335_v20 }
 0xd7d   : > { %v11066_v61 = vmul.f32 %v14337_v60, %v14337_v60  ;;  %v11067_v56 = vmul.f32 %v14339_v38, %v14339_v38  ;;  %v11084_v62 = vmul.f32 %v14341_v9, %v14341_v9  ;;  %v11085_v1 = vmul.f32 %v14343_v33, %v14343_v33 }
 0xd7e   : > { %v11032_v31 = vadd.f32 %v11031_v44, %v11030_v27  ;;  %v11050_v37 = vadd.f32 %v11049_v47, %v11048_v19 }
 0xd7f   : > { %v11068_v49 = vadd.f32 %v11067_v56, %v11066_v61  ;;  %v11086_v50 = vadd.f32 %v11085_v1, %v11084_v62 }
 0xd80   : > { %v11033_v6 = vrot.slane %v11032_v31, 4  ;;  %v11051_v10 = vrot.slane %v11050_v37, 4 }
 0xd81   : > { %v11069_v2 = vrot.slane %v11068_v49, 4  ;;  %v11087_v25 = vrot.slane %v11086_v50, 4 }
 0xd82   : > { %v11034_v26 = vadd.f32 %v11033_v6, %v11032_v31  ;;  %v11052_v55 = vadd.f32 %v11051_v10, %v11050_v37 }
 0xd83   : > { %v11070_v17 = vadd.f32 %v11069_v2, %v11068_v49  ;;  %v11088_v13 = vadd.f32 %v11087_v25, %v11086_v50 }
 0xd84   : > { %v11035_v0 = vrot.slane %v11034_v26, 2  ;;  %v11053_v36 = vrot.slane %v11052_v55, 2 }
 0xd85   : > { %v11071_v14 = vrot.slane %v11070_v17, 2  ;;  %v11089_v15 = vrot.slane %v11088_v13, 2 }
 0xd86   : > { %v11036_v34 = vadd.f32 %v11035_v0, %v11034_v26  ;;  %v11054_v43 = vadd.f32 %v11053_v36, %v11052_v55 }
 0xd87   : > { %v11072_v35 = vadd.f32 %v11071_v14, %v11070_v17  ;;  %v11090_v51 = vadd.f32 %v11089_v15, %v11088_v13 }
 0xd88   : > { %v11037_v22 = vrot.slane %v11036_v34, 1  ;;  %v11055_v52 = vrot.slane %v11054_v43, 1 }
 0xd89   : > { %v11073_v21 = vrot.slane %v11072_v35, 1  ;;  %v11091_v3 = vrot.slane %v11090_v51, 1 }
 0xd8a   : > { %v11038_v57 = vadd.f32 %v11037_v22, %v11036_v34  ;;  %v11056_v24 = vadd.f32 %v11055_v52, %v11054_v43 }
 0xd8b   : > { %v11074_v58 = vadd.f32 %v11073_v21, %v11072_v35  ;;  %v11092_v48 = vadd.f32 %v11091_v3, %v11090_v51 }
 0xd8c   : > { %11039 = vst [vmem:[#allocation2] sm:$0x1] %v11038_v57  ;;  %11057 = vst [vmem:[#allocation2 + $0x1] sm:$0x1] %v11056_v24 }
 0xd8d   : > { %11075 = vst [vmem:[#allocation2 + $0x2] sm:$0x1] %v11074_v58  ;;  %11093 = vst [vmem:[#allocation2 + $0x3] sm:$0x1] %v11092_v48 }
 0xd94   : > { %v11094_v18 = vld [vmem:[#allocation2] sm:$0xf] }
 0xd95   : > { %13209 = vmatmul.mubr.f32.vlgmr.msra.gmra.mxu1 %v11094_v18 }
 0xe55   : > { %v11161_v4 = vpop.f32.mrf.mxu1 }
 0xe56   : > { %v11162_v42 = vadd.f32 1e-05, %v11161_v4 }
 0xe57   : > { %v13210_v23 = vpop.f32.mrf.mxu1 }
 0xe58   : > { %13277 = vrsqrt.f32 %v11162_v42 }
 0xe65   : > { %v13278_v5 = vpop.eup %13277 }
 0xe66   : > { %v11172_v12 = vmul.f32 %v13278_v5, %v11911_v16 }
 0xe68   : > { %v11180_v28 = vrot.slane %v11172_v12, %v11026_v59  ;;  %v11202_v29 = vrot.slane %v11172_v12, %v11044_v39  ;;  %v11218_v30 = vrot.slane %v11172_v12, %v11062_v41  ;;  %v11234_v32 = vrot.slane %v11172_v12, %v11080_v54 }
 0xe6a   : > { %v11181_v11 = vmul.f32 %v11180_v28, %v14326_v46  ;;  %v11182_v40 = vmul.f32 %v11180_v28, %v14329_v45  ;;  %v11203_v7 = vmul.f32 %v11202_v29, %v14332_v63  ;;  %v11204_v59 = vmul.f32 %v11202_v29, %v14335_v20 }
 0xe6b   : > { %v11219_v39 = vmul.f32 %v11218_v30, %v14337_v60  ;;  %v11220_v27 = vmul.f32 %v11218_v30, %v14339_v38  ;;  %v11235_v41 = vmul.f32 %v11234_v32, %v14341_v9  ;;  %v11236_v53 = vmul.f32 %v11234_v32, %v14343_v33 }
 0xe6c   : > { %v11189_v54 = vadd.f32 %v11912_v8, %v11181_v11  ;;  %v11190_v44 = vadd.f32 %v11912_v8, %v11182_v40  ;;  %v11205_v46 = vadd.f32 %v11912_v8, %v11203_v7  ;;  %v11206_v19 = vadd.f32 %v11912_v8, %v11204_v59 }
 0xe6d   : > { %v11221_v45 = vadd.f32 %v11912_v8, %v11219_v39  ;;  %v11222_v47 = vadd.f32 %v11912_v8, %v11220_v27  ;;  %v11237_v63 = vadd.f32 %v11912_v8, %v11235_v41  ;;  %v11238_v61 = vadd.f32 %v11912_v8, %v11236_v53 }
 0xe6e   : > { %v11191_v20 = vmax.f32 %v11189_v54, 0.0  ;;  %v11192_v56 = vmax.f32 %v11190_v44, 0.0  ;;  %v11207_v60 = vmax.f32 %v11205_v46, 0.0  ;;  %v11208_v38 = vmax.f32 %v11206_v19, 0.0 }
 0xe6f   : > { %v11223_v9 = vmax.f32 %v11221_v45, 0.0  ;;  %v11224_v33 = vmax.f32 %v11222_v47, 0.0  ;;  %v11239_v62 = vmax.f32 %v11237_v63, 0.0  ;;  %v11240_v1 = vmax.f32 %v11238_v61, 0.0 }
 0xe70   : > { %11193 = vst [vmem:[%s295_s29] sm:$0xff] %v11191_v20  ;;  %11194 = vst [vmem:[%s295_s29 + $0x8] sm:$0xff] %v11192_v56 }
 0xe71   : > { %11915 = vst [vmem:[%s295_s29 + $0x10] sm:$0xff] %v11207_v60  ;;  %11916 = vst [vmem:[%s295_s29 + $0x18] sm:$0xff] %v11208_v38 }
 0xe72   : > { %11919 = vst [vmem:[%s295_s29 + $0x20] sm:$0xff] %v11223_v9  ;;  %11920 = vst [vmem:[%s295_s29 + $0x28] sm:$0xff] %v11224_v33 }
 0xe73   : > { %11923 = vst [vmem:[%s295_s29 + $0x30] sm:$0xff] %v11239_v62  ;;  %11924 = vst [vmem:[%s295_s29 + $0x38] sm:$0xff] %v11240_v1 }
 0xe74   : > { %13344 = shalt.err (!%p13341_p3)
}
 0xe75   : > { %s13345_s16 = scalar_lea.hbm %s14390_s12, 1024  ;;  %s13349_s20 = scalar_lea.hbm %s14442_s6, 2048 }
 0xe76   : > { %p13346_p2 = scmp.ne.s32.totalorder %s14390_s12, %s13345_s16  ;;  %p13350_p7 = scmp.lt.s32.totalorder %s14390_s12, %s14442_s6 }
 0xe77   : > { %p13351_p6 = scmp.lt.s32.totalorder %s13349_s20, %s13345_s16 }
 0xe78   : > { %p13347_p4 = pnand %p13346_p2, %p13483_p5 }
 0xe79   : > { %p13352_p9 = por %p13351_p6, %p13350_p7 }
 0xe7a   : > { %p13348_p13 = pneg %p13347_p4 }
 0xe7c   : > { %p13353_p10 = pnand %p13352_p9, %p13348_p13 }
 0xe7e   : > { %13356 = shalt.err (!%p13353_p10)
}
 0xe7f   : > { %s13408_s29 = smov 128   ;;  %s13409_s9 = smov 8  }
 0xe80   : > { %13219 = dma.vmem_to_hbm [thread:$0]  (%p13483_p5), %s14392_s10, 1024, %s14390_s12, %s14396_s25, %s13408_s29, %s13408_s29, %s13409_s9  }
 0xe81 PF: > { %p13236_p12 = scmp.ge.s32.totalorder %s13399_s24, 2  ;;  %s11273_s11 = sand.u32 1, %s13387_s21  }
 0xe82   : > { %p14452_p8 = scmp.ne.s32.totalorder %s14445_s8, 0  ;;  %s11274_s13 = scalar_lea.sflag [#allocation5], %s11273_s11 }
 0xe84   : > { %p13229_p11 = pnand %p13236_p12, %p14452_p8 }
 0xe86   : > { %p13230_p0 = pneg %p13229_p11 }
 0xe88   : > { %13382 = dma.done.wait (%p13230_p0), %s11274_s13, 1024  }
 0xe89   : > { %13384 = vsyncadd (%p13230_p0), %s11274_s13, 4294966272  ;;  %p18_p1 = scmp.ge.s32.totalorder %s13470_s27, 4   ;;  %s14453_s21 = smov %s13391_s22 }
 0xe8a   : > { %s14454_s22 = smov %s13395_s23  ;;  %s14455_s23 = smov %s13481_s30 }
 0xe8b   : > { %s14456_s24 = smov %s13470_s27  ;;  %20 = sbr.rel (!%p18_p1) target bundleno = 5 (0x5), region = 115 }
 0xe90   :  { %11279 = vsyncpa [#allocation4], 1 }
 0xe91   :  { %11281 = vsyncpa [#allocation4 + $0x1], 1 }
 0xe92   :  { %11282 = vsyncpa [#allocation7], 1 }
 0xe93   :  { %11283 = vsyncpa [#allocation5], 1 }
 0xe94   :  { %11285 = vsyncpa [#allocation5 + $0x1], 1 }

</bundles_post_ra>
